<compile_context>
chip_gen: v7x
topology: tpu7x:2x2x1
jax: 0.10.0
libtpu: 0.0.40
codegen_flags: <defaults>
</compile_context>

<pallas_src>
import jax
import jax.numpy as jnp
from jax.experimental import pallas as pl
from jax.experimental.pallas import tpu as pltpu


def _round_up(x, m):
    return (x + m - 1) // m * m


# ----------------------------- Pallas kernels -----------------------------

def _matmul_bias_relu_kernel(x_ref, w_ref, b_ref, o_ref):
    # Single K step (full-K block): no accumulator scratch, no init/finalize phases.
    acc = jnp.dot(x_ref[...], w_ref[...], preferred_element_type=jnp.float32)
    o_ref[...] = jnp.maximum(acc + b_ref[...], 0.0).astype(o_ref.dtype)


def matmul_bias_relu(x_bf16, w_bf16, b_f32):
    """relu(x @ w + b): bf16 inputs, f32 accumulate + epilogue.

    K and N are taken as single full blocks (max K here is 432, max N is 144, so the
    whole weight fits trivially in VMEM); only M is tiled, with pl.cdiv so no
    wrapper-side padding or output slicing is needed.
    """
    M, K = x_bf16.shape
    K2, N = w_bf16.shape
    assert K == K2
    tm = M if M <= 512 else 512  # full-M block for small layers, 512 rows otherwise
    return pl.pallas_call(
        _matmul_bias_relu_kernel,
        out_shape=jax.ShapeDtypeStruct((M, N), jnp.float32),
        grid=(pl.cdiv(M, tm),),
        in_specs=[
            pl.BlockSpec((tm, K), lambda i: (i, 0)),
            pl.BlockSpec((K, N), lambda i: (0, 0)),   # resident across M steps
            pl.BlockSpec((1, N), lambda i: (0, 0)),
        ],
        out_specs=pl.BlockSpec((tm, N), lambda i: (i, 0)),
        compiler_params=pltpu.CompilerParams(dimension_semantics=("parallel",)),
    )(x_bf16, w_bf16, b_f32)


def _abs_sum_kernel(a_ref, b_ref, o_ref):
    s = jnp.sum(jnp.abs(a_ref[...] - b_ref[...]))
    o_ref[...] = s[None, None]


def l1_weighted_sum(a_flat, b_flat):
    """sum(|a - b|) over pre-scaled flat vectors, in one Pallas reduction."""
    P = a_flat.shape[0]
    Pp = _round_up(P, 8 * 128)
    af = jnp.pad(a_flat, (0, Pp - P)).reshape(Pp // 128, 128)
    bf = jnp.pad(b_flat, (0, Pp - P)).reshape(Pp // 128, 128)
    R = Pp // 128
    s = pl.pallas_call(
        _abs_sum_kernel,
        out_shape=jax.ShapeDtypeStruct((1, 1), jnp.float32),
        grid=(1,),
        in_specs=[pl.BlockSpec((R, 128), lambda i: (0, 0)),
                  pl.BlockSpec((R, 128), lambda i: (0, 0))],
        out_specs=pl.BlockSpec((1, 1), lambda i: (0, 0)),
    )(af, bf)
    return s[0, 0]


# ------------------------- SlimNet backbone (glue) -------------------------

def maxpool_3x3_s2(x):
    """nn.MaxPool2d(3, 2) on NHWC via a fused jnp.maximum chain over the 9 strided
    views (XLA fuses the slices; no 9x stack is materialized in HBM)."""
    N, H, W, C = x.shape
    OH = (H - 3) // 2 + 1
    OW = (W - 3) // 2 + 1
    out = None
    for i in range(3):
        for j in range(3):
            v = x[:, i:i + 2 * OH - 1:2, j:j + 2 * OW - 1:2, :]
            out = v if out is None else jnp.maximum(out, v)
    return out


def conv2d_relu(x, p):
    """Conv2d (+ identity eval-mode BatchNorm) + ReLU via im2col + Pallas matmul."""
    kh, kw, stride, pad = p["kh"], p["kw"], p["stride"], p["pad"]
    if pad:
        x = jnp.pad(x, ((0, 0), (pad, pad), (pad, pad), (0, 0)))
    N, H, W, C = x.shape
    OH = (H - kh) // stride + 1
    OW = (W - kw) // stride + 1
    if kh == 1 and kw == 1 and stride == 1:
        patches = x.reshape(N * OH * OW, C)              # free view, no copy
    else:
        cols = []
        for i in range(kh):
            for j in range(kw):
                cols.append(x[:, i:i + stride * (OH - 1) + 1:stride,
                               j:j + stride * (OW - 1) + 1:stride, :])
        patches = jnp.concatenate(cols, axis=-1).reshape(N * OH * OW, kh * kw * C)
    y = matmul_bias_relu(patches.astype(jnp.bfloat16), p["w"], p["b"])
    return y.reshape(N, OH, OW, -1)


def _he_weight(key, fan_in, shape):
    return jax.random.normal(key, shape, jnp.float32) * (2.0 / fan_in) ** 0.5


def _conv_params(key, kh, kw, cin, cout, stride=1, pad=0):
    w = _he_weight(key, kh * kw * cin, (kh * kw * cin, cout))
    return dict(w=w.astype(jnp.bfloat16), b=jnp.zeros((1, cout), jnp.float32),
                kh=kh, kw=kw, stride=stride, pad=pad)


def _slim_params(key, cin, cout):
    """1x1 squeeze + fused expand: e1 (1x1) is embedded at the centre tap of a 3x3
    kernel so e1|e2|e3 become ONE conv with 3*cout output channels (channel order
    [e1, e2, e3] preserved, matching the original concatenation)."""
    k = jax.random.split(key, 4)
    squeeze = _conv_params(k[0], 1, 1, cin, cout)
    w1 = _he_weight(k[1], cout, (cout, cout))               # e1: 1x1
    w2 = _he_weight(k[2], 9 * cout, (9 * cout, cout))       # e2: 3x3
    w3 = _he_weight(k[3], 9 * cout, (9 * cout, cout))       # e3: 3x3
    we = jnp.zeros((9 * cout, 3 * cout), jnp.float32)
    we = we.at[4 * cout:5 * cout, 0:cout].set(w1)           # centre tap (i=1, j=1)
    we = we.at[:, cout:2 * cout].set(w2)
    we = we.at[:, 2 * cout:3 * cout].set(w3)
    expand = dict(w=we.astype(jnp.bfloat16),
                  b=jnp.zeros((1, 3 * cout), jnp.float32),
                  kh=3, kw=3, stride=1, pad=1)
    return dict(squeeze=squeeze, expand=expand)


def init_slimnet_params(key, filter_count_values=(16, 32, 48, 64),
                        initial_conv=(96, 7, 2)):
    k = jax.random.split(key, 4)
    f = filter_count_values
    return dict(
        conv1=_conv_params(k[0], initial_conv[1], initial_conv[1], 3,
                           initial_conv[0], stride=initial_conv[2]),
        slim1=_slim_params(k[1], initial_conv[0], f[0]),
        slim2=_slim_params(k[2], f[0] * 3, f[1]),
        slim3=_slim_params(k[3], f[1] * 3, f[2]),
        # slim4 / fc parameters exist in SlimNet but never influence FACloss output.
    )


def slim_forward(x, p):
    s = conv2d_relu(x, p["squeeze"])
    return conv2d_relu(s, p["expand"])   # fused e1|e2|e3 in one Pallas matmul


def slimnet_features(params, x_nchw):
    x = jnp.transpose(x_nchw, (0, 2, 3, 1))  # NCHW -> NHWC
    out = maxpool_3x3_s2(conv2d_relu(x, params["conv1"]))
    f0 = out
    out = maxpool_3x3_s2(slim_forward(out, params["slim1"]))
    f1 = out
    out = maxpool_3x3_s2(slim_forward(out, params["slim2"]))
    f2 = out
    out = maxpool_3x3_s2(slim_forward(out, params["slim3"]))
    f3 = out
    return [f0, f1, f2, f3]


def fac_loss(params, y_hat, y):
    # Run the backbone ONCE on [y_hat; y], then split the features.
    x = jnp.concatenate([y_hat, y], axis=0)
    feats = slimnet_features(params, x)            # .detach() is a no-op for the value
    B = y_hat.shape[0]
    a_parts, b_parts = [], []
    for f in feats:
        fh, fg = f[:B], f[B:]
        w = jnp.float32(1.0 / fh.size)             # mean_j = (1/n_j) * sum|fh - fg|
        a_parts.append((fh * w).reshape(-1))
        b_parts.append((fg * w).reshape(-1))
    # Single fused reduction over all four (pre-scaled) feature diffs.
    return l1_weighted_sum(jnp.concatenate(a_parts), jnp.concatenate(b_parts))


if __name__ == "__main__":
    key = jax.random.PRNGKey(0)
    kp, ky1, ky2 = jax.random.split(key, 3)
    params = init_slimnet_params(kp)
    # 80x80 input survives conv1(7,s2) + 4 x MaxPool2d(3,2): feature spatial sizes
    # 37 -> 18 -> 8 -> 3 -> 1.
    y_hat = jax.random.normal(ky1, (2, 3, 80, 80), jnp.float32)
    y = jax.random.normal(ky2, (2, 3, 80, 80), jnp.float32)

    loss_fn = jax.jit(lambda yh, yy: fac_loss(params, yh, yy))
    loss = loss_fn(y_hat, y)
    jax.block_until_ready(loss)
    print("KERNEL_OK")
</pallas_src>

<mosaic_0001>
module attributes {stable_mosaic.version = 11 : i64} {
  func.func @_matmul_bias_relu_kernel(%arg0: i32, %arg1: memref<512x147xbf16, #tpu.memory_space<vmem>>, %arg2: memref<147x96xbf16, #tpu.memory_space<vmem>>, %arg3: memref<1x96xf32, #tpu.memory_space<vmem>>, %arg4: memref<512x96xf32, #tpu.memory_space<vmem>>) attributes {dimension_semantics = [#tpu.dimension_semantics<parallel>], iteration_bounds = array<i64: 11>, scalar_prefetch = 0 : i64, scratch_operands = 0 : i64, tpu.core_type = #tpu.core_type<tc>, window_params = [{transform_indices = @transform_0, window_bounds = array<i64: 512, 147>}, {pipeline_mode = #tpu.pipeline_mode<synchronous>, transform_indices = @transform_1, window_bounds = array<i64: 147, 96>}, {pipeline_mode = #tpu.pipeline_mode<synchronous>, transform_indices = @transform_2, window_bounds = array<i64: 1, 96>}, {transform_indices = @transform_3, window_bounds = array<i64: 512, 96>}]} {
    %c0 = arith.constant 0 : index
    %c0_0 = arith.constant 0 : index
    %0 = vector.load %arg1[%c0, %c0_0] : memref<512x147xbf16, #tpu.memory_space<vmem>>, vector<512x147xbf16>
    %c0_1 = arith.constant 0 : index
    %c0_2 = arith.constant 0 : index
    %1 = vector.load %arg2[%c0_1, %c0_2] : memref<147x96xbf16, #tpu.memory_space<vmem>>, vector<147x96xbf16>
    %cst = arith.constant dense<0.000000e+00> : vector<512x96xf32>
    %2 = tpu.matmul %0, %1, %cst {dimension_numbers = #tpu.dot_dimension_numbers<[1], [0], [0], [1], [0, 0, 1, 1], [], []>} : vector<512x147xbf16>, vector<147x96xbf16>, vector<512x96xf32> -> vector<512x96xf32>
    %c0_3 = arith.constant 0 : index
    %c0_4 = arith.constant 0 : index
    %3 = vector.load %arg3[%c0_3, %c0_4] : memref<1x96xf32, #tpu.memory_space<vmem>>, vector<1x96xf32>
    %4 = vector.broadcast %3 : vector<1x96xf32> to vector<512x96xf32>
    %5 = arith.addf %2, %4 : vector<512x96xf32>
    %cst_5 = arith.constant 0.000000e+00 : f32
    %6 = vector.broadcast %cst_5 : f32 to vector<512x96xf32>
    %7 = arith.maximumf %5, %6 : vector<512x96xf32>
    %c0_6 = arith.constant 0 : index
    %c0_7 = arith.constant 0 : index
    %8 = vector.load %arg4[%c0_6, %c0_7] : memref<512x96xf32, #tpu.memory_space<vmem>>, vector<512x96xf32>
    tpu.vector_store %arg4[%c0_6, %c0_7], %7 {strides = array<i32>} : memref<512x96xf32, #tpu.memory_space<vmem>>, vector<512x96xf32>,
    return
  }
  func.func @transform_0(%arg0: i32) -> (i32, i32) {
    %c0_i32 = arith.constant 0 : i32
    %c0_i32_0 = arith.constant 0 : i32
    return %arg0, %c0_i32 : i32, i32
  }
  func.func @transform_1(%arg0: i32) -> (i32, i32) {
    %c0_i32 = arith.constant 0 : i32
    %c0_i32_0 = arith.constant 0 : i32
    %c0_i32_1 = arith.constant 0 : i32
    return %c0_i32, %c0_i32_0 : i32, i32
  }
  func.func @transform_2(%arg0: i32) -> (i32, i32) {
    %c0_i32 = arith.constant 0 : i32
    %c0_i32_0 = arith.constant 0 : i32
    %c0_i32_1 = arith.constant 0 : i32
    return %c0_i32, %c0_i32_0 : i32, i32
  }
  func.func @transform_3(%arg0: i32) -> (i32, i32) {
    %c0_i32 = arith.constant 0 : i32
    %c0_i32_0 = arith.constant 0 : i32
    return %arg0, %c0_i32 : i32, i32
  }
}

module attributes {stable_mosaic.version = 11 : i64} {
  func.func @_matmul_bias_relu_kernel(%arg0: i32, %arg1: memref<512x96xbf16, #tpu.memory_space<vmem>>, %arg2: memref<96x16xbf16, #tpu.memory_space<vmem>>, %arg3: memref<1x16xf32, #tpu.memory_space<vmem>>, %arg4: memref<512x16xf32, #tpu.memory_space<vmem>>) attributes {dimension_semantics = [#tpu.dimension_semantics<parallel>], iteration_bounds = array<i64: 3>, scalar_prefetch = 0 : i64, scratch_operands = 0 : i64, tpu.core_type = #tpu.core_type<tc>, window_params = [{transform_indices = @transform_0, window_bounds = array<i64: 512, 96>}, {pipeline_mode = #tpu.pipeline_mode<synchronous>, transform_indices = @transform_1, window_bounds = array<i64: 96, 16>}, {pipeline_mode = #tpu.pipeline_mode<synchronous>, transform_indices = @transform_2, window_bounds = array<i64: 1, 16>}, {transform_indices = @transform_3, window_bounds = array<i64: 512, 16>}]} {
    %c0 = arith.constant 0 : index
    %c0_0 = arith.constant 0 : index
    %0 = vector.load %arg1[%c0, %c0_0] : memref<512x96xbf16, #tpu.memory_space<vmem>>, vector<512x96xbf16>
    %c0_1 = arith.constant 0 : index
    %c0_2 = arith.constant 0 : index
    %1 = vector.load %arg2[%c0_1, %c0_2] : memref<96x16xbf16, #tpu.memory_space<vmem>>, vector<96x16xbf16>
    %cst = arith.constant dense<0.000000e+00> : vector<512x16xf32>
    %2 = tpu.matmul %0, %1, %cst {dimension_numbers = #tpu.dot_dimension_numbers<[1], [0], [0], [1], [0, 0, 1, 1], [], []>} : vector<512x96xbf16>, vector<96x16xbf16>, vector<512x16xf32> -> vector<512x16xf32>
    %c0_3 = arith.constant 0 : index
    %c0_4 = arith.constant 0 : index
    %3 = vector.load %arg3[%c0_3, %c0_4] : memref<1x16xf32, #tpu.memory_space<vmem>>, vector<1x16xf32>
    %4 = vector.broadcast %3 : vector<1x16xf32> to vector<512x16xf32>
    %5 = arith.addf %2, %4 : vector<512x16xf32>
    %cst_5 = arith.constant 0.000000e+00 : f32
    %6 = vector.broadcast %cst_5 : f32 to vector<512x16xf32>
    %7 = arith.maximumf %5, %6 : vector<512x16xf32>
    %c0_6 = arith.constant 0 : index
    %c0_7 = arith.constant 0 : index
    %8 = vector.load %arg4[%c0_6, %c0_7] : memref<512x16xf32, #tpu.memory_space<vmem>>, vector<512x16xf32>
    tpu.vector_store %arg4[%c0_6, %c0_7], %7 {strides = array<i32>} : memref<512x16xf32, #tpu.memory_space<vmem>>, vector<512x16xf32>,
    return
  }
  func.func @transform_0(%arg0: i32) -> (i32, i32) {
    %c0_i32 = arith.constant 0 : i32
    %c0_i32_0 = arith.constant 0 : i32
    return %arg0, %c0_i32 : i32, i32
  }
  func.func @transform_1(%arg0: i32) -> (i32, i32) {
    %c0_i32 = arith.constant 0 : i32
    %c0_i32_0 = arith.constant 0 : i32
    %c0_i32_1 = arith.constant 0 : i32
    return %c0_i32, %c0_i32_0 : i32, i32
  }
  func.func @transform_2(%arg0: i32) -> (i32, i32) {
    %c0_i32 = arith.constant 0 : i32
    %c0_i32_0 = arith.constant 0 : i32
    %c0_i32_1 = arith.constant 0 : i32
    return %c0_i32, %c0_i32_0 : i32, i32
  }
  func.func @transform_3(%arg0: i32) -> (i32, i32) {
    %c0_i32 = arith.constant 0 : i32
    %c0_i32_0 = arith.constant 0 : i32
    return %arg0, %c0_i32 : i32, i32
  }
}

module attributes {stable_mosaic.version = 11 : i64} {
  func.func @_matmul_bias_relu_kernel(%arg0: i32, %arg1: memref<512x144xbf16, #tpu.memory_space<vmem>>, %arg2: memref<144x48xbf16, #tpu.memory_space<vmem>>, %arg3: memref<1x48xf32, #tpu.memory_space<vmem>>, %arg4: memref<512x48xf32, #tpu.memory_space<vmem>>) attributes {dimension_semantics = [#tpu.dimension_semantics<parallel>], iteration_bounds = array<i64: 3>, scalar_prefetch = 0 : i64, scratch_operands = 0 : i64, tpu.core_type = #tpu.core_type<tc>, window_params = [{transform_indices = @transform_0, window_bounds = array<i64: 512, 144>}, {pipeline_mode = #tpu.pipeline_mode<synchronous>, transform_indices = @transform_1, window_bounds = array<i64: 144, 48>}, {pipeline_mode = #tpu.pipeline_mode<synchronous>, transform_indices = @transform_2, window_bounds = array<i64: 1, 48>}, {transform_indices = @transform_3, window_bounds = array<i64: 512, 48>}]} {
    %c0 = arith.constant 0 : index
    %c0_0 = arith.constant 0 : index
    %0 = vector.load %arg1[%c0, %c0_0] : memref<512x144xbf16, #tpu.memory_space<vmem>>, vector<512x144xbf16>
    %c0_1 = arith.constant 0 : index
    %c0_2 = arith.constant 0 : index
    %1 = vector.load %arg2[%c0_1, %c0_2] : memref<144x48xbf16, #tpu.memory_space<vmem>>, vector<144x48xbf16>
    %cst = arith.constant dense<0.000000e+00> : vector<512x48xf32>
    %2 = tpu.matmul %0, %1, %cst {dimension_numbers = #tpu.dot_dimension_numbers<[1], [0], [0], [1], [0, 0, 1, 1], [], []>} : vector<512x144xbf16>, vector<144x48xbf16>, vector<512x48xf32> -> vector<512x48xf32>
    %c0_3 = arith.constant 0 : index
    %c0_4 = arith.constant 0 : index
    %3 = vector.load %arg3[%c0_3, %c0_4] : memref<1x48xf32, #tpu.memory_space<vmem>>, vector<1x48xf32>
    %4 = vector.broadcast %3 : vector<1x48xf32> to vector<512x48xf32>
    %5 = arith.addf %2, %4 : vector<512x48xf32>
    %cst_5 = arith.constant 0.000000e+00 : f32
    %6 = vector.broadcast %cst_5 : f32 to vector<512x48xf32>
    %7 = arith.maximumf %5, %6 : vector<512x48xf32>
    %c0_6 = arith.constant 0 : index
    %c0_7 = arith.constant 0 : index
    %8 = vector.load %arg4[%c0_6, %c0_7] : memref<512x48xf32, #tpu.memory_space<vmem>>, vector<512x48xf32>
    tpu.vector_store %arg4[%c0_6, %c0_7], %7 {strides = array<i32>} : memref<512x48xf32, #tpu.memory_space<vmem>>, vector<512x48xf32>,
    return
  }
  func.func @transform_0(%arg0: i32) -> (i32, i32) {
    %c0_i32 = arith.constant 0 : i32
    %c0_i32_0 = arith.constant 0 : i32
    return %arg0, %c0_i32 : i32, i32
  }
  func.func @transform_1(%arg0: i32) -> (i32, i32) {
    %c0_i32 = arith.constant 0 : i32
    %c0_i32_0 = arith.constant 0 : i32
    %c0_i32_1 = arith.constant 0 : i32
    return %c0_i32, %c0_i32_0 : i32, i32
  }
  func.func @transform_2(%arg0: i32) -> (i32, i32) {
    %c0_i32 = arith.constant 0 : i32
    %c0_i32_0 = arith.constant 0 : i32
    %c0_i32_1 = arith.constant 0 : i32
    return %c0_i32, %c0_i32_0 : i32, i32
  }
  func.func @transform_3(%arg0: i32) -> (i32, i32) {
    %c0_i32 = arith.constant 0 : i32
    %c0_i32_0 = arith.constant 0 : i32
    return %arg0, %c0_i32 : i32, i32
  }
}

module attributes {stable_mosaic.version = 11 : i64} {
  func.func @_matmul_bias_relu_kernel(%arg0: i32, %arg1: memref<256x48xbf16, #tpu.memory_space<vmem>>, %arg2: memref<48x32xbf16, #tpu.memory_space<vmem>>, %arg3: memref<1x32xf32, #tpu.memory_space<vmem>>, %arg4: memref<256x32xf32, #tpu.memory_space<vmem>>) attributes {dimension_semantics = [#tpu.dimension_semantics<parallel>], iteration_bounds = array<i64: 1>, scalar_prefetch = 0 : i64, scratch_operands = 0 : i64, tpu.core_type = #tpu.core_type<tc>, window_params = [{transform_indices = @transform_0, window_bounds = array<i64: 256, 48>}, {pipeline_mode = #tpu.pipeline_mode<synchronous>, transform_indices = @transform_1, window_bounds = array<i64: 48, 32>}, {pipeline_mode = #tpu.pipeline_mode<synchronous>, transform_indices = @transform_2, window_bounds = array<i64: 1, 32>}, {transform_indices = @transform_3, window_bounds = array<i64: 256, 32>}]} {
    %c0 = arith.constant 0 : index
    %c0_0 = arith.constant 0 : index
    %0 = vector.load %arg1[%c0, %c0_0] : memref<256x48xbf16, #tpu.memory_space<vmem>>, vector<256x48xbf16>
    %c0_1 = arith.constant 0 : index
    %c0_2 = arith.constant 0 : index
    %1 = vector.load %arg2[%c0_1, %c0_2] : memref<48x32xbf16, #tpu.memory_space<vmem>>, vector<48x32xbf16>
    %cst = arith.constant dense<0.000000e+00> : vector<256x32xf32>
    %2 = tpu.matmul %0, %1, %cst {dimension_numbers = #tpu.dot_dimension_numbers<[1], [0], [0], [1], [0, 0, 1, 1], [], []>} : vector<256x48xbf16>, vector<48x32xbf16>, vector<256x32xf32> -> vector<256x32xf32>
    %c0_3 = arith.constant 0 : index
    %c0_4 = arith.constant 0 : index
    %3 = vector.load %arg3[%c0_3, %c0_4] : memref<1x32xf32, #tpu.memory_space<vmem>>, vector<1x32xf32>
    %4 = vector.broadcast %3 : vector<1x32xf32> to vector<256x32xf32>
    %5 = arith.addf %2, %4 : vector<256x32xf32>
    %cst_5 = arith.constant 0.000000e+00 : f32
    %6 = vector.broadcast %cst_5 : f32 to vector<256x32xf32>
    %7 = arith.maximumf %5, %6 : vector<256x32xf32>
    %c0_6 = arith.constant 0 : index
    %c0_7 = arith.constant 0 : index
    %8 = vector.load %arg4[%c0_6, %c0_7] : memref<256x32xf32, #tpu.memory_space<vmem>>, vector<256x32xf32>
    tpu.vector_store %arg4[%c0_6, %c0_7], %7 {strides = array<i32>} : memref<256x32xf32, #tpu.memory_space<vmem>>, vector<256x32xf32>,
    return
  }
  func.func @transform_0(%arg0: i32) -> (i32, i32) {
    %c0_i32 = arith.constant 0 : i32
    %c0_i32_0 = arith.constant 0 : i32
    return %arg0, %c0_i32 : i32, i32
  }
  func.func @transform_1(%arg0: i32) -> (i32, i32) {
    %c0_i32 = arith.constant 0 : i32
    %c0_i32_0 = arith.constant 0 : i32
    %c0_i32_1 = arith.constant 0 : i32
    return %c0_i32, %c0_i32_0 : i32, i32
  }
  func.func @transform_2(%arg0: i32) -> (i32, i32) {
    %c0_i32 = arith.constant 0 : i32
    %c0_i32_0 = arith.constant 0 : i32
    %c0_i32_1 = arith.constant 0 : i32
    return %c0_i32, %c0_i32_0 : i32, i32
  }
  func.func @transform_3(%arg0: i32) -> (i32, i32) {
    %c0_i32 = arith.constant 0 : i32
    %c0_i32_0 = arith.constant 0 : i32
    return %arg0, %c0_i32 : i32, i32
  }
}

module attributes {stable_mosaic.version = 11 : i64} {
  func.func @_matmul_bias_relu_kernel(%arg0: i32, %arg1: memref<256x288xbf16, #tpu.memory_space<vmem>>, %arg2: memref<288x96xbf16, #tpu.memory_space<vmem>>, %arg3: memref<1x96xf32, #tpu.memory_space<vmem>>, %arg4: memref<256x96xf32, #tpu.memory_space<vmem>>) attributes {dimension_semantics = [#tpu.dimension_semantics<parallel>], iteration_bounds = array<i64: 1>, scalar_prefetch = 0 : i64, scratch_operands = 0 : i64, tpu.core_type = #tpu.core_type<tc>, window_params = [{transform_indices = @transform_0, window_bounds = array<i64: 256, 288>}, {pipeline_mode = #tpu.pipeline_mode<synchronous>, transform_indices = @transform_1, window_bounds = array<i64: 288, 96>}, {pipeline_mode = #tpu.pipeline_mode<synchronous>, transform_indices = @transform_2, window_bounds = array<i64: 1, 96>}, {transform_indices = @transform_3, window_bounds = array<i64: 256, 96>}]} {
    %c0 = arith.constant 0 : index
    %c0_0 = arith.constant 0 : index
    %0 = vector.load %arg1[%c0, %c0_0] : memref<256x288xbf16, #tpu.memory_space<vmem>>, vector<256x288xbf16>
    %c0_1 = arith.constant 0 : index
    %c0_2 = arith.constant 0 : index
    %1 = vector.load %arg2[%c0_1, %c0_2] : memref<288x96xbf16, #tpu.memory_space<vmem>>, vector<288x96xbf16>
    %cst = arith.constant dense<0.000000e+00> : vector<256x96xf32>
    %2 = tpu.matmul %0, %1, %cst {dimension_numbers = #tpu.dot_dimension_numbers<[1], [0], [0], [1], [0, 0, 1, 1], [], []>} : vector<256x288xbf16>, vector<288x96xbf16>, vector<256x96xf32> -> vector<256x96xf32>
    %c0_3 = arith.constant 0 : index
    %c0_4 = arith.constant 0 : index
    %3 = vector.load %arg3[%c0_3, %c0_4] : memref<1x96xf32, #tpu.memory_space<vmem>>, vector<1x96xf32>
    %4 = vector.broadcast %3 : vector<1x96xf32> to vector<256x96xf32>
    %5 = arith.addf %2, %4 : vector<256x96xf32>
    %cst_5 = arith.constant 0.000000e+00 : f32
    %6 = vector.broadcast %cst_5 : f32 to vector<256x96xf32>
    %7 = arith.maximumf %5, %6 : vector<256x96xf32>
    %c0_6 = arith.constant 0 : index
    %c0_7 = arith.constant 0 : index
    %8 = vector.load %arg4[%c0_6, %c0_7] : memref<256x96xf32, #tpu.memory_space<vmem>>, vector<256x96xf32>
    tpu.vector_store %arg4[%c0_6, %c0_7], %7 {strides = array<i32>} : memref<256x96xf32, #tpu.memory_space<vmem>>, vector<256x96xf32>,
    return
  }
  func.func @transform_0(%arg0: i32) -> (i32, i32) {
    %c0_i32 = arith.constant 0 : i32
    %c0_i32_0 = arith.constant 0 : i32
    return %arg0, %c0_i32 : i32, i32
  }
  func.func @transform_1(%arg0: i32) -> (i32, i32) {
    %c0_i32 = arith.constant 0 : i32
    %c0_i32_0 = arith.constant 0 : i32
    %c0_i32_1 = arith.constant 0 : i32
    return %c0_i32, %c0_i32_0 : i32, i32
  }
  func.func @transform_2(%arg0: i32) -> (i32, i32) {
    %c0_i32 = arith.constant 0 : i32
    %c0_i32_0 = arith.constant 0 : i32
    %c0_i32_1 = arith.constant 0 : i32
    return %c0_i32, %c0_i32_0 : i32, i32
  }
  func.func @transform_3(%arg0: i32) -> (i32, i32) {
    %c0_i32 = arith.constant 0 : i32
    %c0_i32_0 = arith.constant 0 : i32
    return %arg0, %c0_i32 : i32, i32
  }
}

module attributes {stable_mosaic.version = 11 : i64} {
  func.func @_matmul_bias_relu_kernel(%arg0: i32, %arg1: memref<36x96xbf16, #tpu.memory_space<vmem>>, %arg2: memref<96x48xbf16, #tpu.memory_space<vmem>>, %arg3: memref<1x48xf32, #tpu.memory_space<vmem>>, %arg4: memref<36x48xf32, #tpu.memory_space<vmem>>) attributes {dimension_semantics = [#tpu.dimension_semantics<parallel>], iteration_bounds = array<i64: 1>, scalar_prefetch = 0 : i64, scratch_operands = 0 : i64, tpu.core_type = #tpu.core_type<tc>, window_params = [{transform_indices = @transform_0, window_bounds = array<i64: 36, 96>}, {pipeline_mode = #tpu.pipeline_mode<synchronous>, transform_indices = @transform_1, window_bounds = array<i64: 96, 48>}, {pipeline_mode = #tpu.pipeline_mode<synchronous>, transform_indices = @transform_2, window_bounds = array<i64: 1, 48>}, {transform_indices = @transform_3, window_bounds = array<i64: 36, 48>}]} {
    %c0 = arith.constant 0 : index
    %c0_0 = arith.constant 0 : index
    %0 = vector.load %arg1[%c0, %c0_0] : memref<36x96xbf16, #tpu.memory_space<vmem>>, vector<36x96xbf16>
    %c0_1 = arith.constant 0 : index
    %c0_2 = arith.constant 0 : index
    %1 = vector.load %arg2[%c0_1, %c0_2] : memref<96x48xbf16, #tpu.memory_space<vmem>>, vector<96x48xbf16>
    %cst = arith.constant dense<0.000000e+00> : vector<36x48xf32>
    %2 = tpu.matmul %0, %1, %cst {dimension_numbers = #tpu.dot_dimension_numbers<[1], [0], [0], [1], [0, 0, 1, 1], [], []>} : vector<36x96xbf16>, vector<96x48xbf16>, vector<36x48xf32> -> vector<36x48xf32>
    %c0_3 = arith.constant 0 : index
    %c0_4 = arith.constant 0 : index
    %3 = vector.load %arg3[%c0_3, %c0_4] : memref<1x48xf32, #tpu.memory_space<vmem>>, vector<1x48xf32>
    %4 = vector.broadcast %3 : vector<1x48xf32> to vector<36x48xf32>
    %5 = arith.addf %2, %4 : vector<36x48xf32>
    %cst_5 = arith.constant 0.000000e+00 : f32
    %6 = vector.broadcast %cst_5 : f32 to vector<36x48xf32>
    %7 = arith.maximumf %5, %6 : vector<36x48xf32>
    %c0_6 = arith.constant 0 : index
    %c0_7 = arith.constant 0 : index
    %8 = vector.load %arg4[%c0_6, %c0_7] : memref<36x48xf32, #tpu.memory_space<vmem>>, vector<36x48xf32>
    tpu.vector_store %arg4[%c0_6, %c0_7], %7 {strides = array<i32>} : memref<36x48xf32, #tpu.memory_space<vmem>>, vector<36x48xf32>,
    return
  }
  func.func @transform_0(%arg0: i32) -> (i32, i32) {
    %c0_i32 = arith.constant 0 : i32
    %c0_i32_0 = arith.constant 0 : i32
    return %arg0, %c0_i32 : i32, i32
  }
  func.func @transform_1(%arg0: i32) -> (i32, i32) {
    %c0_i32 = arith.constant 0 : i32
    %c0_i32_0 = arith.constant 0 : i32
    %c0_i32_1 = arith.constant 0 : i32
    return %c0_i32, %c0_i32_0 : i32, i32
  }
  func.func @transform_2(%arg0: i32) -> (i32, i32) {
    %c0_i32 = arith.constant 0 : i32
    %c0_i32_0 = arith.constant 0 : i32
    %c0_i32_1 = arith.constant 0 : i32
    return %c0_i32, %c0_i32_0 : i32, i32
  }
  func.func @transform_3(%arg0: i32) -> (i32, i32) {
    %c0_i32 = arith.constant 0 : i32
    %c0_i32_0 = arith.constant 0 : i32
    return %arg0, %c0_i32 : i32, i32
  }
}

module attributes {stable_mosaic.version = 11 : i64} {
  func.func @_matmul_bias_relu_kernel(%arg0: i32, %arg1: memref<36x432xbf16, #tpu.memory_space<vmem>>, %arg2: memref<432x144xbf16, #tpu.memory_space<vmem>>, %arg3: memref<1x144xf32, #tpu.memory_space<vmem>>, %arg4: memref<36x144xf32, #tpu.memory_space<vmem>>) attributes {dimension_semantics = [#tpu.dimension_semantics<parallel>], iteration_bounds = array<i64: 1>, scalar_prefetch = 0 : i64, scratch_operands = 0 : i64, tpu.core_type = #tpu.core_type<tc>, window_params = [{transform_indices = @transform_0, window_bounds = array<i64: 36, 432>}, {pipeline_mode = #tpu.pipeline_mode<synchronous>, transform_indices = @transform_1, window_bounds = array<i64: 432, 144>}, {pipeline_mode = #tpu.pipeline_mode<synchronous>, transform_indices = @transform_2, window_bounds = array<i64: 1, 144>}, {transform_indices = @transform_3, window_bounds = array<i64: 36, 144>}]} {
    %c0 = arith.constant 0 : index
    %c0_0 = arith.constant 0 : index
    %0 = vector.load %arg1[%c0, %c0_0] : memref<36x432xbf16, #tpu.memory_space<vmem>>, vector<36x432xbf16>
    %c0_1 = arith.constant 0 : index
    %c0_2 = arith.constant 0 : index
    %1 = vector.load %arg2[%c0_1, %c0_2] : memref<432x144xbf16, #tpu.memory_space<vmem>>, vector<432x144xbf16>
    %cst = arith.constant dense<0.000000e+00> : vector<36x144xf32>
    %2 = tpu.matmul %0, %1, %cst {dimension_numbers = #tpu.dot_dimension_numbers<[1], [0], [0], [1], [0, 0, 1, 1], [], []>} : vector<36x432xbf16>, vector<432x144xbf16>, vector<36x144xf32> -> vector<36x144xf32>
    %c0_3 = arith.constant 0 : index
    %c0_4 = arith.constant 0 : index
    %3 = vector.load %arg3[%c0_3, %c0_4] : memref<1x144xf32, #tpu.memory_space<vmem>>, vector<1x144xf32>
    %4 = vector.broadcast %3 : vector<1x144xf32> to vector<36x144xf32>
    %5 = arith.addf %2, %4 : vector<36x144xf32>
    %cst_5 = arith.constant 0.000000e+00 : f32
    %6 = vector.broadcast %cst_5 : f32 to vector<36x144xf32>
    %7 = arith.maximumf %5, %6 : vector<36x144xf32>
    %c0_6 = arith.constant 0 : index
    %c0_7 = arith.constant 0 : index
    %8 = vector.load %arg4[%c0_6, %c0_7] : memref<36x144xf32, #tpu.memory_space<vmem>>, vector<36x144xf32>
    tpu.vector_store %arg4[%c0_6, %c0_7], %7 {strides = array<i32>} : memref<36x144xf32, #tpu.memory_space<vmem>>, vector<36x144xf32>,
    return
  }
  func.func @transform_0(%arg0: i32) -> (i32, i32) {
    %c0_i32 = arith.constant 0 : i32
    %c0_i32_0 = arith.constant 0 : i32
    return %arg0, %c0_i32 : i32, i32
  }
  func.func @transform_1(%arg0: i32) -> (i32, i32) {
    %c0_i32 = arith.constant 0 : i32
    %c0_i32_0 = arith.constant 0 : i32
    %c0_i32_1 = arith.constant 0 : i32
    return %c0_i32, %c0_i32_0 : i32, i32
  }
  func.func @transform_2(%arg0: i32) -> (i32, i32) {
    %c0_i32 = arith.constant 0 : i32
    %c0_i32_0 = arith.constant 0 : i32
    %c0_i32_1 = arith.constant 0 : i32
    return %c0_i32, %c0_i32_0 : i32, i32
  }
  func.func @transform_3(%arg0: i32) -> (i32, i32) {
    %c0_i32 = arith.constant 0 : i32
    %c0_i32_0 = arith.constant 0 : i32
    return %arg0, %c0_i32 : i32, i32
  }
}

module attributes {stable_mosaic.version = 11 : i64} {
  func.func @_abs_sum_kernel(%arg0: i32, %arg1: memref<552x128xf32, #tpu.memory_space<vmem>>, %arg2: memref<552x128xf32, #tpu.memory_space<vmem>>, %arg3: memref<1x1xf32, #tpu.memory_space<vmem>>) attributes {dimension_semantics = [#tpu.dimension_semantics<arbitrary>], iteration_bounds = array<i64: 1>, scalar_prefetch = 0 : i64, scratch_operands = 0 : i64, tpu.core_type = #tpu.core_type<tc>, window_params = [{pipeline_mode = #tpu.pipeline_mode<synchronous>, transform_indices = @transform_0, window_bounds = array<i64: 552, 128>}, {pipeline_mode = #tpu.pipeline_mode<synchronous>, transform_indices = @transform_1, window_bounds = array<i64: 552, 128>}, {pipeline_mode = #tpu.pipeline_mode<synchronous>, transform_indices = @transform_2, window_bounds = array<i64: 1, 1>}]} {
    %c0 = arith.constant 0 : index
    %c0_0 = arith.constant 0 : index
    %0 = vector.load %arg1[%c0, %c0_0] : memref<552x128xf32, #tpu.memory_space<vmem>>, vector<552x128xf32>
    %c0_1 = arith.constant 0 : index
    %c0_2 = arith.constant 0 : index
    %1 = vector.load %arg2[%c0_1, %c0_2] : memref<552x128xf32, #tpu.memory_space<vmem>>, vector<552x128xf32>
    %2 = arith.subf %0, %1 : vector<552x128xf32>
    %3 = math.absf %2 : vector<552x128xf32>
    %4 = vector.shape_cast %3 : vector<552x128xf32> to vector<1x552x128xf32>
    %cst = arith.constant dense<0.000000e+00> : vector<1xf32>
    %5 = vector.multi_reduction <add>, %4, %cst [1, 2] : vector<1x552x128xf32> to vector<1xf32>
    %6 = vector.shape_cast %5 : vector<1xf32> to vector<1x1x1xf32>
    %7 = vector.extract %6[0, 0, 0] : f32 from vector<1x1x1xf32>
    %8 = vector.broadcast %7 : f32 to vector<1x1xf32>
    %c0_3 = arith.constant 0 : index
    %c0_4 = arith.constant 0 : index
    %9 = vector.load %arg3[%c0_3, %c0_4] : memref<1x1xf32, #tpu.memory_space<vmem>>, vector<1x1xf32>
    tpu.vector_store %arg3[%c0_3, %c0_4], %8 {strides = array<i32>} : memref<1x1xf32, #tpu.memory_space<vmem>>, vector<1x1xf32>,
    return
  }
  func.func @transform_0(%arg0: i32) -> (i32, i32) {
    %c0_i32 = arith.constant 0 : i32
    %c0_i32_0 = arith.constant 0 : i32
    %c0_i32_1 = arith.constant 0 : i32
    return %c0_i32, %c0_i32_0 : i32, i32
  }
  func.func @transform_1(%arg0: i32) -> (i32, i32) {
    %c0_i32 = arith.constant 0 : i32
    %c0_i32_0 = arith.constant 0 : i32
    %c0_i32_1 = arith.constant 0 : i32
    return %c0_i32, %c0_i32_0 : i32, i32
  }
  func.func @transform_2(%arg0: i32) -> (i32, i32) {
    %c0_i32 = arith.constant 0 : i32
    %c0_i32_0 = arith.constant 0 : i32
    %c0_i32_1 = arith.constant 0 : i32
    return %c0_i32, %c0_i32_0 : i32, i32
  }
}

</mosaic_0001>

<bundles_post_ra>
// kernel: _lambda_.8
= control target key start
LH: loop header
LB: loop body
LE: loop exit
PB: predicated region body
PF: predicated region fallthrough
CT: control target
= control target key end

     0   :  { %s2087_s12 = smov 0   ;;  %s2089_s13 = smov 0   ;;  %s2658_s0 = inlined_call_operand.vmem [shape: bf16[5476,147], index: 0, kind: input, shape index: {}]   ;;  %s2659_s1 = inlined_call_operand.vmem [shape: bf16[147,96], index: 1, kind: input, shape index: {}]   ;;  %s2660_s2 = inlined_call_operand.vmem [shape: f32[1,96], index: 2, kind: input, shape index: {}]   ;;  %s2661_s3 = inlined_call_operand.vmem [shape: f32[5476,96], index: 3, kind: output, shape index: {}]  }
   0x1   :  { %s2091_s14 = smov 0  }
   0x2 LB: > { %s2100_s15 = sadd.s32 4294967295, %s2031_s14   ;;  %s2102_s16 = sadd.s32 1, %s2031_s14   ;;  %s2031_s14 = sphi %s2091_s14, %s2670_s14   ;;  %s2027_s13 = sphi %s2089_s13, %s2669_s13   ;;  %s2023_s12 = sphi %s2087_s12, %s2668_s12  }
   0x3   : > { %s85_s17 = ssub.s32 %s2031_s14, %s2102_s16  ;;  %s88_s18 = sadd.s32 1, %s2027_s13 }
   0x4   : > { %p86_p0 = scmp.eq.s32.totalorder %s85_s17, 0  ;;  %p98_p1 = scmp.ne.s32.totalorder %s2027_s13, %s2023_s12 }
   0x5   : > { %p99_p2 = scmp.eq.s32.totalorder %s2100_s15, 10  ;;  %p1628_p3 = scmp.ge.s32.totalorder %s2031_s14, 1 }
   0x6   : > { %s2110_s19 = scalar_select %p86_p0, %s2027_s13, %s88_s18  }
   0x7   : > { %p2112_p4 = por %p99_p2, %p98_p1  ;;  %p149_p5 = scmp.lt.s32.totalorder %s2031_s14, 12 }
   0x9   : > { %p150_p6 = pnand %p1628_p3, %p149_p5 }
   0xa   : > { %v1871_v0 = vld [vmem:[%s2659_s1] sm:$0xff] (!%p150_p6)   ;;  %v2065_v1 = vmov (!%p150_p6), 0   ;;  %v1872_v2 = vld [vmem:[%s2659_s1 + $0x8] sm:$0xff] (!%p150_p6)   ;;  %v1873_v3 = vld [vmem:[%s2659_s1 + $0x10] sm:$0xff] (!%p150_p6)   ;;  %s2126_s27 = sshll.u32 (!%p150_p6), %s2100_s15, 6  ;;  %vm636_vm0 = vcmask (!%p150_p6), 154624  }
   0xb   : > { %153 = sbr.rel (%p150_p6) target bundleno = 462 (0x1ce), region = 32  ;;  %740 = vmatprep.subr.bf16.mxu0 (!%p150_p6), %v2065_v1  ;;  %1761 = vmatprep.subr.bf16.mxu1 (!%p150_p6), %v2065_v1  ;;  %p184_p7 = scmp.lt.s32.totalorder (!%p150_p6), %s2126_s27, 684  ;;  %v1874_v4 = vld [vmem:[%s2659_s1 + $0x18] sm:$0xff] (!%p150_p6)   ;;  %v1875_v5 = vld [vmem:[%s2659_s1 + $0x20] sm:$0xff] (!%p150_p6)   ;;  %v1876_v8 = vld [vmem:[%s2659_s1 + $0x28] sm:$0xff] (!%p150_p6)   ;;  %vm733_vm1 = vcmask (!%p150_p6), 1040384  }
   0xc   : > { %741 = vmatpush1.bf16.msra.mxu0 (!%p150_p6), %v1871_v0  ;;  %1771 = vmatpush1.bf16.msra.mxu1 (!%p150_p6), %v1871_v0  ;;  %v1877_v9 = vld [vmem:[%s2659_s1 + $0x30] sm:$0xff] (!%p150_p6)   ;;  %v1878_v10 = vld [vmem:[%s2659_s1 + $0x38] sm:$0xff] (!%p150_p6)   ;;  %vm734_vm2 = vcmask (!%p150_p6), 1041408   ;;  %v2066_v11 = vmov (!%p150_p6), 65535   ;;  %v1879_v13 = vld [vmem:[%s2659_s1 + $0x40] sm:$0xff] (!%p150_p6)   ;;  %s175_s26 = sand.u32 (!%p150_p6), 1, %s2023_s12  }
   0xd   : > { %742 = vmatprep.subr.bf16.mxu0 (!%p150_p6), %v2065_v1  ;;  %1762 = vmatprep.subr.bf16.mxu1 (!%p150_p6), %v2065_v1  ;;  %v735_v12 = vsel (!%p150_p6), %vm733_vm1, 4294967295, %v2066_v11  ;;  %v1880_v14 = vld [vmem:[%s2659_s1 + $0x48] ss:$0 sps:$4 sm:$0x33] (!%p150_p6)   ;;  %s1629_s30 = sshll.u32 (!%p150_p6), %s175_s26, 9  ;;  %vm1093_vm3 = vcmask (!%p150_p6), 785408  }
   0xe   : > { %v736_v15 = vsel (!%p150_p6), %vm734_vm2, %v735_v12, 0  ;;  %s2262_s12 = scalar_lea.vmem (!%p150_p6), [#allocation2], %s1629_s30  }
   0xf   : > { %v738_v16 = vand.u32 (!%p150_p6), %v1880_v14, %v736_v15  ;;  %v2256_v15 = vld [vmem:[%s2660_s2] ss:$0 sm:$0xff] (!%p150_p6) }
  0x10   : > { %743 = vmatpush1.bf16.msra.mxu0 (!%p150_p6), %v1872_v2  ;;  %1772 = vmatpush1.bf16.msra.mxu1 (!%p150_p6), %v1872_v2 }
  0x11   : > { %744 = vmatprep.subr.bf16.mxu0 (!%p150_p6), %v2065_v1  ;;  %1763 = vmatprep.subr.bf16.mxu1 (!%p150_p6), %v2065_v1 }
  0x12   : > { %s185_s28 = scalar_select %p184_p7, %s2126_s27, 684 }
  0x13   : > { %s1758_s5 = sshll.u32 (%p2112_p4), %s2100_s15, 9 }
  0x14   : > { %745 = vmatpush1.bf16.msra.mxu0 %v1873_v3  ;;  %1773 = vmatpush1.bf16.msra.mxu1 %v1873_v3  ;;  %s1757_s4 = sshll.u32 %s185_s28, 3  ;;  %s2459_s8 = scalar_lea.vmem (%p2112_p4), %s2661_s3, %s1758_s5  }
  0x15   : > { %746 = vmatprep.subr.bf16.mxu0 %v2065_v1  ;;  %1764 = vmatprep.subr.bf16.mxu1 %v2065_v1  ;;  %s2136_s7 = scalar_lea.vmem %s2658_s0, %s1757_s4  ;;  %s1166_s4 = ssub.s32 (%p2112_p4), 685, %s2126_s27 }
  0x16   : > { %v1883_v6 = vld [vmem:[%s2136_s7 + $0x4] ss:$8 sps:$4 sm:$0xff]   ;;  %v1881_v17 = vld [vmem:[%s2136_s7] ss:$8 sps:$4 sm:$0xff]   ;;  %v1887_v19 = vld [vmem:[%s2136_s7 + $0x14] ss:$8 sps:$4 sm:$0xff]  }
  0x17   : > { %v1886_v7 = vld [vmem:[%s2136_s7 + $0x104] ss:$8 sps:$4 sm:$0xff]   ;;  %1708 = vmatprep.mubr.msk.bf16.mxu0 %vm636_vm0, %v1883_v6  ;;  %v1884_v18 = vld [vmem:[%s2136_s7 + $0x100] ss:$8 sps:$4 sm:$0xff]   ;;  %v1889_v20 = vld [vmem:[%s2136_s7 + $0x114] ss:$8 sps:$4 sm:$0xff]  }
  0x18   : > { %747 = vmatpush1.bf16.msra.mxu0 %v1874_v4  ;;  %1774 = vmatpush1.bf16.msra.mxu1 %v1874_v4  ;;  %v1891_v21 = vld [vmem:[%s2136_s7 + $0x10] ss:$8 sps:$4 sm:$0xff]   ;;  %v1893_v23 = vld [vmem:[%s2136_s7 + $0x24] ss:$8 sps:$4 sm:$0xff]   ;;  %v1897_v25 = vld [vmem:[%s2136_s7 + $0x20] ss:$8 sps:$4 sm:$0xff]  }
  0x19   : > { %748 = vmatprep.subr.bf16.mxu0 %v2065_v1  ;;  %1765 = vmatprep.subr.bf16.mxu1 %v2065_v1  ;;  %v1892_v22 = vld [vmem:[%s2136_s7 + $0x110] ss:$8 sps:$4 sm:$0xff]   ;;  %v1895_v24 = vld [vmem:[%s2136_s7 + $0x124] ss:$8 sps:$4 sm:$0xff]   ;;  %v1898_v26 = vld [vmem:[%s2136_s7 + $0x120] ss:$8 sps:$4 sm:$0xff]  }
  0x1a   : > { %1724 = vmatprep.mubr.msk.bf16.mxu1 %vm636_vm0, %v1886_v7  ;;  %v1899_v27 = vld [vmem:[%s2136_s7 + $0x34] ss:$8 sps:$4 sm:$0xff]   ;;  %v1903_v29 = vld [vmem:[%s2136_s7 + $0x30] ss:$8 sps:$4 sm:$0xff]   ;;  %v1905_v31 = vld [vmem:[%s2136_s7 + $0x44] ss:$8 sps:$4 sm:$0xff]  }
  0x1b   : > { %v1901_v28 = vld [vmem:[%s2136_s7 + $0x134] ss:$8 sps:$4 sm:$0xff]   ;;  %v1904_v30 = vld [vmem:[%s2136_s7 + $0x130] ss:$8 sps:$4 sm:$0xff]   ;;  %v1907_v32 = vld [vmem:[%s2136_s7 + $0x144] ss:$8 sps:$4 sm:$0xff]  }
  0x1c   : > { %749 = vmatpush1.bf16.msra.mxu0 %v1875_v5  ;;  %1775 = vmatpush1.bf16.msra.mxu1 %v1875_v5  ;;  %v1909_v33 = vld [vmem:[%s2136_s7 + $0x40] ss:$8 sps:$4 sm:$0xff]   ;;  %v1911_v35 = vld [vmem:[%s2136_s7 + $0x54] ss:$8 sps:$4 sm:$0xff]   ;;  %v1915_v37 = vld [vmem:[%s2136_s7 + $0x50] ss:$8 sps:$4 sm:$0xff]  }
  0x1d   : > { %750 = vmatprep.subr.bf16.mxu0 %v2065_v1  ;;  %1766 = vmatprep.subr.bf16.mxu1 %v2065_v1  ;;  %v1910_v34 = vld [vmem:[%s2136_s7 + $0x140] ss:$8 sps:$4 sm:$0xff]   ;;  %v1913_v36 = vld [vmem:[%s2136_s7 + $0x154] ss:$8 sps:$4 sm:$0xff]   ;;  %v1916_v38 = vld [vmem:[%s2136_s7 + $0x150] ss:$8 sps:$4 sm:$0xff]  }
  0x1e   : > { %v1917_v39 = vld [vmem:[%s2136_s7 + $0x64] ss:$8 sps:$4 sm:$0xff]   ;;  %v1921_v41 = vld [vmem:[%s2136_s7 + $0x60] ss:$8 sps:$4 sm:$0xff]   ;;  %v1923_v43 = vld [vmem:[%s2136_s7 + $0x74] ss:$8 sps:$4 sm:$0xff]  }
  0x1f   : > { %v1919_v40 = vld [vmem:[%s2136_s7 + $0x164] ss:$8 sps:$4 sm:$0xff]   ;;  %v1922_v42 = vld [vmem:[%s2136_s7 + $0x160] ss:$8 sps:$4 sm:$0xff]   ;;  %v1925_v44 = vld [vmem:[%s2136_s7 + $0x174] ss:$8 sps:$4 sm:$0xff]  }
  0x20   : > { %751 = vmatpush1.bf16.msra.mxu0 %v1876_v8  ;;  %1776 = vmatpush1.bf16.msra.mxu1 %v1876_v8  ;;  %v1927_v45 = vld [vmem:[%s2136_s7 + $0x70] ss:$8 sps:$4 sm:$0xff]   ;;  %v1929_v47 = vld [vmem:[%s2136_s7 + $0x84] ss:$8 sps:$4 sm:$0xff]   ;;  %v1933_v49 = vld [vmem:[%s2136_s7 + $0x80] ss:$8 sps:$4 sm:$0xff]  }
  0x21   : > { %752 = vmatprep.subr.bf16.mxu0 %v2065_v1  ;;  %1767 = vmatprep.subr.bf16.mxu1 %v2065_v1  ;;  %v1928_v46 = vld [vmem:[%s2136_s7 + $0x170] ss:$8 sps:$4 sm:$0xff]   ;;  %v1931_v48 = vld [vmem:[%s2136_s7 + $0x184] ss:$8 sps:$4 sm:$0xff]   ;;  %v1934_v50 = vld [vmem:[%s2136_s7 + $0x180] ss:$8 sps:$4 sm:$0xff]  }
  0x22   : > { %v1935_v51 = vld [vmem:[%s2136_s7 + $0x94] ss:$8 sps:$4 sm:$0xff]   ;;  %v1939_v53 = vld [vmem:[%s2136_s7 + $0x90] ss:$8 sps:$4 sm:$0xff]   ;;  %v1941_v55 = vld [vmem:[%s2136_s7 + $0xa4] ss:$8 sps:$4 sm:$0xff]  }
  0x23   : > { %v1937_v52 = vld [vmem:[%s2136_s7 + $0x194] ss:$8 sps:$4 sm:$0xff]   ;;  %v1940_v54 = vld [vmem:[%s2136_s7 + $0x190] ss:$8 sps:$4 sm:$0xff]   ;;  %v1943_v56 = vld [vmem:[%s2136_s7 + $0x1a4] ss:$8 sps:$4 sm:$0xff]  }
  0x24   : > { %753 = vmatpush1.bf16.msra.mxu0 %v1877_v9  ;;  %1777 = vmatpush1.bf16.msra.mxu1 %v1877_v9  ;;  %v1945_v57 = vld [vmem:[%s2136_s7 + $0xa0] ss:$8 sps:$4 sm:$0xff]   ;;  %v1947_v59 = vld [vmem:[%s2136_s7 + $0xb4] ss:$8 sps:$4 sm:$0xff]   ;;  %v1951_v61 = vld [vmem:[%s2136_s7 + $0xb0] ss:$8 sps:$4 sm:$0xff]  }
  0x25   : > { %754 = vmatprep.subr.bf16.mxu0 %v2065_v1  ;;  %1768 = vmatprep.subr.bf16.mxu1 %v2065_v1  ;;  %v1946_v58 = vld [vmem:[%s2136_s7 + $0x1a0] ss:$8 sps:$4 sm:$0xff]   ;;  %v1949_v60 = vld [vmem:[%s2136_s7 + $0x1b4] ss:$8 sps:$4 sm:$0xff]   ;;  %v1952_v62 = vld [vmem:[%s2136_s7 + $0x1b0] ss:$8 sps:$4 sm:$0xff]  }
  0x26   : > { %v1953_v63 = vld [vmem:[%s2136_s7 + $0xc4] ss:$8 sps:$4 sm:$0xff]   ;;  %v1958_v2 = vld [vmem:[%s2136_s7 + $0x1c0] ss:$8 sps:$4 sm:$0xff]   ;;  %v1959_v3 = vld [vmem:[%s2136_s7 + $0xd4] ss:$8 sps:$4 sm:$0xff]  }
  0x27   : > { %v1955_v0 = vld [vmem:[%s2136_s7 + $0x1c4] ss:$8 sps:$4 sm:$0xff]   ;;  %v1961_v4 = vld [vmem:[%s2136_s7 + $0x1d4] ss:$8 sps:$4 sm:$0xff]   ;;  %v1963_v5 = vld [vmem:[%s2136_s7 + $0xd0] ss:$8 sps:$4 sm:$0xff]  }
  0x28   : > { %755 = vmatpush1.bf16.msra.mxu0 %v1878_v10  ;;  %1778 = vmatpush1.bf16.msra.mxu1 %v1878_v10  ;;  %v1964_v6 = vld [vmem:[%s2136_s7 + $0x1d0] ss:$8 sps:$4 sm:$0xff]   ;;  %v1965_v7 = vld [vmem:[%s2136_s7 + $0xe4] ss:$8 sps:$4 sm:$0xff]   ;;  %v1969_v9 = vld [vmem:[%s2136_s7 + $0xe0] ss:$8 sps:$4 sm:$0xff]  }
  0x29   : > { %756 = vmatprep.subr.bf16.mxu0 %v2065_v1  ;;  %1769 = vmatprep.subr.bf16.mxu1 %v2065_v1  ;;  %v1967_v8 = vld [vmem:[%s2136_s7 + $0x1e4] ss:$8 sps:$4 sm:$0xff]   ;;  %v1970_v10 = vld [vmem:[%s2136_s7 + $0x1e0] ss:$8 sps:$4 sm:$0xff]   ;;  %v1971_v11 = vld [vmem:[%s2136_s7 + $0xf4] ss:$8 sps:$4 sm:$0xff]  }
  0x2a   : > { %v1973_v12 = vld [vmem:[%s2136_s7 + $0x1f4] ss:$8 sps:$4 sm:$0xff]   ;;  %v1976_v14 = vld [vmem:[%s2136_s7 + $0x1f0] ss:$8 sps:$4 sm:$0xff]   ;;  %p1167_p8 = scmp.lt.s32.totalorder (%p2112_p4), %s1166_s4, 64 }
  0x2c   : > { %757 = vmatpush1.bf16.msra.mxu0 %v1879_v13  ;;  %1779 = vmatpush1.bf16.msra.mxu1 %v1879_v13  ;;  %v1975_v13 = vld [vmem:[%s2136_s7 + $0xf0] ss:$8 sps:$4 sm:$0xff]  }
  0x2d   : > { %758 = vmatprep.subr.bf16.mxu0 %v2065_v1  ;;  %1770 = vmatprep.subr.bf16.mxu1 %v2065_v1  ;;  %v1957_v1 = vld [vmem:[%s2136_s7 + $0xc0] ss:$8 sps:$4 sm:$0xff]  }
  0x30   : > { %759 = vmatpush1.bf16.msra.mxu0 %v738_v16  ;;  %1780 = vmatpush1.bf16.msra.mxu1 %v738_v16 }
  0x33   : > { %773 = vmatmul.mubr.bf16.vlgmr.msra.gmra.mrb[0].mxu0 %v1881_v17  ;;  %901 = vmatmul.mubr.bf16.vlgmr.msra.gmra.mrb[0].mxu1 %v1884_v18 }
  0x34   : > { %1709 = vmatprep.mubr.msk.bf16.mxu0 %vm636_vm0, %v1887_v19  ;;  %1725 = vmatprep.mubr.msk.bf16.mxu1 %vm636_vm0, %v1889_v20 }
  0x3b   : > { %781 = vmatmul.mubr.bf16.gmra.mrb[4].mxu0 %v1891_v21  ;;  %909 = vmatmul.mubr.bf16.gmra.mrb[4].mxu1 %v1892_v22 }
  0x3c   : > { %1710 = vmatprep.mubr.msk.bf16.mxu0 %vm636_vm0, %v1893_v23  ;;  %1726 = vmatprep.mubr.msk.bf16.mxu1 %vm636_vm0, %v1895_v24 }
  0x43   : > { %789 = vmatmul.mubr.bf16.gmra.mrb[8].mxu0 %v1897_v25  ;;  %917 = vmatmul.mubr.bf16.gmra.mrb[8].mxu1 %v1898_v26 }
  0x44   : > { %1711 = vmatprep.mubr.msk.bf16.mxu0 %vm636_vm0, %v1899_v27  ;;  %1727 = vmatprep.mubr.msk.bf16.mxu1 %vm636_vm0, %v1901_v28 }
  0x4b   : > { %797 = vmatmul.mubr.bf16.gmra.mrb[12].mxu0 %v1903_v29  ;;  %925 = vmatmul.mubr.bf16.gmra.mrb[12].mxu1 %v1904_v30 }
  0x4c   : > { %1712 = vmatprep.mubr.msk.bf16.mxu0 %vm636_vm0, %v1905_v31  ;;  %1728 = vmatprep.mubr.msk.bf16.mxu1 %vm636_vm0, %v1907_v32 }
  0x53   : > { %805 = vmatmul.mubr.bf16.gmra.mrb[16].mxu0 %v1909_v33  ;;  %933 = vmatmul.mubr.bf16.gmra.mrb[16].mxu1 %v1910_v34 }
  0x54   : > { %1713 = vmatprep.mubr.msk.bf16.mxu0 %vm636_vm0, %v1911_v35  ;;  %1729 = vmatprep.mubr.msk.bf16.mxu1 %vm636_vm0, %v1913_v36 }
  0x5b   : > { %813 = vmatmul.mubr.bf16.gmra.mrb[20].mxu0 %v1915_v37  ;;  %941 = vmatmul.mubr.bf16.gmra.mrb[20].mxu1 %v1916_v38 }
  0x5c   : > { %1714 = vmatprep.mubr.msk.bf16.mxu0 %vm636_vm0, %v1917_v39  ;;  %1730 = vmatprep.mubr.msk.bf16.mxu1 %vm636_vm0, %v1919_v40 }
  0x63   : > { %821 = vmatmul.mubr.bf16.gmra.mrb[24].mxu0 %v1921_v41  ;;  %949 = vmatmul.mubr.bf16.gmra.mrb[24].mxu1 %v1922_v42 }
  0x64   : > { %1715 = vmatprep.mubr.msk.bf16.mxu0 %vm636_vm0, %v1923_v43  ;;  %1731 = vmatprep.mubr.msk.bf16.mxu1 %vm636_vm0, %v1925_v44 }
  0x6b   : > { %829 = vmatmul.mubr.bf16.gmra.mrb[28].mxu0 %v1927_v45  ;;  %957 = vmatmul.mubr.bf16.gmra.mrb[28].mxu1 %v1928_v46 }
  0x6c   : > { %1716 = vmatprep.mubr.msk.bf16.mxu0 %vm636_vm0, %v1929_v47  ;;  %1732 = vmatprep.mubr.msk.bf16.mxu1 %vm636_vm0, %v1931_v48 }
  0x73   : > { %837 = vmatmul.mubr.bf16.gmra.mrb[32].mxu0 %v1933_v49  ;;  %965 = vmatmul.mubr.bf16.gmra.mrb[32].mxu1 %v1934_v50 }
  0x74   : > { %1717 = vmatprep.mubr.msk.bf16.mxu0 %vm636_vm0, %v1935_v51  ;;  %1733 = vmatprep.mubr.msk.bf16.mxu1 %vm636_vm0, %v1937_v52 }
  0x7b   : > { %845 = vmatmul.mubr.bf16.gmra.mrb[36].mxu0 %v1939_v53  ;;  %973 = vmatmul.mubr.bf16.gmra.mrb[36].mxu1 %v1940_v54 }
  0x7c   : > { %1718 = vmatprep.mubr.msk.bf16.mxu0 %vm636_vm0, %v1941_v55  ;;  %1734 = vmatprep.mubr.msk.bf16.mxu1 %vm636_vm0, %v1943_v56 }
  0x83   : > { %853 = vmatmul.mubr.bf16.gmra.mrb[40].mxu0 %v1945_v57  ;;  %981 = vmatmul.mubr.bf16.gmra.mrb[40].mxu1 %v1946_v58 }
  0x84   : > { %1719 = vmatprep.mubr.msk.bf16.mxu0 %vm636_vm0, %v1947_v59  ;;  %1735 = vmatprep.mubr.msk.bf16.mxu1 %vm636_vm0, %v1949_v60 }
  0x8b   : > { %861 = vmatmul.mubr.bf16.gmra.mrb[44].mxu0 %v1951_v61  ;;  %989 = vmatmul.mubr.bf16.gmra.mrb[44].mxu1 %v1952_v62 }
  0x8c   : > { %1720 = vmatprep.mubr.msk.bf16.mxu0 %vm636_vm0, %v1953_v63  ;;  %1736 = vmatprep.mubr.msk.bf16.mxu1 %vm636_vm0, %v1955_v0 }
  0x93   : > { %869 = vmatmul.mubr.bf16.gmra.mrb[48].mxu0 %v1957_v1  ;;  %997 = vmatmul.mubr.bf16.gmra.mrb[48].mxu1 %v1958_v2 }
  0x94   : > { %1721 = vmatprep.mubr.msk.bf16.mxu0 %vm636_vm0, %v1959_v3  ;;  %1737 = vmatprep.mubr.msk.bf16.mxu1 %vm636_vm0, %v1961_v4 }
  0x9b   : > { %877 = vmatmul.mubr.bf16.gmra.mrb[52].mxu0 %v1963_v5  ;;  %1005 = vmatmul.mubr.bf16.gmra.mrb[52].mxu1 %v1964_v6 }
  0x9c   : > { %1722 = vmatprep.mubr.msk.bf16.mxu0 %vm636_vm0, %v1965_v7  ;;  %1738 = vmatprep.mubr.msk.bf16.mxu1 %vm636_vm0, %v1967_v8 }
  0xa3   : > { %885 = vmatmul.mubr.bf16.gmra.mrb[56].mxu0 %v1969_v9  ;;  %1013 = vmatmul.mubr.bf16.gmra.mrb[56].mxu1 %v1970_v10 }
  0xa4   : > { %1723 = vmatprep.mubr.msk.bf16.mxu0 %vm636_vm0, %v1971_v11  ;;  %1739 = vmatprep.mubr.msk.bf16.mxu1 %vm636_vm0, %v1973_v12 }
  0xab   : > { %893 = vmatmul.mubr.bf16.gmra.mrb[60].mxu0 %v1975_v13  ;;  %1021 = vmatmul.mubr.bf16.gmra.mrb[60].mxu1 %v1976_v14 }
 0x106   : > { %v774_v16 = vpop.f32.mrb[0].mxu0  ;;  %v902_v17 = vpop.f32.mrb[0].mxu1 }
 0x107   : > { %v775_v18 = vadd.f32 %v2256_v15, %v774_v16  ;;  %v903_v19 = vadd.f32 %v2256_v15, %v902_v17  ;;  %v776_v20 = vpop.f32.mrb[1].mxu0  ;;  %v904_v21 = vpop.f32.mrb[1].mxu1 }
 0x108   : > { %v777_v22 = vpop.f32.mrb[2].mxu0  ;;  %v905_v23 = vpop.f32.mrb[2].mxu1 }
 0x109   : > { %v1029_v24 = vmax.f32 %v775_v18, 0.0  ;;  %v1061_v25 = vmax.f32 %v903_v19, 0.0  ;;  %v778_v26 = vadd.f32 %v2256_v15, %v777_v22  ;;  %v906_v27 = vadd.f32 %v2256_v15, %v905_v23  ;;  %v779_v28 = vpop.f32.mrb[3].mxu0  ;;  %v907_v29 = vpop.f32.mrb[3].mxu1 }
 0x10b   : > { %1094 = vst.msk [vmem:[%s2262_s12] sm:$0xff] %vm1093_vm3, %v1029_v24  ;;  %1126 = vst.msk [vmem:[%s2262_s12 + $0x100] sm:$0xff] %vm1093_vm3, %v1061_v25  ;;  %v1030_v30 = vmax.f32 %v778_v26, 0.0  ;;  %v1062_v31 = vmax.f32 %v906_v27, 0.0 }
 0x10d   : > { %1095 = vst.msk [vmem:[%s2262_s12 + $0x8] sm:$0xff] %vm1093_vm3, %v1030_v30  ;;  %1127 = vst.msk [vmem:[%s2262_s12 + $0x108] sm:$0xff] %vm1093_vm3, %v1062_v31 }
 0x10e   : > { %v782_v32 = vpop.f32.mrb[4].mxu0  ;;  %v910_v33 = vpop.f32.mrb[4].mxu1 }
 0x10f   : > { %v783_v34 = vadd.f32 %v2256_v15, %v782_v32  ;;  %v911_v35 = vadd.f32 %v2256_v15, %v910_v33  ;;  %v784_v36 = vpop.f32.mrb[5].mxu0  ;;  %v912_v37 = vpop.f32.mrb[5].mxu1 }
 0x110   : > { %v785_v38 = vpop.f32.mrb[6].mxu0  ;;  %v913_v39 = vpop.f32.mrb[6].mxu1 }
 0x111   : > { %v1031_v40 = vmax.f32 %v783_v34, 0.0  ;;  %v1063_v41 = vmax.f32 %v911_v35, 0.0  ;;  %v786_v42 = vadd.f32 %v2256_v15, %v785_v38  ;;  %v914_v43 = vadd.f32 %v2256_v15, %v913_v39  ;;  %v787_v44 = vpop.f32.mrb[7].mxu0  ;;  %v915_v45 = vpop.f32.mrb[7].mxu1 }
 0x113   : > { %1096 = vst.msk [vmem:[%s2262_s12 + $0x10] sm:$0xff] %vm1093_vm3, %v1031_v40  ;;  %1128 = vst.msk [vmem:[%s2262_s12 + $0x110] sm:$0xff] %vm1093_vm3, %v1063_v41  ;;  %v1032_v46 = vmax.f32 %v786_v42, 0.0  ;;  %v1064_v47 = vmax.f32 %v914_v43, 0.0 }
 0x115   : > { %1097 = vst.msk [vmem:[%s2262_s12 + $0x18] sm:$0xff] %vm1093_vm3, %v1032_v46  ;;  %1129 = vst.msk [vmem:[%s2262_s12 + $0x118] sm:$0xff] %vm1093_vm3, %v1064_v47 }
 0x116   : > { %v790_v48 = vpop.f32.mrb[8].mxu0  ;;  %v918_v49 = vpop.f32.mrb[8].mxu1 }
 0x117   : > { %v791_v50 = vadd.f32 %v2256_v15, %v790_v48  ;;  %v919_v51 = vadd.f32 %v2256_v15, %v918_v49  ;;  %v792_v52 = vpop.f32.mrb[9].mxu0  ;;  %v920_v53 = vpop.f32.mrb[9].mxu1 }
 0x118   : > { %v793_v54 = vpop.f32.mrb[10].mxu0  ;;  %v921_v55 = vpop.f32.mrb[10].mxu1 }
 0x119   : > { %v1033_v56 = vmax.f32 %v791_v50, 0.0  ;;  %v1065_v57 = vmax.f32 %v919_v51, 0.0  ;;  %v794_v58 = vadd.f32 %v2256_v15, %v793_v54  ;;  %v922_v59 = vadd.f32 %v2256_v15, %v921_v55  ;;  %v795_v60 = vpop.f32.mrb[11].mxu0  ;;  %v923_v61 = vpop.f32.mrb[11].mxu1 }
 0x11b   : > { %1098 = vst.msk [vmem:[%s2262_s12 + $0x20] sm:$0xff] %vm1093_vm3, %v1033_v56  ;;  %1130 = vst.msk [vmem:[%s2262_s12 + $0x120] sm:$0xff] %vm1093_vm3, %v1065_v57  ;;  %v1034_v62 = vmax.f32 %v794_v58, 0.0  ;;  %v1066_v63 = vmax.f32 %v922_v59, 0.0 }
 0x11d   : > { %1099 = vst.msk [vmem:[%s2262_s12 + $0x28] sm:$0xff] %vm1093_vm3, %v1034_v62  ;;  %1131 = vst.msk [vmem:[%s2262_s12 + $0x128] sm:$0xff] %vm1093_vm3, %v1066_v63 }
 0x11e   : > { %v798_v0 = vpop.f32.mrb[12].mxu0  ;;  %v926_v1 = vpop.f32.mrb[12].mxu1 }
 0x11f   : > { %v799_v2 = vadd.f32 %v2256_v15, %v798_v0  ;;  %v927_v3 = vadd.f32 %v2256_v15, %v926_v1  ;;  %v800_v4 = vpop.f32.mrb[13].mxu0  ;;  %v928_v5 = vpop.f32.mrb[13].mxu1 }
 0x120   : > { %v801_v6 = vpop.f32.mrb[14].mxu0  ;;  %v929_v7 = vpop.f32.mrb[14].mxu1 }
 0x121   : > { %v1035_v8 = vmax.f32 %v799_v2, 0.0  ;;  %v1067_v9 = vmax.f32 %v927_v3, 0.0  ;;  %v802_v10 = vadd.f32 %v2256_v15, %v801_v6  ;;  %v930_v11 = vadd.f32 %v2256_v15, %v929_v7  ;;  %v803_v12 = vpop.f32.mrb[15].mxu0  ;;  %v931_v13 = vpop.f32.mrb[15].mxu1 }
 0x123   : > { %1100 = vst.msk [vmem:[%s2262_s12 + $0x30] sm:$0xff] %vm1093_vm3, %v1035_v8  ;;  %1132 = vst.msk [vmem:[%s2262_s12 + $0x130] sm:$0xff] %vm1093_vm3, %v1067_v9  ;;  %v1036_v14 = vmax.f32 %v802_v10, 0.0  ;;  %v1068_v16 = vmax.f32 %v930_v11, 0.0 }
 0x125   : > { %1101 = vst.msk [vmem:[%s2262_s12 + $0x38] sm:$0xff] %vm1093_vm3, %v1036_v14  ;;  %1133 = vst.msk [vmem:[%s2262_s12 + $0x138] sm:$0xff] %vm1093_vm3, %v1068_v16 }
 0x126   : > { %v806_v17 = vpop.f32.mrb[16].mxu0  ;;  %v934_v18 = vpop.f32.mrb[16].mxu1 }
 0x127   : > { %v807_v19 = vadd.f32 %v2256_v15, %v806_v17  ;;  %v935_v20 = vadd.f32 %v2256_v15, %v934_v18  ;;  %v808_v21 = vpop.f32.mrb[17].mxu0  ;;  %v936_v22 = vpop.f32.mrb[17].mxu1 }
 0x128   : > { %v809_v23 = vpop.f32.mrb[18].mxu0  ;;  %v937_v24 = vpop.f32.mrb[18].mxu1 }
 0x129   : > { %v1037_v25 = vmax.f32 %v807_v19, 0.0  ;;  %v1069_v26 = vmax.f32 %v935_v20, 0.0  ;;  %v810_v27 = vadd.f32 %v2256_v15, %v809_v23  ;;  %v938_v28 = vadd.f32 %v2256_v15, %v937_v24  ;;  %v811_v29 = vpop.f32.mrb[19].mxu0  ;;  %v939_v30 = vpop.f32.mrb[19].mxu1 }
 0x12b   : > { %1102 = vst.msk [vmem:[%s2262_s12 + $0x40] sm:$0xff] %vm1093_vm3, %v1037_v25  ;;  %1134 = vst.msk [vmem:[%s2262_s12 + $0x140] sm:$0xff] %vm1093_vm3, %v1069_v26  ;;  %v1038_v31 = vmax.f32 %v810_v27, 0.0  ;;  %v1070_v32 = vmax.f32 %v938_v28, 0.0 }
 0x12d   : > { %1103 = vst.msk [vmem:[%s2262_s12 + $0x48] sm:$0xff] %vm1093_vm3, %v1038_v31  ;;  %1135 = vst.msk [vmem:[%s2262_s12 + $0x148] sm:$0xff] %vm1093_vm3, %v1070_v32 }
 0x12e   : > { %v814_v33 = vpop.f32.mrb[20].mxu0  ;;  %v942_v34 = vpop.f32.mrb[20].mxu1 }
 0x12f   : > { %v815_v35 = vadd.f32 %v2256_v15, %v814_v33  ;;  %v943_v36 = vadd.f32 %v2256_v15, %v942_v34  ;;  %v816_v37 = vpop.f32.mrb[21].mxu0  ;;  %v944_v38 = vpop.f32.mrb[21].mxu1 }
 0x130   : > { %v817_v39 = vpop.f32.mrb[22].mxu0  ;;  %v945_v40 = vpop.f32.mrb[22].mxu1 }
 0x131   : > { %v1039_v41 = vmax.f32 %v815_v35, 0.0  ;;  %v1071_v42 = vmax.f32 %v943_v36, 0.0  ;;  %v818_v43 = vadd.f32 %v2256_v15, %v817_v39  ;;  %v946_v44 = vadd.f32 %v2256_v15, %v945_v40  ;;  %v819_v45 = vpop.f32.mrb[23].mxu0  ;;  %v947_v46 = vpop.f32.mrb[23].mxu1 }
 0x133   : > { %1104 = vst.msk [vmem:[%s2262_s12 + $0x50] sm:$0xff] %vm1093_vm3, %v1039_v41  ;;  %1136 = vst.msk [vmem:[%s2262_s12 + $0x150] sm:$0xff] %vm1093_vm3, %v1071_v42  ;;  %v1040_v47 = vmax.f32 %v818_v43, 0.0  ;;  %v1072_v48 = vmax.f32 %v946_v44, 0.0 }
 0x135   : > { %1105 = vst.msk [vmem:[%s2262_s12 + $0x58] sm:$0xff] %vm1093_vm3, %v1040_v47  ;;  %1137 = vst.msk [vmem:[%s2262_s12 + $0x158] sm:$0xff] %vm1093_vm3, %v1072_v48 }
 0x136   : > { %v822_v49 = vpop.f32.mrb[24].mxu0  ;;  %v950_v50 = vpop.f32.mrb[24].mxu1 }
 0x137   : > { %v823_v51 = vadd.f32 %v2256_v15, %v822_v49  ;;  %v951_v52 = vadd.f32 %v2256_v15, %v950_v50  ;;  %v824_v53 = vpop.f32.mrb[25].mxu0  ;;  %v952_v54 = vpop.f32.mrb[25].mxu1 }
 0x138   : > { %v825_v55 = vpop.f32.mrb[26].mxu0  ;;  %v953_v56 = vpop.f32.mrb[26].mxu1 }
 0x139   : > { %v1041_v57 = vmax.f32 %v823_v51, 0.0  ;;  %v1073_v58 = vmax.f32 %v951_v52, 0.0  ;;  %v826_v59 = vadd.f32 %v2256_v15, %v825_v55  ;;  %v954_v60 = vadd.f32 %v2256_v15, %v953_v56  ;;  %v827_v61 = vpop.f32.mrb[27].mxu0  ;;  %v955_v62 = vpop.f32.mrb[27].mxu1 }
 0x13b   : > { %1106 = vst.msk [vmem:[%s2262_s12 + $0x60] sm:$0xff] %vm1093_vm3, %v1041_v57  ;;  %1138 = vst.msk [vmem:[%s2262_s12 + $0x160] sm:$0xff] %vm1093_vm3, %v1073_v58  ;;  %v1042_v63 = vmax.f32 %v826_v59, 0.0  ;;  %v1074_v0 = vmax.f32 %v954_v60, 0.0 }
 0x13d   : > { %1107 = vst.msk [vmem:[%s2262_s12 + $0x68] sm:$0xff] %vm1093_vm3, %v1042_v63  ;;  %1139 = vst.msk [vmem:[%s2262_s12 + $0x168] sm:$0xff] %vm1093_vm3, %v1074_v0 }
 0x13e   : > { %v830_v1 = vpop.f32.mrb[28].mxu0  ;;  %v958_v2 = vpop.f32.mrb[28].mxu1 }
 0x13f   : > { %v831_v3 = vadd.f32 %v2256_v15, %v830_v1  ;;  %v959_v4 = vadd.f32 %v2256_v15, %v958_v2  ;;  %v832_v5 = vpop.f32.mrb[29].mxu0  ;;  %v960_v6 = vpop.f32.mrb[29].mxu1 }
 0x140   : > { %v833_v7 = vpop.f32.mrb[30].mxu0  ;;  %v961_v8 = vpop.f32.mrb[30].mxu1 }
 0x141   : > { %v1043_v9 = vmax.f32 %v831_v3, 0.0  ;;  %v1075_v10 = vmax.f32 %v959_v4, 0.0  ;;  %v834_v11 = vadd.f32 %v2256_v15, %v833_v7  ;;  %v962_v12 = vadd.f32 %v2256_v15, %v961_v8  ;;  %v835_v13 = vpop.f32.mrb[31].mxu0  ;;  %v963_v14 = vpop.f32.mrb[31].mxu1 }
 0x143   : > { %1108 = vst.msk [vmem:[%s2262_s12 + $0x70] sm:$0xff] %vm1093_vm3, %v1043_v9  ;;  %1140 = vst.msk [vmem:[%s2262_s12 + $0x170] sm:$0xff] %vm1093_vm3, %v1075_v10  ;;  %v1044_v16 = vmax.f32 %v834_v11, 0.0  ;;  %v1076_v17 = vmax.f32 %v962_v12, 0.0 }
 0x145   : > { %1109 = vst.msk [vmem:[%s2262_s12 + $0x78] sm:$0xff] %vm1093_vm3, %v1044_v16  ;;  %1141 = vst.msk [vmem:[%s2262_s12 + $0x178] sm:$0xff] %vm1093_vm3, %v1076_v17 }
 0x146   : > { %v838_v18 = vpop.f32.mrb[32].mxu0  ;;  %v966_v19 = vpop.f32.mrb[32].mxu1 }
 0x147   : > { %v839_v20 = vadd.f32 %v2256_v15, %v838_v18  ;;  %v967_v21 = vadd.f32 %v2256_v15, %v966_v19  ;;  %v840_v22 = vpop.f32.mrb[33].mxu0  ;;  %v968_v23 = vpop.f32.mrb[33].mxu1 }
 0x148   : > { %v841_v24 = vpop.f32.mrb[34].mxu0  ;;  %v969_v25 = vpop.f32.mrb[34].mxu1 }
 0x149   : > { %v1045_v26 = vmax.f32 %v839_v20, 0.0  ;;  %v1077_v27 = vmax.f32 %v967_v21, 0.0  ;;  %v842_v28 = vadd.f32 %v2256_v15, %v841_v24  ;;  %v970_v29 = vadd.f32 %v2256_v15, %v969_v25  ;;  %v843_v30 = vpop.f32.mrb[35].mxu0  ;;  %v971_v31 = vpop.f32.mrb[35].mxu1 }
 0x14b   : > { %1110 = vst.msk [vmem:[%s2262_s12 + $0x80] sm:$0xff] %vm1093_vm3, %v1045_v26  ;;  %1142 = vst.msk [vmem:[%s2262_s12 + $0x180] sm:$0xff] %vm1093_vm3, %v1077_v27  ;;  %v1046_v32 = vmax.f32 %v842_v28, 0.0  ;;  %v1078_v33 = vmax.f32 %v970_v29, 0.0 }
 0x14d   : > { %1111 = vst.msk [vmem:[%s2262_s12 + $0x88] sm:$0xff] %vm1093_vm3, %v1046_v32  ;;  %1143 = vst.msk [vmem:[%s2262_s12 + $0x188] sm:$0xff] %vm1093_vm3, %v1078_v33 }
 0x14e   : > { %v846_v34 = vpop.f32.mrb[36].mxu0  ;;  %v974_v35 = vpop.f32.mrb[36].mxu1 }
 0x14f   : > { %v847_v36 = vadd.f32 %v2256_v15, %v846_v34  ;;  %v975_v37 = vadd.f32 %v2256_v15, %v974_v35  ;;  %v848_v38 = vpop.f32.mrb[37].mxu0  ;;  %v976_v39 = vpop.f32.mrb[37].mxu1 }
 0x150   : > { %v849_v40 = vpop.f32.mrb[38].mxu0  ;;  %v977_v41 = vpop.f32.mrb[38].mxu1 }
 0x151   : > { %v1047_v42 = vmax.f32 %v847_v36, 0.0  ;;  %v1079_v43 = vmax.f32 %v975_v37, 0.0  ;;  %v850_v44 = vadd.f32 %v2256_v15, %v849_v40  ;;  %v978_v45 = vadd.f32 %v2256_v15, %v977_v41  ;;  %v851_v46 = vpop.f32.mrb[39].mxu0  ;;  %v979_v47 = vpop.f32.mrb[39].mxu1 }
 0x153   : > { %1112 = vst.msk [vmem:[%s2262_s12 + $0x90] sm:$0xff] %vm1093_vm3, %v1047_v42  ;;  %1144 = vst.msk [vmem:[%s2262_s12 + $0x190] sm:$0xff] %vm1093_vm3, %v1079_v43  ;;  %v1048_v48 = vmax.f32 %v850_v44, 0.0  ;;  %v1080_v49 = vmax.f32 %v978_v45, 0.0 }
 0x155   : > { %1113 = vst.msk [vmem:[%s2262_s12 + $0x98] sm:$0xff] %vm1093_vm3, %v1048_v48  ;;  %1145 = vst.msk [vmem:[%s2262_s12 + $0x198] sm:$0xff] %vm1093_vm3, %v1080_v49 }
 0x156   : > { %v854_v50 = vpop.f32.mrb[40].mxu0  ;;  %v982_v51 = vpop.f32.mrb[40].mxu1 }
 0x157   : > { %v855_v52 = vadd.f32 %v2256_v15, %v854_v50  ;;  %v983_v53 = vadd.f32 %v2256_v15, %v982_v51  ;;  %v856_v54 = vpop.f32.mrb[41].mxu0  ;;  %v984_v55 = vpop.f32.mrb[41].mxu1 }
 0x158   : > { %v857_v56 = vpop.f32.mrb[42].mxu0  ;;  %v985_v57 = vpop.f32.mrb[42].mxu1 }
 0x159   : > { %v1049_v58 = vmax.f32 %v855_v52, 0.0  ;;  %v1081_v59 = vmax.f32 %v983_v53, 0.0  ;;  %v858_v60 = vadd.f32 %v2256_v15, %v857_v56  ;;  %v986_v61 = vadd.f32 %v2256_v15, %v985_v57  ;;  %v859_v62 = vpop.f32.mrb[43].mxu0  ;;  %v987_v63 = vpop.f32.mrb[43].mxu1 }
 0x15b   : > { %1114 = vst.msk [vmem:[%s2262_s12 + $0xa0] sm:$0xff] %vm1093_vm3, %v1049_v58  ;;  %1146 = vst.msk [vmem:[%s2262_s12 + $0x1a0] sm:$0xff] %vm1093_vm3, %v1081_v59  ;;  %v1050_v0 = vmax.f32 %v858_v60, 0.0  ;;  %v1082_v1 = vmax.f32 %v986_v61, 0.0 }
 0x15d   : > { %1115 = vst.msk [vmem:[%s2262_s12 + $0xa8] sm:$0xff] %vm1093_vm3, %v1050_v0  ;;  %1147 = vst.msk [vmem:[%s2262_s12 + $0x1a8] sm:$0xff] %vm1093_vm3, %v1082_v1 }
 0x15e   : > { %v862_v2 = vpop.f32.mrb[44].mxu0  ;;  %v990_v3 = vpop.f32.mrb[44].mxu1 }
 0x15f   : > { %v863_v4 = vadd.f32 %v2256_v15, %v862_v2  ;;  %v991_v5 = vadd.f32 %v2256_v15, %v990_v3  ;;  %v864_v6 = vpop.f32.mrb[45].mxu0  ;;  %v992_v7 = vpop.f32.mrb[45].mxu1 }
 0x160   : > { %v865_v8 = vpop.f32.mrb[46].mxu0  ;;  %v993_v9 = vpop.f32.mrb[46].mxu1 }
 0x161   : > { %v1051_v10 = vmax.f32 %v863_v4, 0.0  ;;  %v1083_v11 = vmax.f32 %v991_v5, 0.0  ;;  %v866_v12 = vadd.f32 %v2256_v15, %v865_v8  ;;  %v994_v13 = vadd.f32 %v2256_v15, %v993_v9  ;;  %v867_v14 = vpop.f32.mrb[47].mxu0  ;;  %v995_v16 = vpop.f32.mrb[47].mxu1 }
 0x163   : > { %1116 = vst.msk [vmem:[%s2262_s12 + $0xb0] sm:$0xff] %vm1093_vm3, %v1051_v10  ;;  %1148 = vst.msk [vmem:[%s2262_s12 + $0x1b0] sm:$0xff] %vm1093_vm3, %v1083_v11  ;;  %v1052_v17 = vmax.f32 %v866_v12, 0.0  ;;  %v1084_v18 = vmax.f32 %v994_v13, 0.0 }
 0x165   : > { %1117 = vst.msk [vmem:[%s2262_s12 + $0xb8] sm:$0xff] %vm1093_vm3, %v1052_v17  ;;  %1149 = vst.msk [vmem:[%s2262_s12 + $0x1b8] sm:$0xff] %vm1093_vm3, %v1084_v18 }
 0x166   : > { %v870_v19 = vpop.f32.mrb[48].mxu0  ;;  %v998_v20 = vpop.f32.mrb[48].mxu1 }
 0x167   : > { %v871_v21 = vadd.f32 %v2256_v15, %v870_v19  ;;  %v999_v22 = vadd.f32 %v2256_v15, %v998_v20  ;;  %v872_v23 = vpop.f32.mrb[49].mxu0  ;;  %v1000_v24 = vpop.f32.mrb[49].mxu1 }
 0x168   : > { %v873_v25 = vpop.f32.mrb[50].mxu0  ;;  %v1001_v26 = vpop.f32.mrb[50].mxu1 }
 0x169   : > { %v1053_v27 = vmax.f32 %v871_v21, 0.0  ;;  %v1085_v28 = vmax.f32 %v999_v22, 0.0  ;;  %v874_v29 = vadd.f32 %v2256_v15, %v873_v25  ;;  %v1002_v30 = vadd.f32 %v2256_v15, %v1001_v26  ;;  %v875_v31 = vpop.f32.mrb[51].mxu0  ;;  %v1003_v32 = vpop.f32.mrb[51].mxu1 }
 0x16b   : > { %1118 = vst.msk [vmem:[%s2262_s12 + $0xc0] sm:$0xff] %vm1093_vm3, %v1053_v27  ;;  %1150 = vst.msk [vmem:[%s2262_s12 + $0x1c0] sm:$0xff] %vm1093_vm3, %v1085_v28  ;;  %v1054_v33 = vmax.f32 %v874_v29, 0.0  ;;  %v1086_v34 = vmax.f32 %v1002_v30, 0.0 }
 0x16d   : > { %1119 = vst.msk [vmem:[%s2262_s12 + $0xc8] sm:$0xff] %vm1093_vm3, %v1054_v33  ;;  %1151 = vst.msk [vmem:[%s2262_s12 + $0x1c8] sm:$0xff] %vm1093_vm3, %v1086_v34 }
 0x16e   : > { %v878_v35 = vpop.f32.mrb[52].mxu0  ;;  %v1006_v36 = vpop.f32.mrb[52].mxu1 }
 0x16f   : > { %v879_v37 = vadd.f32 %v2256_v15, %v878_v35  ;;  %v1007_v38 = vadd.f32 %v2256_v15, %v1006_v36  ;;  %v880_v39 = vpop.f32.mrb[53].mxu0  ;;  %v1008_v40 = vpop.f32.mrb[53].mxu1 }
 0x170   : > { %v881_v41 = vpop.f32.mrb[54].mxu0  ;;  %v1009_v42 = vpop.f32.mrb[54].mxu1 }
 0x171   : > { %v1055_v43 = vmax.f32 %v879_v37, 0.0  ;;  %v1087_v44 = vmax.f32 %v1007_v38, 0.0  ;;  %v882_v45 = vadd.f32 %v2256_v15, %v881_v41  ;;  %v1010_v46 = vadd.f32 %v2256_v15, %v1009_v42  ;;  %v883_v47 = vpop.f32.mrb[55].mxu0  ;;  %v1011_v48 = vpop.f32.mrb[55].mxu1 }
 0x173   : > { %1120 = vst.msk [vmem:[%s2262_s12 + $0xd0] sm:$0xff] %vm1093_vm3, %v1055_v43  ;;  %1152 = vst.msk [vmem:[%s2262_s12 + $0x1d0] sm:$0xff] %vm1093_vm3, %v1087_v44  ;;  %v1056_v49 = vmax.f32 %v882_v45, 0.0  ;;  %v1088_v50 = vmax.f32 %v1010_v46, 0.0 }
 0x175   : > { %1121 = vst.msk [vmem:[%s2262_s12 + $0xd8] sm:$0xff] %vm1093_vm3, %v1056_v49  ;;  %1153 = vst.msk [vmem:[%s2262_s12 + $0x1d8] sm:$0xff] %vm1093_vm3, %v1088_v50 }
 0x176   : > { %v886_v51 = vpop.f32.mrb[56].mxu0  ;;  %v1014_v52 = vpop.f32.mrb[56].mxu1 }
 0x177   : > { %v887_v53 = vadd.f32 %v2256_v15, %v886_v51  ;;  %v1015_v54 = vadd.f32 %v2256_v15, %v1014_v52  ;;  %v888_v55 = vpop.f32.mrb[57].mxu0  ;;  %v1016_v56 = vpop.f32.mrb[57].mxu1 }
 0x178   : > { %v889_v57 = vpop.f32.mrb[58].mxu0  ;;  %v1017_v58 = vpop.f32.mrb[58].mxu1 }
 0x179   : > { %v1057_v59 = vmax.f32 %v887_v53, 0.0  ;;  %v1089_v60 = vmax.f32 %v1015_v54, 0.0  ;;  %v890_v61 = vadd.f32 %v2256_v15, %v889_v57  ;;  %v1018_v62 = vadd.f32 %v2256_v15, %v1017_v58  ;;  %v891_v63 = vpop.f32.mrb[59].mxu0  ;;  %v1019_v0 = vpop.f32.mrb[59].mxu1 }
 0x17b   : > { %1122 = vst.msk [vmem:[%s2262_s12 + $0xe0] sm:$0xff] %vm1093_vm3, %v1057_v59  ;;  %1154 = vst.msk [vmem:[%s2262_s12 + $0x1e0] sm:$0xff] %vm1093_vm3, %v1089_v60  ;;  %v1058_v1 = vmax.f32 %v890_v61, 0.0  ;;  %v1090_v2 = vmax.f32 %v1018_v62, 0.0 }
 0x17d   : > { %1123 = vst.msk [vmem:[%s2262_s12 + $0xe8] sm:$0xff] %vm1093_vm3, %v1058_v1  ;;  %1155 = vst.msk [vmem:[%s2262_s12 + $0x1e8] sm:$0xff] %vm1093_vm3, %v1090_v2 }
 0x17e   : > { %v894_v3 = vpop.f32.mrb[60].mxu0  ;;  %v1022_v4 = vpop.f32.mrb[60].mxu1 }
 0x17f   : > { %v895_v5 = vadd.f32 %v2256_v15, %v894_v3  ;;  %v1023_v6 = vadd.f32 %v2256_v15, %v1022_v4  ;;  %v896_v7 = vpop.f32.mrb[61].mxu0  ;;  %v1024_v8 = vpop.f32.mrb[61].mxu1  ;;  %1164 = sbr.rel (!%p2112_p4) target bundleno = 462 (0x1ce), region = 36 }
 0x180   : > { %v897_v9 = vpop.f32.mrb[62].mxu0  ;;  %v1025_v10 = vpop.f32.mrb[62].mxu1 }
 0x181   : > { %v1059_v11 = vmax.f32 %v895_v5, 0.0  ;;  %v1091_v12 = vmax.f32 %v1023_v6, 0.0  ;;  %v898_v13 = vadd.f32 %v2256_v15, %v897_v9  ;;  %v1026_v14 = vadd.f32 %v2256_v15, %v1025_v10  ;;  %v899_v16 = vpop.f32.mrb[63].mxu0  ;;  %v1027_v17 = vpop.f32.mrb[63].mxu1 }
 0x183   : > { %1124 = vst.msk [vmem:[%s2262_s12 + $0xf0] sm:$0xff] %vm1093_vm3, %v1059_v11  ;;  %1156 = vst.msk [vmem:[%s2262_s12 + $0x1f0] sm:$0xff] %vm1093_vm3, %v1091_v12  ;;  %v1060_v18 = vmax.f32 %v898_v13, 0.0  ;;  %v1092_v19 = vmax.f32 %v1026_v14, 0.0 }
 0x185   : > { %1125 = vst.msk [vmem:[%s2262_s12 + $0xf8] sm:$0xff] %vm1093_vm3, %v1060_v18  ;;  %1157 = vst.msk [vmem:[%s2262_s12 + $0x1f8] sm:$0xff] %vm1093_vm3, %v1092_v19 }
 0x186   : > { %s2672_s4 = smov (!%p1167_p8, %s1166_s4), 64 }
 0x187   : > { %s1742_s9 = sshll.u32 %s2672_s4, 7 }
 0x188   : > { %p1745_p9 = scmp.eq.s32.totalorder %s1742_s9, 0 }
 0x189   : > { %s2465_s10 = sshrl.u32 (!%p1745_p9), %s2672_s4, 6 }
 0x18a   : > { %1175 = sbr.rel (%p1745_p9) target bundleno = 462 (0x1ce), region = 40  ;;  %p1746_p10 = scmp.le.s32.totalorder (!%p1745_p9), %s2465_s10, 0 }
 0x191   : > { %1581 = sbr.rel (%p1746_p10) target bundleno = 441 (0x1b9), region = 116  ;;  %s2663_s15 = smov (!%p1746_p10), %s2459_s8 }
 0x192   : > { %s2664_s20 = smov (!%p1746_p10), %s2262_s12  ;;  %s2474_s27 = smov (!%p1746_p10), 0  }
 0x193   : > { %s2476_s11 = smov (!%p1746_p10), 0  }
 0x198 LB: >> { %v1363_v15 = vld [vmem:[%s2039_s20] sm:$0xff]  ;;  %v1365_v20 = vld [vmem:[%s2039_s20 + $0x8] sm:$0xff]  ;;  %v1367_v21 = vld [vmem:[%s2039_s20 + $0x10] sm:$0xff]  ;;  %s1491_s14 = sadd.s32 1, %s2043_s27  ;;  %s1357_s11 = sadd.s32 1, %s2047_s11   ;;  %s2047_s11 = sphi %s2476_s11, %s1357_s11   ;;  %s2043_s27 = sphi %s2474_s27, %s2667_s27   ;;  %s2039_s20 = sphi %s2664_s20, %s2666_s20   ;;  %s2035_s15 = sphi %s2663_s15, %s2665_s15  }
 0x199   : >> { %1364 = vst [vmem:[%s2035_s15] sm:$0xff] %v1363_v15  ;;  %1366 = vst [vmem:[%s2035_s15 + $0x8] sm:$0xff] %v1365_v20  ;;  %v1369_v22 = vld [vmem:[%s2039_s20 + $0x18] sm:$0xff]  ;;  %v1371_v23 = vld [vmem:[%s2039_s20 + $0x20] sm:$0xff]  ;;  %p1492_p11 = scmp.ge.s32.totalorder %s1491_s14, %s2465_s10  ;;  %p1356_p12 = scmp.ge.s32.totalorder %s1357_s11, %s2465_s10 }
 0x19a   : >> { %1368 = vst [vmem:[%s2035_s15 + $0x10] sm:$0xff] %v1367_v21  ;;  %v1373_v24 = vld [vmem:[%s2039_s20 + $0x28] sm:$0xff]  ;;  %1370 = vst [vmem:[%s2035_s15 + $0x18] sm:$0xff] %v1369_v22  ;;  %v1375_v25 = vld [vmem:[%s2039_s20 + $0x30] sm:$0xff] }
 0x19b   : >> { %1372 = vst [vmem:[%s2035_s15 + $0x20] sm:$0xff] %v1371_v23  ;;  %1374 = vst [vmem:[%s2035_s15 + $0x28] sm:$0xff] %v1373_v24  ;;  %v1377_v26 = vld [vmem:[%s2039_s20 + $0x38] sm:$0xff]  ;;  %v1379_v27 = vld [vmem:[%s2039_s20 + $0x40] sm:$0xff]  ;;  %s2674_s14 = smov (%p1492_p11, %s1491_s14), 0 }
 0x19c   : >> { %1376 = vst [vmem:[%s2035_s15 + $0x30] sm:$0xff] %v1375_v25  ;;  %1378 = vst [vmem:[%s2035_s15 + $0x38] sm:$0xff] %v1377_v26  ;;  %v1381_v28 = vld [vmem:[%s2039_s20 + $0x48] sm:$0xff]  ;;  %v1383_v29 = vld [vmem:[%s2039_s20 + $0x50] sm:$0xff]  ;;  %s1747_s17 = sshll.u32 %s2674_s14, 9  ;;  %s2667_s27 = smov %s2674_s14 }
 0x19d   : >> { %1380 = vst [vmem:[%s2035_s15 + $0x40] sm:$0xff] %v1379_v27  ;;  %v1385_v30 = vld [vmem:[%s2039_s20 + $0x58] sm:$0xff]  ;;  %1382 = vst [vmem:[%s2035_s15 + $0x48] sm:$0xff] %v1381_v28  ;;  %v1387_v31 = vld [vmem:[%s2039_s20 + $0x60] sm:$0xff]  ;;  %s2532_s18 = scalar_lea.vmem %s2262_s12, %s1747_s17 [#allocation2]   ;;  %s2535_s21 = scalar_lea.vmem %s2459_s8, %s1747_s17  }
 0x19e   : >> { %1384 = vst [vmem:[%s2035_s15 + $0x50] sm:$0xff] %v1383_v29  ;;  %1386 = vst [vmem:[%s2035_s15 + $0x58] sm:$0xff] %v1385_v30  ;;  %v1389_v32 = vld [vmem:[%s2039_s20 + $0x68] sm:$0xff]  ;;  %v1391_v33 = vld [vmem:[%s2039_s20 + $0x70] sm:$0xff] }
 0x19f   : >> { %1388 = vst [vmem:[%s2035_s15 + $0x60] sm:$0xff] %v1387_v31  ;;  %1390 = vst [vmem:[%s2035_s15 + $0x68] sm:$0xff] %v1389_v32  ;;  %v1393_v34 = vld [vmem:[%s2039_s20 + $0x78] sm:$0xff]  ;;  %v1395_v35 = vld [vmem:[%s2039_s20 + $0x80] sm:$0xff] }
 0x1a0   : >> { %1392 = vst [vmem:[%s2035_s15 + $0x70] sm:$0xff] %v1391_v33  ;;  %v1397_v36 = vld [vmem:[%s2039_s20 + $0x88] sm:$0xff]  ;;  %1394 = vst [vmem:[%s2035_s15 + $0x78] sm:$0xff] %v1393_v34  ;;  %v1399_v37 = vld [vmem:[%s2039_s20 + $0x90] sm:$0xff] }
 0x1a1   : >> { %1396 = vst [vmem:[%s2035_s15 + $0x80] sm:$0xff] %v1395_v35  ;;  %1398 = vst [vmem:[%s2035_s15 + $0x88] sm:$0xff] %v1397_v36  ;;  %v1401_v38 = vld [vmem:[%s2039_s20 + $0x98] sm:$0xff]  ;;  %v1403_v39 = vld [vmem:[%s2039_s20 + $0xa0] sm:$0xff] }
 0x1a2   : >> { %1400 = vst [vmem:[%s2035_s15 + $0x90] sm:$0xff] %v1399_v37  ;;  %1402 = vst [vmem:[%s2035_s15 + $0x98] sm:$0xff] %v1401_v38  ;;  %v1405_v40 = vld [vmem:[%s2039_s20 + $0xa8] sm:$0xff]  ;;  %v1407_v41 = vld [vmem:[%s2039_s20 + $0xb0] sm:$0xff] }
 0x1a3   : >> { %1404 = vst [vmem:[%s2035_s15 + $0xa0] sm:$0xff] %v1403_v39  ;;  %v1409_v42 = vld [vmem:[%s2039_s20 + $0xb8] sm:$0xff]  ;;  %1406 = vst [vmem:[%s2035_s15 + $0xa8] sm:$0xff] %v1405_v40  ;;  %v1411_v43 = vld [vmem:[%s2039_s20 + $0xc0] sm:$0xff] }
 0x1a4   : >> { %1408 = vst [vmem:[%s2035_s15 + $0xb0] sm:$0xff] %v1407_v41  ;;  %1410 = vst [vmem:[%s2035_s15 + $0xb8] sm:$0xff] %v1409_v42  ;;  %v1413_v44 = vld [vmem:[%s2039_s20 + $0xc8] sm:$0xff]  ;;  %v1415_v45 = vld [vmem:[%s2039_s20 + $0xd0] sm:$0xff] }
 0x1a5   : >> { %1412 = vst [vmem:[%s2035_s15 + $0xc0] sm:$0xff] %v1411_v43  ;;  %1414 = vst [vmem:[%s2035_s15 + $0xc8] sm:$0xff] %v1413_v44  ;;  %v1417_v46 = vld [vmem:[%s2039_s20 + $0xd8] sm:$0xff]  ;;  %v1419_v47 = vld [vmem:[%s2039_s20 + $0xe0] sm:$0xff] }
 0x1a6   : >> { %1416 = vst [vmem:[%s2035_s15 + $0xd0] sm:$0xff] %v1415_v45  ;;  %v1421_v48 = vld [vmem:[%s2039_s20 + $0xe8] sm:$0xff]  ;;  %1418 = vst [vmem:[%s2035_s15 + $0xd8] sm:$0xff] %v1417_v46  ;;  %v1423_v49 = vld [vmem:[%s2039_s20 + $0xf0] sm:$0xff] }
 0x1a7   : >> { %1420 = vst [vmem:[%s2035_s15 + $0xe0] sm:$0xff] %v1419_v47  ;;  %1422 = vst [vmem:[%s2035_s15 + $0xe8] sm:$0xff] %v1421_v48  ;;  %v1425_v50 = vld [vmem:[%s2039_s20 + $0xf8] sm:$0xff]  ;;  %v1427_v51 = vld [vmem:[%s2039_s20 + $0x100] sm:$0xff] }
 0x1a8   : >> { %1424 = vst [vmem:[%s2035_s15 + $0xf0] sm:$0xff] %v1423_v49  ;;  %1426 = vst [vmem:[%s2035_s15 + $0xf8] sm:$0xff] %v1425_v50  ;;  %v1429_v52 = vld [vmem:[%s2039_s20 + $0x108] sm:$0xff]  ;;  %v1431_v53 = vld [vmem:[%s2039_s20 + $0x110] sm:$0xff] }
 0x1a9   : >> { %1428 = vst [vmem:[%s2035_s15 + $0x100] sm:$0xff] %v1427_v51  ;;  %v1433_v54 = vld [vmem:[%s2039_s20 + $0x118] sm:$0xff]  ;;  %1430 = vst [vmem:[%s2035_s15 + $0x108] sm:$0xff] %v1429_v52  ;;  %v1435_v55 = vld [vmem:[%s2039_s20 + $0x120] sm:$0xff] }
 0x1aa   : >> { %1432 = vst [vmem:[%s2035_s15 + $0x110] sm:$0xff] %v1431_v53  ;;  %1434 = vst [vmem:[%s2035_s15 + $0x118] sm:$0xff] %v1433_v54  ;;  %v1437_v56 = vld [vmem:[%s2039_s20 + $0x128] sm:$0xff]  ;;  %v1439_v57 = vld [vmem:[%s2039_s20 + $0x130] sm:$0xff] }
 0x1ab   : >> { %1436 = vst [vmem:[%s2035_s15 + $0x120] sm:$0xff] %v1435_v55  ;;  %1438 = vst [vmem:[%s2035_s15 + $0x128] sm:$0xff] %v1437_v56  ;;  %v1441_v58 = vld [vmem:[%s2039_s20 + $0x138] sm:$0xff]  ;;  %v1443_v59 = vld [vmem:[%s2039_s20 + $0x140] sm:$0xff] }
 0x1ac   : >> { %1440 = vst [vmem:[%s2035_s15 + $0x130] sm:$0xff] %v1439_v57  ;;  %v1445_v60 = vld [vmem:[%s2039_s20 + $0x148] sm:$0xff]  ;;  %1442 = vst [vmem:[%s2035_s15 + $0x138] sm:$0xff] %v1441_v58  ;;  %v1447_v61 = vld [vmem:[%s2039_s20 + $0x150] sm:$0xff] }
 0x1ad   : >> { %1444 = vst [vmem:[%s2035_s15 + $0x140] sm:$0xff] %v1443_v59  ;;  %1446 = vst [vmem:[%s2035_s15 + $0x148] sm:$0xff] %v1445_v60  ;;  %v1449_v62 = vld [vmem:[%s2039_s20 + $0x158] sm:$0xff]  ;;  %v1451_v63 = vld [vmem:[%s2039_s20 + $0x160] sm:$0xff] }
 0x1ae   : >> { %1448 = vst [vmem:[%s2035_s15 + $0x150] sm:$0xff] %v1447_v61  ;;  %1450 = vst [vmem:[%s2035_s15 + $0x158] sm:$0xff] %v1449_v62  ;;  %v1453_v0 = vld [vmem:[%s2039_s20 + $0x168] sm:$0xff]  ;;  %v1455_v1 = vld [vmem:[%s2039_s20 + $0x170] sm:$0xff] }
 0x1af   : >> { %1452 = vst [vmem:[%s2035_s15 + $0x160] sm:$0xff] %v1451_v63  ;;  %v1457_v2 = vld [vmem:[%s2039_s20 + $0x178] sm:$0xff]  ;;  %1454 = vst [vmem:[%s2035_s15 + $0x168] sm:$0xff] %v1453_v0  ;;  %v1459_v3 = vld [vmem:[%s2039_s20 + $0x180] sm:$0xff] }
 0x1b0   : >> { %1456 = vst [vmem:[%s2035_s15 + $0x170] sm:$0xff] %v1455_v1  ;;  %1458 = vst [vmem:[%s2035_s15 + $0x178] sm:$0xff] %v1457_v2  ;;  %v1461_v4 = vld [vmem:[%s2039_s20 + $0x188] sm:$0xff]  ;;  %v1463_v5 = vld [vmem:[%s2039_s20 + $0x190] sm:$0xff] }
 0x1b1   : >> { %1460 = vst [vmem:[%s2035_s15 + $0x180] sm:$0xff] %v1459_v3  ;;  %1462 = vst [vmem:[%s2035_s15 + $0x188] sm:$0xff] %v1461_v4  ;;  %v1465_v6 = vld [vmem:[%s2039_s20 + $0x198] sm:$0xff]  ;;  %v1467_v7 = vld [vmem:[%s2039_s20 + $0x1a0] sm:$0xff] }
 0x1b2   : >> { %1464 = vst [vmem:[%s2035_s15 + $0x190] sm:$0xff] %v1463_v5  ;;  %v1469_v8 = vld [vmem:[%s2039_s20 + $0x1a8] sm:$0xff]  ;;  %1466 = vst [vmem:[%s2035_s15 + $0x198] sm:$0xff] %v1465_v6  ;;  %v1471_v9 = vld [vmem:[%s2039_s20 + $0x1b0] sm:$0xff]  ;;  %1359 = sbr.rel (!%p1356_p12) target bundleno = 408 (0x198), region = 122 }
 0x1b3   : >> { %1468 = vst [vmem:[%s2035_s15 + $0x1a0] sm:$0xff] %v1467_v7  ;;  %1470 = vst [vmem:[%s2035_s15 + $0x1a8] sm:$0xff] %v1469_v8  ;;  %v1473_v10 = vld [vmem:[%s2039_s20 + $0x1b8] sm:$0xff]  ;;  %v1475_v11 = vld [vmem:[%s2039_s20 + $0x1c0] sm:$0xff] }
 0x1b4   : >> { %1472 = vst [vmem:[%s2035_s15 + $0x1b0] sm:$0xff] %v1471_v9  ;;  %1474 = vst [vmem:[%s2035_s15 + $0x1b8] sm:$0xff] %v1473_v10  ;;  %v1477_v12 = vld [vmem:[%s2039_s20 + $0x1c8] sm:$0xff]  ;;  %v1479_v13 = vld [vmem:[%s2039_s20 + $0x1d0] sm:$0xff] }
 0x1b5   : >> { %1476 = vst [vmem:[%s2035_s15 + $0x1c0] sm:$0xff] %v1475_v11  ;;  %v1481_v14 = vld [vmem:[%s2039_s20 + $0x1d8] sm:$0xff]  ;;  %1478 = vst [vmem:[%s2035_s15 + $0x1c8] sm:$0xff] %v1477_v12  ;;  %v1483_v16 = vld [vmem:[%s2039_s20 + $0x1e0] sm:$0xff] }
 0x1b6   : >> { %1480 = vst [vmem:[%s2035_s15 + $0x1d0] sm:$0xff] %v1479_v13  ;;  %1482 = vst [vmem:[%s2035_s15 + $0x1d8] sm:$0xff] %v1481_v14  ;;  %v1485_v17 = vld [vmem:[%s2039_s20 + $0x1e8] sm:$0xff]  ;;  %v1487_v18 = vld [vmem:[%s2039_s20 + $0x1f0] sm:$0xff] }
 0x1b7   : >> { %1484 = vst [vmem:[%s2035_s15 + $0x1e0] sm:$0xff] %v1483_v16  ;;  %1486 = vst [vmem:[%s2035_s15 + $0x1e8] sm:$0xff] %v1485_v17  ;;  %v1489_v19 = vld [vmem:[%s2039_s20 + $0x1f8] sm:$0xff]  ;;  %s2666_s20 = smov %s2532_s18 }
 0x1b8   : >> { %1488 = vst [vmem:[%s2035_s15 + $0x1f0] sm:$0xff] %v1487_v18  ;;  %1490 = vst [vmem:[%s2035_s15 + $0x1f8] sm:$0xff] %v1489_v19  ;;  %s2665_s15 = smov %s2535_s21 }
 0x1b9 PF: > { %s2640_s22 = sand.u32 63, %s2672_s4   ;;  %s1759_s23 = sshll.u32 %s2465_s10, 9 }
 0x1ba   : > { %s1502_s24 = scalar_lea.vmem %s2262_s12, %s1759_s23 [#allocation2]   ;;  %s1504_s25 = scalar_lea.vmem %s2459_s8, %s1759_s23  }
 0x1bb   : > { %p1752_p13 = scmp.le.s32.totalorder %s2640_s22, 0 }
 0x1bc   : > { %s2049_s26 = smov (!%p1752_p13), %s1504_s25   ;;  %s2053_s28 = smov (!%p1752_p13), %s1502_s24  }
 0x1bd   : > { %1595 = sbr.rel (%p1752_p13) target bundleno = 462 (0x1ce), region = 127  ;;  %s2057_s29 = smov (!%p1752_p13), 0  }
 0x1be   : > { %s2061_s30 = smov (!%p1752_p13), 0  }
 0x1c4 LB: >> { %v1514_v15 = vld [vmem:[%s2055_s28] sm:$0xff]  ;;  %s1516_s4 = sadd.s32 1, %s2059_s29  ;;  %s1508_s30 = sadd.s32 1, %s2063_s30   ;;  %s2063_s30 = sphi %s2061_s30, %s1508_s30   ;;  %s2059_s29 = sphi %s2057_s29, %s2058_s29   ;;  %s2055_s28 = sphi %s2053_s28, %s1521_s28   ;;  %s2051_s26 = sphi %s2049_s26, %s1522_s26  }
 0x1c5   : >> { %1515 = vst [vmem:[%s2051_s26] sm:$0xff] %v1514_v15  ;;  %p1517_p0 = scmp.ge.s32.totalorder %s1516_s4, %s2640_s22  ;;  %p1507_p1 = scmp.ge.s32.totalorder %s1508_s30, %s2640_s22 }
 0x1c7   : >> { %s2676_s4 = smov (%p1517_p0, %s1516_s4), 0  ;;  %1510 = sbr.rel (!%p1507_p1) target bundleno = 452 (0x1c4), region = 133 }
 0x1c8   : >> { %s1753_s12 = sshll.u32 %s2676_s4, 3  ;;  %s2058_s29 = smov %s2676_s4  }
 0x1c9   : >> { %s1521_s28 = scalar_lea.vmem %s1502_s24, %s1753_s12 [#allocation2]   ;;  %s1522_s26 = scalar_lea.vmem %s1504_s25, %s1753_s12  }
 0x1ce PF: > { %p10_p2 = scmp.ge.s32.totalorder %s2102_s16, 13   ;;  %s2668_s12 = smov %s2027_s13 }
 0x1cf   : > { %s2669_s13 = smov %s2110_s19  ;;  %s2670_s14 = smov %s2102_s16 }
 0x1d0   :  { %12 = sbr.rel (!%p10_p2) target bundleno = 2 (0x2), region = 144 }

// kernel: _lambda_.9
= control target key start
LH: loop header
LB: loop body
LE: loop exit
PB: predicated region body
PF: predicated region fallthrough
CT: control target
= control target key end

     0   :  { %s1912_s12 = smov 0   ;;  %s1914_s13 = smov 0   ;;  %s2439_s0 = inlined_call_operand.vmem [shape: bf16[1296,96], index: 0, kind: input, shape index: {}]   ;;  %s2440_s1 = inlined_call_operand.vmem [shape: bf16[96,16], index: 1, kind: input, shape index: {}]   ;;  %s2441_s2 = inlined_call_operand.vmem [shape: f32[1,16], index: 2, kind: input, shape index: {}]   ;;  %s2442_s3 = inlined_call_operand.vmem [shape: f32[1296,16], index: 3, kind: output, shape index: {}]  }
   0x1   :  { %s1916_s14 = smov 0  }
   0x2 LB: > { %s1925_s15 = sadd.s32 4294967295, %s1858_s14   ;;  %s1927_s16 = sadd.s32 1, %s1858_s14   ;;  %s1858_s14 = sphi %s1916_s14, %s2451_s14   ;;  %s1854_s13 = sphi %s1914_s13, %s2450_s13   ;;  %s1850_s12 = sphi %s1912_s12, %s2449_s12  }
   0x3   : > { %s85_s17 = ssub.s32 %s1858_s14, %s1927_s16  ;;  %s88_s18 = sadd.s32 1, %s1854_s13 }
   0x4   : > { %p86_p0 = scmp.eq.s32.totalorder %s85_s17, 0  ;;  %p98_p1 = scmp.ne.s32.totalorder %s1854_s13, %s1850_s12 }
   0x5   : > { %p99_p2 = scmp.eq.s32.totalorder %s1925_s15, 2  ;;  %p1457_p3 = scmp.ge.s32.totalorder %s1858_s14, 1 }
   0x6   : > { %s1935_s19 = scalar_select %p86_p0, %s1854_s13, %s88_s18  }
   0x7   : > { %p1937_p4 = por %p99_p2, %p98_p1  ;;  %p146_p5 = scmp.lt.s32.totalorder %s1858_s14, 4 }
   0x9   : > { %p147_p6 = pnand %p1457_p3, %p146_p5 }
   0xa   : > { %v1766_v0 = vld [vmem:[%s2440_s1] sm:$0xff] (!%p147_p6)   ;;  %s1945_s23 = sshll.u32 (!%p147_p6), %s1925_s15, 6  ;;  %v1767_v1 = vld [vmem:[%s2440_s1 + $0x8] sm:$0xff] (!%p147_p6)   ;;  %v1768_v2 = vld [vmem:[%s2440_s1 + $0x10] sm:$0xff] (!%p147_p6)   ;;  %vm472_vm0 = vcmask (!%p147_p6), 785408   ;;  %s170_s14 = sand.u32 (!%p147_p6), 1, %s1850_s12  }
   0xb   : > { %150 = sbr.rel (%p147_p6) target bundleno = 384 (0x180), region = 32  ;;  %p178_p7 = scmp.lt.s32.totalorder (!%p147_p6), %s1945_s23, 161  ;;  %1590 = vmatprep.subr.bf16.mxu0 (!%p147_p6), %v1766_v0  ;;  %1666 = vmatprep.subr.bf16.mxu1 (!%p147_p6), %v1766_v0  ;;  %v1769_v3 = vld [vmem:[%s2440_s1 + $0x18] sm:$0xff] (!%p147_p6)   ;;  %v1770_v6 = vld [vmem:[%s2440_s1 + $0x20] sm:$0xff] (!%p147_p6)   ;;  %v1771_v7 = vld [vmem:[%s2440_s1 + $0x28] sm:$0xff] (!%p147_p6)   ;;  %vm922_vm1 = vcmask (!%p147_p6), 130048  }
   0xc   : > { %1591 = vmatpush3.bf16.msra.mxu0 (!%p147_p6), %v1766_v0  ;;  %1672 = vmatpush3.bf16.msra.mxu1 (!%p147_p6), %v1766_v0  ;;  %v2037_v38 = vld [vmem:[%s2441_s2] ss:$0 sm:$0xff] (!%p147_p6)  ;;  %s1458_s21 = sshll.u32 (!%p147_p6), %s170_s14, 9 }
   0xd   : > { %1592 = vmatprep.subr.bf16.mxu0 (!%p147_p6), %v1767_v1  ;;  %1667 = vmatprep.subr.bf16.mxu1 (!%p147_p6), %v1767_v1  ;;  %s2047_s12 = scalar_lea.vmem (!%p147_p6), [#allocation2], %s1458_s21  }
  0x10   : > { %1593 = vmatpush3.bf16.msra.mxu0 (!%p147_p6), %v1767_v1  ;;  %1673 = vmatpush3.bf16.msra.mxu1 (!%p147_p6), %v1767_v1 }
  0x11   : > { %1594 = vmatprep.subr.bf16.mxu0 (!%p147_p6), %v1768_v2  ;;  %1668 = vmatprep.subr.bf16.mxu1 (!%p147_p6), %v1768_v2 }
  0x12   : > { %s179_s26 = scalar_select %p178_p7, %s1945_s23, 161 }
  0x13   : > { %s995_s22 = ssub.s32 (%p1937_p4), 162, %s1945_s23  ;;  %s1549_s24 = sshll.u32 (%p1937_p4), %s1925_s15, 9 }
  0x14   : > { %s1460_s29 = sshll.u32 %s179_s26, 2  ;;  %1595 = vmatpush3.bf16.msra.mxu0 %v1768_v2  ;;  %1674 = vmatpush3.bf16.msra.mxu1 %v1768_v2  ;;  %p996_p8 = scmp.lt.s32.totalorder (%p1937_p4), %s995_s22, 64 }
  0x15   : > { %s1961_s7 = scalar_lea.vmem %s2439_s0, %s1460_s29  ;;  %1596 = vmatprep.subr.bf16.mxu0 %v1769_v3  ;;  %1669 = vmatprep.subr.bf16.mxu1 %v1769_v3  ;;  %s2240_s27 = scalar_lea.vmem (%p1937_p4), %s2442_s3, %s1549_s24  }
  0x16   : > { %v1772_v4 = vld [vmem:[%s1961_s7] sm:$0xff]   ;;  %v1774_v8 = vld [vmem:[%s1961_s7 + $0x8] sm:$0xff]   ;;  %v1776_v10 = vld [vmem:[%s1961_s7 + $0x10] sm:$0xff]  }
  0x17   : > { %v1773_v5 = vld [vmem:[%s1961_s7 + $0x80] sm:$0xff]   ;;  %1602 = vmatprep.mubr.msk.bf16.mxu0 %vm472_vm0, %v1772_v4  ;;  %v1775_v9 = vld [vmem:[%s1961_s7 + $0x88] sm:$0xff]   ;;  %v1777_v11 = vld [vmem:[%s1961_s7 + $0x90] sm:$0xff]  }
  0x18   : > { %1634 = vmatprep.mubr.msk.bf16.mxu1 %vm472_vm0, %v1773_v5  ;;  %1597 = vmatpush3.bf16.msra.mxu0 %v1769_v3  ;;  %v1778_v12 = vld [vmem:[%s1961_s7 + $0x18] sm:$0xff]   ;;  %v1780_v14 = vld [vmem:[%s1961_s7 + $0x20] sm:$0xff]   ;;  %v1782_v16 = vld [vmem:[%s1961_s7 + $0x28] sm:$0xff]  }
  0x19   : > { %1675 = vmatpush3.bf16.msra.mxu1 %v1769_v3  ;;  %1598 = vmatprep.subr.bf16.mxu0 %v1770_v6  ;;  %v1779_v13 = vld [vmem:[%s1961_s7 + $0x98] sm:$0xff]   ;;  %v1781_v15 = vld [vmem:[%s1961_s7 + $0xa0] sm:$0xff]   ;;  %v1783_v17 = vld [vmem:[%s1961_s7 + $0xa8] sm:$0xff]  }
  0x1a   : > { %1670 = vmatprep.subr.bf16.mxu1 %v1770_v6  ;;  %v1784_v18 = vld [vmem:[%s1961_s7 + $0x30] sm:$0xff]   ;;  %v1786_v20 = vld [vmem:[%s1961_s7 + $0x38] sm:$0xff]   ;;  %v1788_v22 = vld [vmem:[%s1961_s7 + $0x40] sm:$0xff]  }
  0x1b   : > { %v1785_v19 = vld [vmem:[%s1961_s7 + $0xb0] sm:$0xff]   ;;  %v1787_v21 = vld [vmem:[%s1961_s7 + $0xb8] sm:$0xff]   ;;  %v1789_v23 = vld [vmem:[%s1961_s7 + $0xc0] sm:$0xff]  }
  0x1c   : > { %1599 = vmatpush3.bf16.msra.mxu0 %v1770_v6  ;;  %v1790_v24 = vld [vmem:[%s1961_s7 + $0x48] sm:$0xff]   ;;  %v1792_v26 = vld [vmem:[%s1961_s7 + $0x50] sm:$0xff]   ;;  %v1794_v28 = vld [vmem:[%s1961_s7 + $0x58] sm:$0xff]  }
  0x1d   : > { %1676 = vmatpush3.bf16.msra.mxu1 %v1770_v6  ;;  %1600 = vmatprep.subr.bf16.mxu0 %v1771_v7  ;;  %v1791_v25 = vld [vmem:[%s1961_s7 + $0xc8] sm:$0xff]   ;;  %v1793_v27 = vld [vmem:[%s1961_s7 + $0xd0] sm:$0xff]   ;;  %v1795_v29 = vld [vmem:[%s1961_s7 + $0xd8] sm:$0xff]  }
  0x1e   : > { %1671 = vmatprep.subr.bf16.mxu1 %v1771_v7  ;;  %v1796_v30 = vld [vmem:[%s1961_s7 + $0x60] sm:$0xff]   ;;  %v1798_v32 = vld [vmem:[%s1961_s7 + $0x68] sm:$0xff]   ;;  %v1800_v34 = vld [vmem:[%s1961_s7 + $0x70] sm:$0xff]  }
  0x1f   : > { %v1797_v31 = vld [vmem:[%s1961_s7 + $0xe0] sm:$0xff]   ;;  %v1799_v33 = vld [vmem:[%s1961_s7 + $0xe8] sm:$0xff]   ;;  %v1801_v35 = vld [vmem:[%s1961_s7 + $0xf0] sm:$0xff]  }
  0x20   : > { %1601 = vmatpush3.bf16.msra.mxu0 %v1771_v7  ;;  %v1802_v36 = vld [vmem:[%s1961_s7 + $0x78] sm:$0xff]  }
  0x21   : > { %1677 = vmatpush3.bf16.msra.mxu1 %v1771_v7  ;;  %v1803_v37 = vld [vmem:[%s1961_s7 + $0xf8] sm:$0xff]  }
  0x23   : > { %1603 = vmatmul.mubr.msk.bf16.vlgmr.msra.gmra.mrb[0].mxu0 %vm472_vm0, %v1774_v8 }
  0x24   : > { %1635 = vmatmul.mubr.msk.bf16.vlgmr.msra.gmra.mrb[0].mxu1 %vm472_vm0, %v1775_v9  ;;  %1606 = vmatprep.mubr.msk.bf16.mxu0 %vm472_vm0, %v1776_v10 }
  0x25   : > { %1638 = vmatprep.mubr.msk.bf16.mxu1 %vm472_vm0, %v1777_v11 }
  0x2b   : > { %1607 = vmatmul.mubr.msk.bf16.gmra.mrb[4].mxu0 %vm472_vm0, %v1778_v12 }
  0x2c   : > { %1639 = vmatmul.mubr.msk.bf16.gmra.mrb[4].mxu1 %vm472_vm0, %v1779_v13  ;;  %1610 = vmatprep.mubr.msk.bf16.mxu0 %vm472_vm0, %v1780_v14 }
  0x2d   : > { %1642 = vmatprep.mubr.msk.bf16.mxu1 %vm472_vm0, %v1781_v15 }
  0x33   : > { %1611 = vmatmul.mubr.msk.bf16.gmra.mrb[8].mxu0 %vm472_vm0, %v1782_v16 }
  0x34   : > { %1643 = vmatmul.mubr.msk.bf16.gmra.mrb[8].mxu1 %vm472_vm0, %v1783_v17  ;;  %1614 = vmatprep.mubr.msk.bf16.mxu0 %vm472_vm0, %v1784_v18 }
  0x35   : > { %1646 = vmatprep.mubr.msk.bf16.mxu1 %vm472_vm0, %v1785_v19 }
  0x3b   : > { %1615 = vmatmul.mubr.msk.bf16.gmra.mrb[12].mxu0 %vm472_vm0, %v1786_v20 }
  0x3c   : > { %1647 = vmatmul.mubr.msk.bf16.gmra.mrb[12].mxu1 %vm472_vm0, %v1787_v21  ;;  %1618 = vmatprep.mubr.msk.bf16.mxu0 %vm472_vm0, %v1788_v22 }
  0x3d   : > { %1650 = vmatprep.mubr.msk.bf16.mxu1 %vm472_vm0, %v1789_v23 }
  0x43   : > { %1619 = vmatmul.mubr.msk.bf16.gmra.mrb[16].mxu0 %vm472_vm0, %v1790_v24 }
  0x44   : > { %1651 = vmatmul.mubr.msk.bf16.gmra.mrb[16].mxu1 %vm472_vm0, %v1791_v25  ;;  %1622 = vmatprep.mubr.msk.bf16.mxu0 %vm472_vm0, %v1792_v26 }
  0x45   : > { %1654 = vmatprep.mubr.msk.bf16.mxu1 %vm472_vm0, %v1793_v27 }
  0x4b   : > { %1623 = vmatmul.mubr.msk.bf16.gmra.mrb[20].mxu0 %vm472_vm0, %v1794_v28 }
  0x4c   : > { %1655 = vmatmul.mubr.msk.bf16.gmra.mrb[20].mxu1 %vm472_vm0, %v1795_v29  ;;  %1626 = vmatprep.mubr.msk.bf16.mxu0 %vm472_vm0, %v1796_v30 }
  0x4d   : > { %1658 = vmatprep.mubr.msk.bf16.mxu1 %vm472_vm0, %v1797_v31 }
  0x53   : > { %1627 = vmatmul.mubr.msk.bf16.gmra.mrb[24].mxu0 %vm472_vm0, %v1798_v32 }
  0x54   : > { %1659 = vmatmul.mubr.msk.bf16.gmra.mrb[24].mxu1 %vm472_vm0, %v1799_v33  ;;  %1630 = vmatprep.mubr.msk.bf16.mxu0 %vm472_vm0, %v1800_v34 }
  0x55   : > { %1662 = vmatprep.mubr.msk.bf16.mxu1 %vm472_vm0, %v1801_v35 }
  0x5b   : > { %1631 = vmatmul.mubr.msk.bf16.gmra.mrb[28].mxu0 %vm472_vm0, %v1802_v36 }
  0x5c   : > { %1663 = vmatmul.mubr.msk.bf16.gmra.mrb[28].mxu1 %vm472_vm0, %v1803_v37 }
  0xf6   : > { %v1604_v39 = vpop.f32.mrb[0].mxu0 }
  0xf7   : > { %v1636_v40 = vpop.f32.mrb[0].mxu1  ;;  %v612_v41 = vadd.f32 %v1604_v39, %v2037_v38  ;;  %v603_v43 = vpop.f32.mrb[1].mxu0 }
  0xf8   : > { %v740_v42 = vadd.f32 %v1636_v40, %v2037_v38  ;;  %v731_v44 = vpop.f32.mrb[1].mxu1  ;;  %v604_v45 = vadd.f32 %v2037_v38, %v603_v43  ;;  %v1605_v47 = vpop.f32.mrb[2].mxu0 }
  0xf9   : > { %v732_v46 = vadd.f32 %v2037_v38, %v731_v44  ;;  %v1637_v48 = vpop.f32.mrb[2].mxu1  ;;  %v860_v49 = vmax.f32 %v612_v41, 0.0  ;;  %v615_v51 = vadd.f32 %v1605_v47, %v2037_v38  ;;  %v606_v53 = vpop.f32.mrb[3].mxu0 }
  0xfa   : > { %v892_v50 = vmax.f32 %v740_v42, 0.0  ;;  %v743_v52 = vadd.f32 %v1637_v48, %v2037_v38  ;;  %v734_v54 = vpop.f32.mrb[3].mxu1  ;;  %v858_v55 = vmax.f32 %v604_v45, 0.0  ;;  %v607_v57 = vadd.f32 %v2037_v38, %v606_v53 }
  0xfb   : > { %v890_v56 = vmax.f32 %v732_v46, 0.0  ;;  %v735_v58 = vadd.f32 %v2037_v38, %v734_v54  ;;  %925 = vst.msk [vmem:[%s2047_s12 + $0x10] sm:$0xff] %vm922_vm1, %v860_v49  ;;  %v861_v59 = vmax.f32 %v615_v51, 0.0 }
  0xfc   : > { %957 = vst.msk [vmem:[%s2047_s12 + $0x110] sm:$0xff] %vm922_vm1, %v892_v50  ;;  %v893_v60 = vmax.f32 %v743_v52, 0.0  ;;  %923 = vst.msk [vmem:[%s2047_s12] sm:$0xff] %vm922_vm1, %v858_v55  ;;  %v859_v61 = vmax.f32 %v607_v57, 0.0 }
  0xfd   : > { %955 = vst.msk [vmem:[%s2047_s12 + $0x100] sm:$0xff] %vm922_vm1, %v890_v56  ;;  %v891_v62 = vmax.f32 %v735_v58, 0.0  ;;  %926 = vst.msk [vmem:[%s2047_s12 + $0x18] sm:$0xff] %vm922_vm1, %v861_v59 }
  0xfe   : > { %958 = vst.msk [vmem:[%s2047_s12 + $0x118] sm:$0xff] %vm922_vm1, %v893_v60  ;;  %924 = vst.msk [vmem:[%s2047_s12 + $0x8] sm:$0xff] %vm922_vm1, %v859_v61  ;;  %v1608_v63 = vpop.f32.mrb[4].mxu0 }
  0xff   : > { %956 = vst.msk [vmem:[%s2047_s12 + $0x108] sm:$0xff] %vm922_vm1, %v891_v62  ;;  %v1640_v0 = vpop.f32.mrb[4].mxu1  ;;  %v628_v1 = vadd.f32 %v1608_v63, %v2037_v38  ;;  %v619_v3 = vpop.f32.mrb[5].mxu0 }
 0x100   : > { %v756_v2 = vadd.f32 %v1640_v0, %v2037_v38  ;;  %v747_v4 = vpop.f32.mrb[5].mxu1  ;;  %v620_v5 = vadd.f32 %v2037_v38, %v619_v3  ;;  %v1609_v7 = vpop.f32.mrb[6].mxu0 }
 0x101   : > { %v748_v6 = vadd.f32 %v2037_v38, %v747_v4  ;;  %v1641_v8 = vpop.f32.mrb[6].mxu1  ;;  %v864_v9 = vmax.f32 %v628_v1, 0.0  ;;  %v631_v11 = vadd.f32 %v1609_v7, %v2037_v38  ;;  %v622_v13 = vpop.f32.mrb[7].mxu0 }
 0x102   : > { %v896_v10 = vmax.f32 %v756_v2, 0.0  ;;  %v759_v12 = vadd.f32 %v1641_v8, %v2037_v38  ;;  %v750_v14 = vpop.f32.mrb[7].mxu1  ;;  %v862_v15 = vmax.f32 %v620_v5, 0.0  ;;  %v623_v17 = vadd.f32 %v2037_v38, %v622_v13 }
 0x103   : > { %v894_v16 = vmax.f32 %v748_v6, 0.0  ;;  %v751_v18 = vadd.f32 %v2037_v38, %v750_v14  ;;  %929 = vst.msk [vmem:[%s2047_s12 + $0x30] sm:$0xff] %vm922_vm1, %v864_v9  ;;  %v865_v19 = vmax.f32 %v631_v11, 0.0 }
 0x104   : > { %961 = vst.msk [vmem:[%s2047_s12 + $0x130] sm:$0xff] %vm922_vm1, %v896_v10  ;;  %v897_v20 = vmax.f32 %v759_v12, 0.0  ;;  %927 = vst.msk [vmem:[%s2047_s12 + $0x20] sm:$0xff] %vm922_vm1, %v862_v15  ;;  %v863_v21 = vmax.f32 %v623_v17, 0.0 }
 0x105   : > { %959 = vst.msk [vmem:[%s2047_s12 + $0x120] sm:$0xff] %vm922_vm1, %v894_v16  ;;  %v895_v22 = vmax.f32 %v751_v18, 0.0  ;;  %930 = vst.msk [vmem:[%s2047_s12 + $0x38] sm:$0xff] %vm922_vm1, %v865_v19 }
 0x106   : > { %962 = vst.msk [vmem:[%s2047_s12 + $0x138] sm:$0xff] %vm922_vm1, %v897_v20  ;;  %928 = vst.msk [vmem:[%s2047_s12 + $0x28] sm:$0xff] %vm922_vm1, %v863_v21  ;;  %v1612_v23 = vpop.f32.mrb[8].mxu0 }
 0x107   : > { %960 = vst.msk [vmem:[%s2047_s12 + $0x128] sm:$0xff] %vm922_vm1, %v895_v22  ;;  %v1644_v24 = vpop.f32.mrb[8].mxu1  ;;  %v644_v25 = vadd.f32 %v1612_v23, %v2037_v38  ;;  %v635_v27 = vpop.f32.mrb[9].mxu0 }
 0x108   : > { %v772_v26 = vadd.f32 %v1644_v24, %v2037_v38  ;;  %v763_v28 = vpop.f32.mrb[9].mxu1  ;;  %v636_v29 = vadd.f32 %v2037_v38, %v635_v27  ;;  %v1613_v31 = vpop.f32.mrb[10].mxu0 }
 0x109   : > { %v764_v30 = vadd.f32 %v2037_v38, %v763_v28  ;;  %v1645_v32 = vpop.f32.mrb[10].mxu1  ;;  %v868_v33 = vmax.f32 %v644_v25, 0.0  ;;  %v647_v35 = vadd.f32 %v1613_v31, %v2037_v38  ;;  %v638_v37 = vpop.f32.mrb[11].mxu0 }
 0x10a   : > { %v900_v34 = vmax.f32 %v772_v26, 0.0  ;;  %v775_v36 = vadd.f32 %v1645_v32, %v2037_v38  ;;  %v766_v39 = vpop.f32.mrb[11].mxu1  ;;  %v866_v40 = vmax.f32 %v636_v29, 0.0  ;;  %v639_v42 = vadd.f32 %v2037_v38, %v638_v37 }
 0x10b   : > { %v898_v41 = vmax.f32 %v764_v30, 0.0  ;;  %v767_v43 = vadd.f32 %v2037_v38, %v766_v39  ;;  %933 = vst.msk [vmem:[%s2047_s12 + $0x50] sm:$0xff] %vm922_vm1, %v868_v33  ;;  %v869_v44 = vmax.f32 %v647_v35, 0.0 }
 0x10c   : > { %965 = vst.msk [vmem:[%s2047_s12 + $0x150] sm:$0xff] %vm922_vm1, %v900_v34  ;;  %v901_v45 = vmax.f32 %v775_v36, 0.0  ;;  %931 = vst.msk [vmem:[%s2047_s12 + $0x40] sm:$0xff] %vm922_vm1, %v866_v40  ;;  %v867_v46 = vmax.f32 %v639_v42, 0.0 }
 0x10d   : > { %963 = vst.msk [vmem:[%s2047_s12 + $0x140] sm:$0xff] %vm922_vm1, %v898_v41  ;;  %v899_v47 = vmax.f32 %v767_v43, 0.0  ;;  %934 = vst.msk [vmem:[%s2047_s12 + $0x58] sm:$0xff] %vm922_vm1, %v869_v44 }
 0x10e   : > { %966 = vst.msk [vmem:[%s2047_s12 + $0x158] sm:$0xff] %vm922_vm1, %v901_v45  ;;  %932 = vst.msk [vmem:[%s2047_s12 + $0x48] sm:$0xff] %vm922_vm1, %v867_v46  ;;  %v1616_v48 = vpop.f32.mrb[12].mxu0 }
 0x10f   : > { %964 = vst.msk [vmem:[%s2047_s12 + $0x148] sm:$0xff] %vm922_vm1, %v899_v47  ;;  %v1648_v49 = vpop.f32.mrb[12].mxu1  ;;  %v660_v50 = vadd.f32 %v1616_v48, %v2037_v38  ;;  %v651_v52 = vpop.f32.mrb[13].mxu0 }
 0x110   : > { %v788_v51 = vadd.f32 %v1648_v49, %v2037_v38  ;;  %v779_v53 = vpop.f32.mrb[13].mxu1  ;;  %v652_v54 = vadd.f32 %v2037_v38, %v651_v52  ;;  %v1617_v56 = vpop.f32.mrb[14].mxu0 }
 0x111   : > { %v780_v55 = vadd.f32 %v2037_v38, %v779_v53  ;;  %v1649_v57 = vpop.f32.mrb[14].mxu1  ;;  %v872_v58 = vmax.f32 %v660_v50, 0.0  ;;  %v663_v60 = vadd.f32 %v1617_v56, %v2037_v38  ;;  %v654_v62 = vpop.f32.mrb[15].mxu0 }
 0x112   : > { %v904_v59 = vmax.f32 %v788_v51, 0.0  ;;  %v791_v61 = vadd.f32 %v1649_v57, %v2037_v38  ;;  %v782_v63 = vpop.f32.mrb[15].mxu1  ;;  %v870_v0 = vmax.f32 %v652_v54, 0.0  ;;  %v655_v2 = vadd.f32 %v2037_v38, %v654_v62 }
 0x113   : > { %v902_v1 = vmax.f32 %v780_v55, 0.0  ;;  %v783_v3 = vadd.f32 %v2037_v38, %v782_v63  ;;  %937 = vst.msk [vmem:[%s2047_s12 + $0x70] sm:$0xff] %vm922_vm1, %v872_v58  ;;  %v873_v4 = vmax.f32 %v663_v60, 0.0 }
 0x114   : > { %969 = vst.msk [vmem:[%s2047_s12 + $0x170] sm:$0xff] %vm922_vm1, %v904_v59  ;;  %v905_v5 = vmax.f32 %v791_v61, 0.0  ;;  %935 = vst.msk [vmem:[%s2047_s12 + $0x60] sm:$0xff] %vm922_vm1, %v870_v0  ;;  %v871_v6 = vmax.f32 %v655_v2, 0.0 }
 0x115   : > { %967 = vst.msk [vmem:[%s2047_s12 + $0x160] sm:$0xff] %vm922_vm1, %v902_v1  ;;  %v903_v7 = vmax.f32 %v783_v3, 0.0  ;;  %938 = vst.msk [vmem:[%s2047_s12 + $0x78] sm:$0xff] %vm922_vm1, %v873_v4 }
 0x116   : > { %970 = vst.msk [vmem:[%s2047_s12 + $0x178] sm:$0xff] %vm922_vm1, %v905_v5  ;;  %936 = vst.msk [vmem:[%s2047_s12 + $0x68] sm:$0xff] %vm922_vm1, %v871_v6  ;;  %v1620_v8 = vpop.f32.mrb[16].mxu0 }
 0x117   : > { %968 = vst.msk [vmem:[%s2047_s12 + $0x168] sm:$0xff] %vm922_vm1, %v903_v7  ;;  %v1652_v9 = vpop.f32.mrb[16].mxu1  ;;  %v676_v10 = vadd.f32 %v1620_v8, %v2037_v38  ;;  %v667_v12 = vpop.f32.mrb[17].mxu0 }
 0x118   : > { %v804_v11 = vadd.f32 %v1652_v9, %v2037_v38  ;;  %v795_v13 = vpop.f32.mrb[17].mxu1  ;;  %v668_v14 = vadd.f32 %v2037_v38, %v667_v12  ;;  %v1621_v16 = vpop.f32.mrb[18].mxu0 }
 0x119   : > { %v796_v15 = vadd.f32 %v2037_v38, %v795_v13  ;;  %v1653_v17 = vpop.f32.mrb[18].mxu1  ;;  %v876_v18 = vmax.f32 %v676_v10, 0.0  ;;  %v679_v20 = vadd.f32 %v1621_v16, %v2037_v38  ;;  %v670_v22 = vpop.f32.mrb[19].mxu0 }
 0x11a   : > { %v908_v19 = vmax.f32 %v804_v11, 0.0  ;;  %v807_v21 = vadd.f32 %v1653_v17, %v2037_v38  ;;  %v798_v23 = vpop.f32.mrb[19].mxu1  ;;  %v874_v24 = vmax.f32 %v668_v14, 0.0  ;;  %v671_v26 = vadd.f32 %v2037_v38, %v670_v22 }
 0x11b   : > { %v906_v25 = vmax.f32 %v796_v15, 0.0  ;;  %v799_v27 = vadd.f32 %v2037_v38, %v798_v23  ;;  %941 = vst.msk [vmem:[%s2047_s12 + $0x90] sm:$0xff] %vm922_vm1, %v876_v18  ;;  %v877_v28 = vmax.f32 %v679_v20, 0.0 }
 0x11c   : > { %973 = vst.msk [vmem:[%s2047_s12 + $0x190] sm:$0xff] %vm922_vm1, %v908_v19  ;;  %v909_v29 = vmax.f32 %v807_v21, 0.0  ;;  %939 = vst.msk [vmem:[%s2047_s12 + $0x80] sm:$0xff] %vm922_vm1, %v874_v24  ;;  %v875_v30 = vmax.f32 %v671_v26, 0.0 }
 0x11d   : > { %971 = vst.msk [vmem:[%s2047_s12 + $0x180] sm:$0xff] %vm922_vm1, %v906_v25  ;;  %v907_v31 = vmax.f32 %v799_v27, 0.0  ;;  %942 = vst.msk [vmem:[%s2047_s12 + $0x98] sm:$0xff] %vm922_vm1, %v877_v28 }
 0x11e   : > { %974 = vst.msk [vmem:[%s2047_s12 + $0x198] sm:$0xff] %vm922_vm1, %v909_v29  ;;  %940 = vst.msk [vmem:[%s2047_s12 + $0x88] sm:$0xff] %vm922_vm1, %v875_v30  ;;  %v1624_v32 = vpop.f32.mrb[20].mxu0 }
 0x11f   : > { %972 = vst.msk [vmem:[%s2047_s12 + $0x188] sm:$0xff] %vm922_vm1, %v907_v31  ;;  %v1656_v33 = vpop.f32.mrb[20].mxu1  ;;  %v692_v34 = vadd.f32 %v1624_v32, %v2037_v38  ;;  %v683_v36 = vpop.f32.mrb[21].mxu0 }
 0x120   : > { %v820_v35 = vadd.f32 %v1656_v33, %v2037_v38  ;;  %v811_v37 = vpop.f32.mrb[21].mxu1  ;;  %v684_v39 = vadd.f32 %v2037_v38, %v683_v36  ;;  %v1625_v41 = vpop.f32.mrb[22].mxu0 }
 0x121   : > { %v812_v40 = vadd.f32 %v2037_v38, %v811_v37  ;;  %v1657_v42 = vpop.f32.mrb[22].mxu1  ;;  %v880_v43 = vmax.f32 %v692_v34, 0.0  ;;  %v695_v45 = vadd.f32 %v1625_v41, %v2037_v38  ;;  %v686_v47 = vpop.f32.mrb[23].mxu0 }
 0x122   : > { %v912_v44 = vmax.f32 %v820_v35, 0.0  ;;  %v823_v46 = vadd.f32 %v1657_v42, %v2037_v38  ;;  %v814_v48 = vpop.f32.mrb[23].mxu1  ;;  %v878_v49 = vmax.f32 %v684_v39, 0.0  ;;  %v687_v51 = vadd.f32 %v2037_v38, %v686_v47 }
 0x123   : > { %v910_v50 = vmax.f32 %v812_v40, 0.0  ;;  %v815_v52 = vadd.f32 %v2037_v38, %v814_v48  ;;  %945 = vst.msk [vmem:[%s2047_s12 + $0xb0] sm:$0xff] %vm922_vm1, %v880_v43  ;;  %v881_v53 = vmax.f32 %v695_v45, 0.0 }
 0x124   : > { %977 = vst.msk [vmem:[%s2047_s12 + $0x1b0] sm:$0xff] %vm922_vm1, %v912_v44  ;;  %v913_v54 = vmax.f32 %v823_v46, 0.0  ;;  %943 = vst.msk [vmem:[%s2047_s12 + $0xa0] sm:$0xff] %vm922_vm1, %v878_v49  ;;  %v879_v55 = vmax.f32 %v687_v51, 0.0 }
 0x125   : > { %975 = vst.msk [vmem:[%s2047_s12 + $0x1a0] sm:$0xff] %vm922_vm1, %v910_v50  ;;  %v911_v56 = vmax.f32 %v815_v52, 0.0  ;;  %946 = vst.msk [vmem:[%s2047_s12 + $0xb8] sm:$0xff] %vm922_vm1, %v881_v53 }
 0x126   : > { %978 = vst.msk [vmem:[%s2047_s12 + $0x1b8] sm:$0xff] %vm922_vm1, %v913_v54  ;;  %944 = vst.msk [vmem:[%s2047_s12 + $0xa8] sm:$0xff] %vm922_vm1, %v879_v55  ;;  %v1628_v57 = vpop.f32.mrb[24].mxu0 }
 0x127   : > { %976 = vst.msk [vmem:[%s2047_s12 + $0x1a8] sm:$0xff] %vm922_vm1, %v911_v56  ;;  %v1660_v58 = vpop.f32.mrb[24].mxu1  ;;  %v708_v59 = vadd.f32 %v1628_v57, %v2037_v38  ;;  %v699_v61 = vpop.f32.mrb[25].mxu0 }
 0x128   : > { %v836_v60 = vadd.f32 %v1660_v58, %v2037_v38  ;;  %v827_v62 = vpop.f32.mrb[25].mxu1  ;;  %v700_v63 = vadd.f32 %v2037_v38, %v699_v61  ;;  %v1629_v1 = vpop.f32.mrb[26].mxu0 }
 0x129   : > { %v828_v0 = vadd.f32 %v2037_v38, %v827_v62  ;;  %v1661_v2 = vpop.f32.mrb[26].mxu1  ;;  %v884_v3 = vmax.f32 %v708_v59, 0.0  ;;  %v711_v5 = vadd.f32 %v1629_v1, %v2037_v38  ;;  %v702_v7 = vpop.f32.mrb[27].mxu0 }
 0x12a   : > { %v916_v4 = vmax.f32 %v836_v60, 0.0  ;;  %v839_v6 = vadd.f32 %v1661_v2, %v2037_v38  ;;  %v830_v8 = vpop.f32.mrb[27].mxu1  ;;  %v882_v9 = vmax.f32 %v700_v63, 0.0  ;;  %v703_v11 = vadd.f32 %v2037_v38, %v702_v7 }
 0x12b   : > { %v914_v10 = vmax.f32 %v828_v0, 0.0  ;;  %v831_v12 = vadd.f32 %v2037_v38, %v830_v8  ;;  %949 = vst.msk [vmem:[%s2047_s12 + $0xd0] sm:$0xff] %vm922_vm1, %v884_v3  ;;  %v885_v13 = vmax.f32 %v711_v5, 0.0 }
 0x12c   : > { %981 = vst.msk [vmem:[%s2047_s12 + $0x1d0] sm:$0xff] %vm922_vm1, %v916_v4  ;;  %v917_v14 = vmax.f32 %v839_v6, 0.0  ;;  %947 = vst.msk [vmem:[%s2047_s12 + $0xc0] sm:$0xff] %vm922_vm1, %v882_v9  ;;  %v883_v15 = vmax.f32 %v703_v11, 0.0 }
 0x12d   : > { %979 = vst.msk [vmem:[%s2047_s12 + $0x1c0] sm:$0xff] %vm922_vm1, %v914_v10  ;;  %v915_v16 = vmax.f32 %v831_v12, 0.0  ;;  %950 = vst.msk [vmem:[%s2047_s12 + $0xd8] sm:$0xff] %vm922_vm1, %v885_v13 }
 0x12e   : > { %982 = vst.msk [vmem:[%s2047_s12 + $0x1d8] sm:$0xff] %vm922_vm1, %v917_v14  ;;  %948 = vst.msk [vmem:[%s2047_s12 + $0xc8] sm:$0xff] %vm922_vm1, %v883_v15  ;;  %v1632_v17 = vpop.f32.mrb[28].mxu0 }
 0x12f   : > { %980 = vst.msk [vmem:[%s2047_s12 + $0x1c8] sm:$0xff] %vm922_vm1, %v915_v16  ;;  %v1664_v18 = vpop.f32.mrb[28].mxu1  ;;  %v724_v19 = vadd.f32 %v1632_v17, %v2037_v38  ;;  %v715_v21 = vpop.f32.mrb[29].mxu0 }
 0x130   : > { %v852_v20 = vadd.f32 %v1664_v18, %v2037_v38  ;;  %v843_v22 = vpop.f32.mrb[29].mxu1  ;;  %v716_v23 = vadd.f32 %v2037_v38, %v715_v21  ;;  %v1633_v25 = vpop.f32.mrb[30].mxu0 }
 0x131   : > { %v844_v24 = vadd.f32 %v2037_v38, %v843_v22  ;;  %v1665_v26 = vpop.f32.mrb[30].mxu1  ;;  %v888_v27 = vmax.f32 %v724_v19, 0.0  ;;  %v727_v29 = vadd.f32 %v1633_v25, %v2037_v38  ;;  %v718_v31 = vpop.f32.mrb[31].mxu0  ;;  %993 = sbr.rel (!%p1937_p4) target bundleno = 384 (0x180), region = 36 }
 0x132   : > { %v920_v28 = vmax.f32 %v852_v20, 0.0  ;;  %v855_v30 = vadd.f32 %v1665_v26, %v2037_v38  ;;  %v846_v32 = vpop.f32.mrb[31].mxu1  ;;  %v886_v33 = vmax.f32 %v716_v23, 0.0  ;;  %v719_v35 = vadd.f32 %v2037_v38, %v718_v31 }
 0x133   : > { %v918_v34 = vmax.f32 %v844_v24, 0.0  ;;  %v847_v36 = vadd.f32 %v2037_v38, %v846_v32  ;;  %953 = vst.msk [vmem:[%s2047_s12 + $0xf0] sm:$0xff] %vm922_vm1, %v888_v27  ;;  %v889_v37 = vmax.f32 %v727_v29, 0.0 }
 0x134   : > { %985 = vst.msk [vmem:[%s2047_s12 + $0x1f0] sm:$0xff] %vm922_vm1, %v920_v28  ;;  %v921_v39 = vmax.f32 %v855_v30, 0.0  ;;  %951 = vst.msk [vmem:[%s2047_s12 + $0xe0] sm:$0xff] %vm922_vm1, %v886_v33  ;;  %v887_v40 = vmax.f32 %v719_v35, 0.0 }
 0x135   : > { %983 = vst.msk [vmem:[%s2047_s12 + $0x1e0] sm:$0xff] %vm922_vm1, %v918_v34  ;;  %v919_v41 = vmax.f32 %v847_v36, 0.0  ;;  %954 = vst.msk [vmem:[%s2047_s12 + $0xf8] sm:$0xff] %vm922_vm1, %v889_v37 }
 0x136   : > { %986 = vst.msk [vmem:[%s2047_s12 + $0x1f8] sm:$0xff] %vm922_vm1, %v921_v39  ;;  %952 = vst.msk [vmem:[%s2047_s12 + $0xe8] sm:$0xff] %vm922_vm1, %v887_v40 }
 0x137   : > { %984 = vst.msk [vmem:[%s2047_s12 + $0x1e8] sm:$0xff] %vm922_vm1, %v919_v41 }
 0x138   : > { %s2453_s22 = smov (!%p996_p8, %s995_s22), 64 }
 0x139   : > { %s1534_s28 = sshll.u32 %s2453_s22, 7 }
 0x13a   : > { %p1537_p9 = scmp.eq.s32.totalorder %s1534_s28, 0 }
 0x13b   : > { %s2246_s29 = sshrl.u32 (!%p1537_p9), %s2453_s22, 6 }
 0x13c   : > { %1004 = sbr.rel (%p1537_p9) target bundleno = 384 (0x180), region = 40  ;;  %p1538_p10 = scmp.le.s32.totalorder (!%p1537_p9), %s2246_s29, 0 }
 0x143   : > { %1410 = sbr.rel (%p1538_p10) target bundleno = 363 (0x16b), region = 116  ;;  %s2444_s15 = smov (!%p1538_p10), %s2240_s27 }
 0x144   : > { %s2445_s20 = smov (!%p1538_p10), %s2047_s12  ;;  %s2255_s23 = smov (!%p1538_p10), 0  }
 0x145   : > { %s2257_s30 = smov (!%p1538_p10), 0  }
 0x14a LB: >> { %v1192_v38 = vld [vmem:[%s1866_s20] sm:$0xff]  ;;  %v1194_v42 = vld [vmem:[%s1866_s20 + $0x8] sm:$0xff]  ;;  %v1196_v43 = vld [vmem:[%s1866_s20 + $0x10] sm:$0xff]  ;;  %s1320_s4 = sadd.s32 1, %s1870_s23  ;;  %s1186_s30 = sadd.s32 1, %s1874_s30   ;;  %s1874_s30 = sphi %s2257_s30, %s1186_s30   ;;  %s1870_s23 = sphi %s2255_s23, %s2448_s23   ;;  %s1866_s20 = sphi %s2445_s20, %s2447_s20   ;;  %s1862_s15 = sphi %s2444_s15, %s2446_s15  }
 0x14b   : >> { %1193 = vst [vmem:[%s1862_s15] sm:$0xff] %v1192_v38  ;;  %1195 = vst [vmem:[%s1862_s15 + $0x8] sm:$0xff] %v1194_v42  ;;  %v1198_v44 = vld [vmem:[%s1866_s20 + $0x18] sm:$0xff]  ;;  %v1200_v45 = vld [vmem:[%s1866_s20 + $0x20] sm:$0xff]  ;;  %p1321_p11 = scmp.ge.s32.totalorder %s1320_s4, %s2246_s29  ;;  %p1185_p12 = scmp.ge.s32.totalorder %s1186_s30, %s2246_s29 }
 0x14c   : >> { %1197 = vst [vmem:[%s1862_s15 + $0x10] sm:$0xff] %v1196_v43  ;;  %v1202_v46 = vld [vmem:[%s1866_s20 + $0x28] sm:$0xff]  ;;  %1199 = vst [vmem:[%s1862_s15 + $0x18] sm:$0xff] %v1198_v44  ;;  %v1204_v47 = vld [vmem:[%s1866_s20 + $0x30] sm:$0xff] }
 0x14d   : >> { %1201 = vst [vmem:[%s1862_s15 + $0x20] sm:$0xff] %v1200_v45  ;;  %1203 = vst [vmem:[%s1862_s15 + $0x28] sm:$0xff] %v1202_v46  ;;  %v1206_v48 = vld [vmem:[%s1866_s20 + $0x38] sm:$0xff]  ;;  %v1208_v49 = vld [vmem:[%s1866_s20 + $0x40] sm:$0xff]  ;;  %s2455_s4 = smov (%p1321_p11, %s1320_s4), 0 }
 0x14e   : >> { %1205 = vst [vmem:[%s1862_s15 + $0x30] sm:$0xff] %v1204_v47  ;;  %1207 = vst [vmem:[%s1862_s15 + $0x38] sm:$0xff] %v1206_v48  ;;  %v1210_v50 = vld [vmem:[%s1866_s20 + $0x48] sm:$0xff]  ;;  %v1212_v51 = vld [vmem:[%s1866_s20 + $0x50] sm:$0xff]  ;;  %s1539_s5 = sshll.u32 %s2455_s4, 9  ;;  %s2448_s23 = smov %s2455_s4 }
 0x14f   : >> { %1209 = vst [vmem:[%s1862_s15 + $0x40] sm:$0xff] %v1208_v49  ;;  %v1214_v52 = vld [vmem:[%s1866_s20 + $0x58] sm:$0xff]  ;;  %1211 = vst [vmem:[%s1862_s15 + $0x48] sm:$0xff] %v1210_v50  ;;  %v1216_v53 = vld [vmem:[%s1866_s20 + $0x60] sm:$0xff]  ;;  %s2313_s6 = scalar_lea.vmem %s2047_s12, %s1539_s5 [#allocation2]   ;;  %s2316_s7 = scalar_lea.vmem %s2240_s27, %s1539_s5  }
 0x150   : >> { %1213 = vst [vmem:[%s1862_s15 + $0x50] sm:$0xff] %v1212_v51  ;;  %1215 = vst [vmem:[%s1862_s15 + $0x58] sm:$0xff] %v1214_v52  ;;  %v1218_v54 = vld [vmem:[%s1866_s20 + $0x68] sm:$0xff]  ;;  %v1220_v55 = vld [vmem:[%s1866_s20 + $0x70] sm:$0xff] }
 0x151   : >> { %1217 = vst [vmem:[%s1862_s15 + $0x60] sm:$0xff] %v1216_v53  ;;  %1219 = vst [vmem:[%s1862_s15 + $0x68] sm:$0xff] %v1218_v54  ;;  %v1222_v56 = vld [vmem:[%s1866_s20 + $0x78] sm:$0xff]  ;;  %v1224_v57 = vld [vmem:[%s1866_s20 + $0x80] sm:$0xff] }
 0x152   : >> { %1221 = vst [vmem:[%s1862_s15 + $0x70] sm:$0xff] %v1220_v55  ;;  %v1226_v58 = vld [vmem:[%s1866_s20 + $0x88] sm:$0xff]  ;;  %1223 = vst [vmem:[%s1862_s15 + $0x78] sm:$0xff] %v1222_v56  ;;  %v1228_v59 = vld [vmem:[%s1866_s20 + $0x90] sm:$0xff] }
 0x153   : >> { %1225 = vst [vmem:[%s1862_s15 + $0x80] sm:$0xff] %v1224_v57  ;;  %1227 = vst [vmem:[%s1862_s15 + $0x88] sm:$0xff] %v1226_v58  ;;  %v1230_v60 = vld [vmem:[%s1866_s20 + $0x98] sm:$0xff]  ;;  %v1232_v61 = vld [vmem:[%s1866_s20 + $0xa0] sm:$0xff] }
 0x154   : >> { %1229 = vst [vmem:[%s1862_s15 + $0x90] sm:$0xff] %v1228_v59  ;;  %1231 = vst [vmem:[%s1862_s15 + $0x98] sm:$0xff] %v1230_v60  ;;  %v1234_v62 = vld [vmem:[%s1866_s20 + $0xa8] sm:$0xff]  ;;  %v1236_v63 = vld [vmem:[%s1866_s20 + $0xb0] sm:$0xff] }
 0x155   : >> { %1233 = vst [vmem:[%s1862_s15 + $0xa0] sm:$0xff] %v1232_v61  ;;  %v1238_v0 = vld [vmem:[%s1866_s20 + $0xb8] sm:$0xff]  ;;  %1235 = vst [vmem:[%s1862_s15 + $0xa8] sm:$0xff] %v1234_v62  ;;  %v1240_v1 = vld [vmem:[%s1866_s20 + $0xc0] sm:$0xff] }
 0x156   : >> { %1237 = vst [vmem:[%s1862_s15 + $0xb0] sm:$0xff] %v1236_v63  ;;  %1239 = vst [vmem:[%s1862_s15 + $0xb8] sm:$0xff] %v1238_v0  ;;  %v1242_v2 = vld [vmem:[%s1866_s20 + $0xc8] sm:$0xff]  ;;  %v1244_v3 = vld [vmem:[%s1866_s20 + $0xd0] sm:$0xff] }
 0x157   : >> { %1241 = vst [vmem:[%s1862_s15 + $0xc0] sm:$0xff] %v1240_v1  ;;  %1243 = vst [vmem:[%s1862_s15 + $0xc8] sm:$0xff] %v1242_v2  ;;  %v1246_v4 = vld [vmem:[%s1866_s20 + $0xd8] sm:$0xff]  ;;  %v1248_v5 = vld [vmem:[%s1866_s20 + $0xe0] sm:$0xff] }
 0x158   : >> { %1245 = vst [vmem:[%s1862_s15 + $0xd0] sm:$0xff] %v1244_v3  ;;  %v1250_v6 = vld [vmem:[%s1866_s20 + $0xe8] sm:$0xff]  ;;  %1247 = vst [vmem:[%s1862_s15 + $0xd8] sm:$0xff] %v1246_v4  ;;  %v1252_v7 = vld [vmem:[%s1866_s20 + $0xf0] sm:$0xff] }
 0x159   : >> { %1249 = vst [vmem:[%s1862_s15 + $0xe0] sm:$0xff] %v1248_v5  ;;  %1251 = vst [vmem:[%s1862_s15 + $0xe8] sm:$0xff] %v1250_v6  ;;  %v1254_v8 = vld [vmem:[%s1866_s20 + $0xf8] sm:$0xff]  ;;  %v1256_v9 = vld [vmem:[%s1866_s20 + $0x100] sm:$0xff] }
 0x15a   : >> { %1253 = vst [vmem:[%s1862_s15 + $0xf0] sm:$0xff] %v1252_v7  ;;  %1255 = vst [vmem:[%s1862_s15 + $0xf8] sm:$0xff] %v1254_v8  ;;  %v1258_v10 = vld [vmem:[%s1866_s20 + $0x108] sm:$0xff]  ;;  %v1260_v11 = vld [vmem:[%s1866_s20 + $0x110] sm:$0xff] }
 0x15b   : >> { %1257 = vst [vmem:[%s1862_s15 + $0x100] sm:$0xff] %v1256_v9  ;;  %v1262_v12 = vld [vmem:[%s1866_s20 + $0x118] sm:$0xff]  ;;  %1259 = vst [vmem:[%s1862_s15 + $0x108] sm:$0xff] %v1258_v10  ;;  %v1264_v13 = vld [vmem:[%s1866_s20 + $0x120] sm:$0xff] }
 0x15c   : >> { %1261 = vst [vmem:[%s1862_s15 + $0x110] sm:$0xff] %v1260_v11  ;;  %1263 = vst [vmem:[%s1862_s15 + $0x118] sm:$0xff] %v1262_v12  ;;  %v1266_v14 = vld [vmem:[%s1866_s20 + $0x128] sm:$0xff]  ;;  %v1268_v15 = vld [vmem:[%s1866_s20 + $0x130] sm:$0xff] }
 0x15d   : >> { %1265 = vst [vmem:[%s1862_s15 + $0x120] sm:$0xff] %v1264_v13  ;;  %1267 = vst [vmem:[%s1862_s15 + $0x128] sm:$0xff] %v1266_v14  ;;  %v1270_v16 = vld [vmem:[%s1866_s20 + $0x138] sm:$0xff]  ;;  %v1272_v17 = vld [vmem:[%s1866_s20 + $0x140] sm:$0xff] }
 0x15e   : >> { %1269 = vst [vmem:[%s1862_s15 + $0x130] sm:$0xff] %v1268_v15  ;;  %v1274_v18 = vld [vmem:[%s1866_s20 + $0x148] sm:$0xff]  ;;  %1271 = vst [vmem:[%s1862_s15 + $0x138] sm:$0xff] %v1270_v16  ;;  %v1276_v19 = vld [vmem:[%s1866_s20 + $0x150] sm:$0xff] }
 0x15f   : >> { %1273 = vst [vmem:[%s1862_s15 + $0x140] sm:$0xff] %v1272_v17  ;;  %1275 = vst [vmem:[%s1862_s15 + $0x148] sm:$0xff] %v1274_v18  ;;  %v1278_v20 = vld [vmem:[%s1866_s20 + $0x158] sm:$0xff]  ;;  %v1280_v21 = vld [vmem:[%s1866_s20 + $0x160] sm:$0xff] }
 0x160   : >> { %1277 = vst [vmem:[%s1862_s15 + $0x150] sm:$0xff] %v1276_v19  ;;  %1279 = vst [vmem:[%s1862_s15 + $0x158] sm:$0xff] %v1278_v20  ;;  %v1282_v22 = vld [vmem:[%s1866_s20 + $0x168] sm:$0xff]  ;;  %v1284_v23 = vld [vmem:[%s1866_s20 + $0x170] sm:$0xff] }
 0x161   : >> { %1281 = vst [vmem:[%s1862_s15 + $0x160] sm:$0xff] %v1280_v21  ;;  %v1286_v24 = vld [vmem:[%s1866_s20 + $0x178] sm:$0xff]  ;;  %1283 = vst [vmem:[%s1862_s15 + $0x168] sm:$0xff] %v1282_v22  ;;  %v1288_v25 = vld [vmem:[%s1866_s20 + $0x180] sm:$0xff] }
 0x162   : >> { %1285 = vst [vmem:[%s1862_s15 + $0x170] sm:$0xff] %v1284_v23  ;;  %1287 = vst [vmem:[%s1862_s15 + $0x178] sm:$0xff] %v1286_v24  ;;  %v1290_v26 = vld [vmem:[%s1866_s20 + $0x188] sm:$0xff]  ;;  %v1292_v27 = vld [vmem:[%s1866_s20 + $0x190] sm:$0xff] }
 0x163   : >> { %1289 = vst [vmem:[%s1862_s15 + $0x180] sm:$0xff] %v1288_v25  ;;  %1291 = vst [vmem:[%s1862_s15 + $0x188] sm:$0xff] %v1290_v26  ;;  %v1294_v28 = vld [vmem:[%s1866_s20 + $0x198] sm:$0xff]  ;;  %v1296_v29 = vld [vmem:[%s1866_s20 + $0x1a0] sm:$0xff] }
 0x164   : >> { %1293 = vst [vmem:[%s1862_s15 + $0x190] sm:$0xff] %v1292_v27  ;;  %v1298_v30 = vld [vmem:[%s1866_s20 + $0x1a8] sm:$0xff]  ;;  %1295 = vst [vmem:[%s1862_s15 + $0x198] sm:$0xff] %v1294_v28  ;;  %v1300_v31 = vld [vmem:[%s1866_s20 + $0x1b0] sm:$0xff]  ;;  %1188 = sbr.rel (!%p1185_p12) target bundleno = 330 (0x14a), region = 122 }
 0x165   : >> { %1297 = vst [vmem:[%s1862_s15 + $0x1a0] sm:$0xff] %v1296_v29  ;;  %1299 = vst [vmem:[%s1862_s15 + $0x1a8] sm:$0xff] %v1298_v30  ;;  %v1302_v32 = vld [vmem:[%s1866_s20 + $0x1b8] sm:$0xff]  ;;  %v1304_v33 = vld [vmem:[%s1866_s20 + $0x1c0] sm:$0xff] }
 0x166   : >> { %1301 = vst [vmem:[%s1862_s15 + $0x1b0] sm:$0xff] %v1300_v31  ;;  %1303 = vst [vmem:[%s1862_s15 + $0x1b8] sm:$0xff] %v1302_v32  ;;  %v1306_v34 = vld [vmem:[%s1866_s20 + $0x1c8] sm:$0xff]  ;;  %v1308_v35 = vld [vmem:[%s1866_s20 + $0x1d0] sm:$0xff] }
 0x167   : >> { %1305 = vst [vmem:[%s1862_s15 + $0x1c0] sm:$0xff] %v1304_v33  ;;  %v1310_v36 = vld [vmem:[%s1866_s20 + $0x1d8] sm:$0xff]  ;;  %1307 = vst [vmem:[%s1862_s15 + $0x1c8] sm:$0xff] %v1306_v34  ;;  %v1312_v37 = vld [vmem:[%s1866_s20 + $0x1e0] sm:$0xff] }
 0x168   : >> { %1309 = vst [vmem:[%s1862_s15 + $0x1d0] sm:$0xff] %v1308_v35  ;;  %1311 = vst [vmem:[%s1862_s15 + $0x1d8] sm:$0xff] %v1310_v36  ;;  %v1314_v39 = vld [vmem:[%s1866_s20 + $0x1e8] sm:$0xff]  ;;  %v1316_v40 = vld [vmem:[%s1866_s20 + $0x1f0] sm:$0xff] }
 0x169   : >> { %1313 = vst [vmem:[%s1862_s15 + $0x1e0] sm:$0xff] %v1312_v37  ;;  %1315 = vst [vmem:[%s1862_s15 + $0x1e8] sm:$0xff] %v1314_v39  ;;  %v1318_v41 = vld [vmem:[%s1866_s20 + $0x1f8] sm:$0xff]  ;;  %s2447_s20 = smov %s2313_s6 }
 0x16a   : >> { %1317 = vst [vmem:[%s1862_s15 + $0x1f0] sm:$0xff] %v1316_v40  ;;  %1319 = vst [vmem:[%s1862_s15 + $0x1f8] sm:$0xff] %v1318_v41  ;;  %s2446_s15 = smov %s2316_s7 }
 0x16b PF: > { %s2421_s8 = sand.u32 63, %s2453_s22   ;;  %s1550_s9 = sshll.u32 %s2246_s29, 9 }
 0x16c   : > { %s1331_s10 = scalar_lea.vmem %s2047_s12, %s1550_s9 [#allocation2]   ;;  %s1333_s11 = scalar_lea.vmem %s2240_s27, %s1550_s9  }
 0x16d   : > { %p1544_p13 = scmp.le.s32.totalorder %s2421_s8, 0 }
 0x16e   : > { %s1876_s14 = smov (!%p1544_p13), %s1333_s11   ;;  %s1880_s17 = smov (!%p1544_p13), %s1331_s10  }
 0x16f   : > { %1424 = sbr.rel (%p1544_p13) target bundleno = 384 (0x180), region = 127  ;;  %s1884_s18 = smov (!%p1544_p13), 0  }
 0x170   : > { %s1888_s21 = smov (!%p1544_p13), 0  }
 0x176 LB: >> { %v1343_v38 = vld [vmem:[%s1882_s17] sm:$0xff]  ;;  %s1345_s22 = sadd.s32 1, %s1886_s18  ;;  %s1337_s21 = sadd.s32 1, %s1890_s21   ;;  %s1890_s21 = sphi %s1888_s21, %s1337_s21   ;;  %s1886_s18 = sphi %s1884_s18, %s1885_s18   ;;  %s1882_s17 = sphi %s1880_s17, %s1350_s17   ;;  %s1878_s14 = sphi %s1876_s14, %s1351_s14  }
 0x177   : >> { %1344 = vst [vmem:[%s1878_s14] sm:$0xff] %v1343_v38  ;;  %p1346_p0 = scmp.ge.s32.totalorder %s1345_s22, %s2421_s8  ;;  %p1336_p1 = scmp.ge.s32.totalorder %s1337_s21, %s2421_s8 }
 0x179   : >> { %s2457_s22 = smov (%p1346_p0, %s1345_s22), 0  ;;  %1339 = sbr.rel (!%p1336_p1) target bundleno = 374 (0x176), region = 133 }
 0x17a   : >> { %s1545_s12 = sshll.u32 %s2457_s22, 3  ;;  %s1885_s18 = smov %s2457_s22  }
 0x17b   : >> { %s1350_s17 = scalar_lea.vmem %s1331_s10, %s1545_s12 [#allocation2]   ;;  %s1351_s14 = scalar_lea.vmem %s1333_s11, %s1545_s12  }
 0x180 PF: > { %p10_p2 = scmp.ge.s32.totalorder %s1927_s16, 5   ;;  %s2449_s12 = smov %s1854_s13 }
 0x181   : > { %s2450_s13 = smov %s1935_s19  ;;  %s2451_s14 = smov %s1927_s16 }
 0x182   :  { %12 = sbr.rel (!%p10_p2) target bundleno = 2 (0x2), region = 144 }

// kernel: _lambda_.10
= control target key start
LH: loop header
LB: loop body
LE: loop exit
PB: predicated region body
PF: predicated region fallthrough
CT: control target
= control target key end

     0   :  { %s2070_s12 = smov 0   ;;  %s2072_s13 = smov 0   ;;  %s2638_s0 = inlined_call_operand.vmem [shape: bf16[1296,144], index: 0, kind: input, shape index: {}]   ;;  %s2639_s1 = inlined_call_operand.vmem [shape: bf16[144,48], index: 1, kind: input, shape index: {}]   ;;  %s2640_s2 = inlined_call_operand.vmem [shape: f32[1,48], index: 2, kind: input, shape index: {}]   ;;  %s2641_s3 = inlined_call_operand.vmem [shape: f32[1296,48], index: 3, kind: output, shape index: {}]  }
   0x1   :  { %s2074_s14 = smov 0  }
   0x2 LB: > { %s2083_s15 = sadd.s32 4294967295, %s2015_s14   ;;  %s2085_s16 = sadd.s32 1, %s2015_s14   ;;  %s2015_s14 = sphi %s2074_s14, %s2650_s14   ;;  %s2011_s13 = sphi %s2072_s13, %s2649_s13   ;;  %s2007_s12 = sphi %s2070_s12, %s2648_s12  }
   0x3   : > { %s85_s17 = ssub.s32 %s2015_s14, %s2085_s16  ;;  %s88_s18 = sadd.s32 1, %s2011_s13 }
   0x4   : > { %p86_p0 = scmp.eq.s32.totalorder %s85_s17, 0  ;;  %p98_p1 = scmp.ne.s32.totalorder %s2011_s13, %s2007_s12 }
   0x5   : > { %p99_p2 = scmp.eq.s32.totalorder %s2083_s15, 2  ;;  %p1617_p3 = scmp.ge.s32.totalorder %s2015_s14, 1 }
   0x6   : > { %s2093_s19 = scalar_select %p86_p0, %s2011_s13, %s88_s18  }
   0x7   : > { %p2095_p4 = por %p99_p2, %p98_p1  ;;  %p149_p5 = scmp.lt.s32.totalorder %s2015_s14, 4 }
   0x9   : > { %p150_p6 = pnand %p1617_p3, %p149_p5 }
   0xa   : > { %v1856_v0 = vld [vmem:[%s2639_s1] sm:$0xff] (!%p150_p6)   ;;  %v2049_v1 = vmov (!%p150_p6), 0   ;;  %s2103_s23 = sshll.u32 (!%p150_p6), %s2083_s15, 6  ;;  %v1857_v2 = vld [vmem:[%s2639_s1 + $0x8] sm:$0xff] (!%p150_p6)   ;;  %v1858_v3 = vld [vmem:[%s2639_s1 + $0x10] sm:$0xff] (!%p150_p6)   ;;  %vm632_vm0 = vcmask (!%p150_p6), 130048  }
   0xb   : > { %153 = sbr.rel (%p150_p6) target bundleno = 459 (0x1cb), region = 32  ;;  %729 = vmatprep.subr.bf16.mxu0 (!%p150_p6), %v2049_v1  ;;  %1749 = vmatprep.subr.bf16.mxu1 (!%p150_p6), %v2049_v1  ;;  %p184_p7 = scmp.lt.s32.totalorder (!%p150_p6), %s2103_s23, 161  ;;  %v1859_v4 = vld [vmem:[%s2639_s1 + $0x18] sm:$0xff] (!%p150_p6)   ;;  %v1860_v7 = vld [vmem:[%s2639_s1 + $0x20] sm:$0xff] (!%p150_p6)   ;;  %v1861_v8 = vld [vmem:[%s2639_s1 + $0x28] sm:$0xff] (!%p150_p6)   ;;  %vm1082_vm1 = vcmask (!%p150_p6), 392192  }
   0xc   : > { %730 = vmatpush1.bf16.msra.mxu0 (!%p150_p6), %v1856_v0  ;;  %1758 = vmatpush1.bf16.msra.mxu1 (!%p150_p6), %v1856_v0  ;;  %v1862_v9 = vld [vmem:[%s2639_s1 + $0x30] sm:$0xff] (!%p150_p6)   ;;  %v1863_v10 = vld [vmem:[%s2639_s1 + $0x38] sm:$0xff] (!%p150_p6)   ;;  %v1864_v11 = vld [vmem:[%s2639_s1 + $0x40] sm:$0xff] (!%p150_p6)   ;;  %s175_s25 = sand.u32 (!%p150_p6), 1, %s2007_s12  }
   0xd   : > { %731 = vmatprep.subr.bf16.mxu0 (!%p150_p6), %v2049_v1  ;;  %1750 = vmatprep.subr.bf16.mxu1 (!%p150_p6), %v2049_v1  ;;  %s1618_s28 = sshll.u32 (!%p150_p6), %s175_s25, 9 }
   0xe   : > { %s2242_s12 = scalar_lea.vmem (!%p150_p6), [#allocation2], %s1618_s28  }
  0x10   : > { %732 = vmatpush1.bf16.msra.mxu0 (!%p150_p6), %v1857_v2  ;;  %1759 = vmatpush1.bf16.msra.mxu1 (!%p150_p6), %v1857_v2 }
  0x11   : > { %733 = vmatprep.subr.bf16.mxu0 (!%p150_p6), %v2049_v1  ;;  %1751 = vmatprep.subr.bf16.mxu1 (!%p150_p6), %v2049_v1 }
  0x12   : > { %s185_s26 = scalar_select %p184_p7, %s2103_s23, 161 }
  0x13   : > { %s1746_s30 = sshll.u32 (%p2095_p4), %s2083_s15, 9 }
  0x14   : > { %s1745_s29 = sshll.u32 %s185_s26, 3  ;;  %734 = vmatpush1.bf16.msra.mxu0 %v1858_v3  ;;  %1760 = vmatpush1.bf16.msra.mxu1 %v1858_v3  ;;  %s2439_s6 = scalar_lea.vmem (%p2095_p4), %s2641_s3, %s1746_s30  }
  0x15   : > { %s2116_s5 = scalar_lea.vmem %s2638_s0, %s1745_s29  ;;  %735 = vmatprep.subr.bf16.mxu0 %v2049_v1  ;;  %1752 = vmatprep.subr.bf16.mxu1 %v2049_v1  ;;  %s1155_s29 = ssub.s32 (%p2095_p4), 162, %s2103_s23 }
  0x16   : > { %v1867_v5 = vld [vmem:[%s2116_s5 + $0x4] ss:$8 sps:$4 sm:$0xff]   ;;  %v1865_v12 = vld [vmem:[%s2116_s5] ss:$8 sps:$4 sm:$0xff]   ;;  %v1871_v14 = vld [vmem:[%s2116_s5 + $0x14] ss:$8 sps:$4 sm:$0xff]  }
  0x17   : > { %v1870_v6 = vld [vmem:[%s2116_s5 + $0x104] ss:$8 sps:$4 sm:$0xff]   ;;  %1696 = vmatprep.mubr.msk.bf16.mxu0 %vm632_vm0, %v1867_v5  ;;  %v1868_v13 = vld [vmem:[%s2116_s5 + $0x100] ss:$8 sps:$4 sm:$0xff]   ;;  %v1873_v15 = vld [vmem:[%s2116_s5 + $0x114] ss:$8 sps:$4 sm:$0xff]  }
  0x18   : > { %1712 = vmatprep.mubr.msk.bf16.mxu1 %vm632_vm0, %v1870_v6  ;;  %736 = vmatpush1.bf16.msra.mxu0 %v1859_v4  ;;  %v1875_v16 = vld [vmem:[%s2116_s5 + $0x10] ss:$8 sps:$4 sm:$0xff]   ;;  %v1877_v18 = vld [vmem:[%s2116_s5 + $0x24] ss:$8 sps:$4 sm:$0xff]   ;;  %v1881_v20 = vld [vmem:[%s2116_s5 + $0x20] ss:$8 sps:$4 sm:$0xff]  }
  0x19   : > { %1761 = vmatpush1.bf16.msra.mxu1 %v1859_v4  ;;  %737 = vmatprep.subr.bf16.mxu0 %v2049_v1  ;;  %v1876_v17 = vld [vmem:[%s2116_s5 + $0x110] ss:$8 sps:$4 sm:$0xff]   ;;  %v1879_v19 = vld [vmem:[%s2116_s5 + $0x124] ss:$8 sps:$4 sm:$0xff]   ;;  %v1882_v21 = vld [vmem:[%s2116_s5 + $0x120] ss:$8 sps:$4 sm:$0xff]  }
  0x1a   : > { %1753 = vmatprep.subr.bf16.mxu1 %v2049_v1  ;;  %v1883_v22 = vld [vmem:[%s2116_s5 + $0x34] ss:$8 sps:$4 sm:$0xff]   ;;  %v1887_v24 = vld [vmem:[%s2116_s5 + $0x30] ss:$8 sps:$4 sm:$0xff]   ;;  %v1889_v26 = vld [vmem:[%s2116_s5 + $0x44] ss:$8 sps:$4 sm:$0xff]  }
  0x1b   : > { %v1885_v23 = vld [vmem:[%s2116_s5 + $0x134] ss:$8 sps:$4 sm:$0xff]   ;;  %v1888_v25 = vld [vmem:[%s2116_s5 + $0x130] ss:$8 sps:$4 sm:$0xff]   ;;  %v1891_v27 = vld [vmem:[%s2116_s5 + $0x144] ss:$8 sps:$4 sm:$0xff]  }
  0x1c   : > { %738 = vmatpush1.bf16.msra.mxu0 %v1860_v7  ;;  %v1893_v28 = vld [vmem:[%s2116_s5 + $0x40] ss:$8 sps:$4 sm:$0xff]   ;;  %v1895_v30 = vld [vmem:[%s2116_s5 + $0x54] ss:$8 sps:$4 sm:$0xff]   ;;  %v1899_v32 = vld [vmem:[%s2116_s5 + $0x50] ss:$8 sps:$4 sm:$0xff]  }
  0x1d   : > { %1762 = vmatpush1.bf16.msra.mxu1 %v1860_v7  ;;  %739 = vmatprep.subr.bf16.mxu0 %v2049_v1  ;;  %v1894_v29 = vld [vmem:[%s2116_s5 + $0x140] ss:$8 sps:$4 sm:$0xff]   ;;  %v1897_v31 = vld [vmem:[%s2116_s5 + $0x154] ss:$8 sps:$4 sm:$0xff]   ;;  %v1900_v33 = vld [vmem:[%s2116_s5 + $0x150] ss:$8 sps:$4 sm:$0xff]  }
  0x1e   : > { %1754 = vmatprep.subr.bf16.mxu1 %v2049_v1  ;;  %v1901_v34 = vld [vmem:[%s2116_s5 + $0x64] ss:$8 sps:$4 sm:$0xff]   ;;  %v1905_v36 = vld [vmem:[%s2116_s5 + $0x60] ss:$8 sps:$4 sm:$0xff]   ;;  %v1907_v38 = vld [vmem:[%s2116_s5 + $0x74] ss:$8 sps:$4 sm:$0xff]  }
  0x1f   : > { %v1903_v35 = vld [vmem:[%s2116_s5 + $0x164] ss:$8 sps:$4 sm:$0xff]   ;;  %v1906_v37 = vld [vmem:[%s2116_s5 + $0x160] ss:$8 sps:$4 sm:$0xff]   ;;  %v1909_v39 = vld [vmem:[%s2116_s5 + $0x174] ss:$8 sps:$4 sm:$0xff]  }
  0x20   : > { %740 = vmatpush1.bf16.msra.mxu0 %v1861_v8  ;;  %v1911_v40 = vld [vmem:[%s2116_s5 + $0x70] ss:$8 sps:$4 sm:$0xff]   ;;  %v1913_v42 = vld [vmem:[%s2116_s5 + $0x84] ss:$8 sps:$4 sm:$0xff]   ;;  %v1917_v44 = vld [vmem:[%s2116_s5 + $0x80] ss:$8 sps:$4 sm:$0xff]  }
  0x21   : > { %1763 = vmatpush1.bf16.msra.mxu1 %v1861_v8  ;;  %741 = vmatprep.subr.bf16.mxu0 %v2049_v1  ;;  %v1912_v41 = vld [vmem:[%s2116_s5 + $0x170] ss:$8 sps:$4 sm:$0xff]   ;;  %v1915_v43 = vld [vmem:[%s2116_s5 + $0x184] ss:$8 sps:$4 sm:$0xff]   ;;  %v1918_v45 = vld [vmem:[%s2116_s5 + $0x180] ss:$8 sps:$4 sm:$0xff]  }
  0x22   : > { %1755 = vmatprep.subr.bf16.mxu1 %v2049_v1  ;;  %v1919_v46 = vld [vmem:[%s2116_s5 + $0x94] ss:$8 sps:$4 sm:$0xff]   ;;  %v1923_v48 = vld [vmem:[%s2116_s5 + $0x90] ss:$8 sps:$4 sm:$0xff]   ;;  %v1925_v50 = vld [vmem:[%s2116_s5 + $0xa4] ss:$8 sps:$4 sm:$0xff]  }
  0x23   : > { %v1921_v47 = vld [vmem:[%s2116_s5 + $0x194] ss:$8 sps:$4 sm:$0xff]   ;;  %v1924_v49 = vld [vmem:[%s2116_s5 + $0x190] ss:$8 sps:$4 sm:$0xff]   ;;  %v1927_v51 = vld [vmem:[%s2116_s5 + $0x1a4] ss:$8 sps:$4 sm:$0xff]  }
  0x24   : > { %742 = vmatpush1.bf16.msra.mxu0 %v1862_v9  ;;  %v1929_v52 = vld [vmem:[%s2116_s5 + $0xa0] ss:$8 sps:$4 sm:$0xff]   ;;  %v1931_v54 = vld [vmem:[%s2116_s5 + $0xb4] ss:$8 sps:$4 sm:$0xff]   ;;  %v1935_v56 = vld [vmem:[%s2116_s5 + $0xb0] ss:$8 sps:$4 sm:$0xff]  }
  0x25   : > { %1764 = vmatpush1.bf16.msra.mxu1 %v1862_v9  ;;  %743 = vmatprep.subr.bf16.mxu0 %v2049_v1  ;;  %v1930_v53 = vld [vmem:[%s2116_s5 + $0x1a0] ss:$8 sps:$4 sm:$0xff]   ;;  %v1933_v55 = vld [vmem:[%s2116_s5 + $0x1b4] ss:$8 sps:$4 sm:$0xff]   ;;  %v1936_v57 = vld [vmem:[%s2116_s5 + $0x1b0] ss:$8 sps:$4 sm:$0xff]  }
  0x26   : > { %1756 = vmatprep.subr.bf16.mxu1 %v2049_v1  ;;  %v1937_v58 = vld [vmem:[%s2116_s5 + $0xc4] ss:$8 sps:$4 sm:$0xff]   ;;  %v1941_v60 = vld [vmem:[%s2116_s5 + $0xc0] ss:$8 sps:$4 sm:$0xff]   ;;  %v1943_v62 = vld [vmem:[%s2116_s5 + $0xd4] ss:$8 sps:$4 sm:$0xff]  }
  0x27   : > { %v1939_v59 = vld [vmem:[%s2116_s5 + $0x1c4] ss:$8 sps:$4 sm:$0xff]   ;;  %v1942_v61 = vld [vmem:[%s2116_s5 + $0x1c0] ss:$8 sps:$4 sm:$0xff]   ;;  %v1945_v63 = vld [vmem:[%s2116_s5 + $0x1d4] ss:$8 sps:$4 sm:$0xff]  }
  0x28   : > { %744 = vmatpush1.bf16.msra.mxu0 %v1863_v10  ;;  %v1947_v0 = vld [vmem:[%s2116_s5 + $0xd0] ss:$8 sps:$4 sm:$0xff]   ;;  %v1949_v2 = vld [vmem:[%s2116_s5 + $0xe4] ss:$8 sps:$4 sm:$0xff]   ;;  %v1953_v4 = vld [vmem:[%s2116_s5 + $0xe0] ss:$8 sps:$4 sm:$0xff]  }
  0x29   : > { %1765 = vmatpush1.bf16.msra.mxu1 %v1863_v10  ;;  %745 = vmatprep.subr.bf16.mxu0 %v2049_v1  ;;  %v1951_v3 = vld [vmem:[%s2116_s5 + $0x1e4] ss:$8 sps:$4 sm:$0xff]   ;;  %v1954_v5 = vld [vmem:[%s2116_s5 + $0x1e0] ss:$8 sps:$4 sm:$0xff]   ;;  %v1955_v6 = vld [vmem:[%s2116_s5 + $0xf4] ss:$8 sps:$4 sm:$0xff]  }
  0x2a   : > { %1757 = vmatprep.subr.bf16.mxu1 %v2049_v1  ;;  %v1948_v1 = vld [vmem:[%s2116_s5 + $0x1d0] ss:$8 sps:$4 sm:$0xff]   ;;  %v1957_v7 = vld [vmem:[%s2116_s5 + $0x1f4] ss:$8 sps:$4 sm:$0xff]   ;;  %v2236_v10 = vld [vmem:[%s2640_s2] ss:$0 sm:$0xff] }
  0x2b   : > { %v1959_v8 = vld [vmem:[%s2116_s5 + $0xf0] ss:$8 sps:$4 sm:$0xff]   ;;  %p1156_p8 = scmp.lt.s32.totalorder (%p2095_p4), %s1155_s29, 64 }
  0x2c   : > { %746 = vmatpush1.bf16.msra.mxu0 %v1864_v11  ;;  %v1960_v9 = vld [vmem:[%s2116_s5 + $0x1f0] ss:$8 sps:$4 sm:$0xff]  }
  0x2d   : > { %1766 = vmatpush1.bf16.msra.mxu1 %v1864_v11 }
  0x2f   : > { %762 = vmatmul.mubr.bf16.vlgmr.msra.gmra.mrb[0].mxu0 %v1865_v12 }
  0x30   : > { %890 = vmatmul.mubr.bf16.vlgmr.msra.gmra.mrb[0].mxu1 %v1868_v13  ;;  %1697 = vmatprep.mubr.msk.bf16.mxu0 %vm632_vm0, %v1871_v14 }
  0x31   : > { %1713 = vmatprep.mubr.msk.bf16.mxu1 %vm632_vm0, %v1873_v15 }
  0x37   : > { %770 = vmatmul.mubr.bf16.gmra.mrb[4].mxu0 %v1875_v16 }
  0x38   : > { %898 = vmatmul.mubr.bf16.gmra.mrb[4].mxu1 %v1876_v17  ;;  %1698 = vmatprep.mubr.msk.bf16.mxu0 %vm632_vm0, %v1877_v18 }
  0x39   : > { %1714 = vmatprep.mubr.msk.bf16.mxu1 %vm632_vm0, %v1879_v19 }
  0x3f   : > { %778 = vmatmul.mubr.bf16.gmra.mrb[8].mxu0 %v1881_v20 }
  0x40   : > { %906 = vmatmul.mubr.bf16.gmra.mrb[8].mxu1 %v1882_v21  ;;  %1699 = vmatprep.mubr.msk.bf16.mxu0 %vm632_vm0, %v1883_v22 }
  0x41   : > { %1715 = vmatprep.mubr.msk.bf16.mxu1 %vm632_vm0, %v1885_v23 }
  0x47   : > { %786 = vmatmul.mubr.bf16.gmra.mrb[12].mxu0 %v1887_v24 }
  0x48   : > { %914 = vmatmul.mubr.bf16.gmra.mrb[12].mxu1 %v1888_v25  ;;  %1700 = vmatprep.mubr.msk.bf16.mxu0 %vm632_vm0, %v1889_v26 }
  0x49   : > { %1716 = vmatprep.mubr.msk.bf16.mxu1 %vm632_vm0, %v1891_v27 }
  0x4f   : > { %794 = vmatmul.mubr.bf16.gmra.mrb[16].mxu0 %v1893_v28 }
  0x50   : > { %922 = vmatmul.mubr.bf16.gmra.mrb[16].mxu1 %v1894_v29  ;;  %1701 = vmatprep.mubr.msk.bf16.mxu0 %vm632_vm0, %v1895_v30 }
  0x51   : > { %1717 = vmatprep.mubr.msk.bf16.mxu1 %vm632_vm0, %v1897_v31 }
  0x57   : > { %802 = vmatmul.mubr.bf16.gmra.mrb[20].mxu0 %v1899_v32 }
  0x58   : > { %930 = vmatmul.mubr.bf16.gmra.mrb[20].mxu1 %v1900_v33  ;;  %1702 = vmatprep.mubr.msk.bf16.mxu0 %vm632_vm0, %v1901_v34 }
  0x59   : > { %1718 = vmatprep.mubr.msk.bf16.mxu1 %vm632_vm0, %v1903_v35 }
  0x5f   : > { %810 = vmatmul.mubr.bf16.gmra.mrb[24].mxu0 %v1905_v36 }
  0x60   : > { %938 = vmatmul.mubr.bf16.gmra.mrb[24].mxu1 %v1906_v37  ;;  %1703 = vmatprep.mubr.msk.bf16.mxu0 %vm632_vm0, %v1907_v38 }
  0x61   : > { %1719 = vmatprep.mubr.msk.bf16.mxu1 %vm632_vm0, %v1909_v39 }
  0x67   : > { %818 = vmatmul.mubr.bf16.gmra.mrb[28].mxu0 %v1911_v40 }
  0x68   : > { %946 = vmatmul.mubr.bf16.gmra.mrb[28].mxu1 %v1912_v41  ;;  %1704 = vmatprep.mubr.msk.bf16.mxu0 %vm632_vm0, %v1913_v42 }
  0x69   : > { %1720 = vmatprep.mubr.msk.bf16.mxu1 %vm632_vm0, %v1915_v43 }
  0x6f   : > { %826 = vmatmul.mubr.bf16.gmra.mrb[32].mxu0 %v1917_v44 }
  0x70   : > { %954 = vmatmul.mubr.bf16.gmra.mrb[32].mxu1 %v1918_v45  ;;  %1705 = vmatprep.mubr.msk.bf16.mxu0 %vm632_vm0, %v1919_v46 }
  0x71   : > { %1721 = vmatprep.mubr.msk.bf16.mxu1 %vm632_vm0, %v1921_v47 }
  0x77   : > { %834 = vmatmul.mubr.bf16.gmra.mrb[36].mxu0 %v1923_v48 }
  0x78   : > { %962 = vmatmul.mubr.bf16.gmra.mrb[36].mxu1 %v1924_v49  ;;  %1706 = vmatprep.mubr.msk.bf16.mxu0 %vm632_vm0, %v1925_v50 }
  0x79   : > { %1722 = vmatprep.mubr.msk.bf16.mxu1 %vm632_vm0, %v1927_v51 }
  0x7f   : > { %842 = vmatmul.mubr.bf16.gmra.mrb[40].mxu0 %v1929_v52 }
  0x80   : > { %970 = vmatmul.mubr.bf16.gmra.mrb[40].mxu1 %v1930_v53  ;;  %1707 = vmatprep.mubr.msk.bf16.mxu0 %vm632_vm0, %v1931_v54 }
  0x81   : > { %1723 = vmatprep.mubr.msk.bf16.mxu1 %vm632_vm0, %v1933_v55 }
  0x87   : > { %850 = vmatmul.mubr.bf16.gmra.mrb[44].mxu0 %v1935_v56 }
  0x88   : > { %978 = vmatmul.mubr.bf16.gmra.mrb[44].mxu1 %v1936_v57  ;;  %1708 = vmatprep.mubr.msk.bf16.mxu0 %vm632_vm0, %v1937_v58 }
  0x89   : > { %1724 = vmatprep.mubr.msk.bf16.mxu1 %vm632_vm0, %v1939_v59 }
  0x8f   : > { %858 = vmatmul.mubr.bf16.gmra.mrb[48].mxu0 %v1941_v60 }
  0x90   : > { %986 = vmatmul.mubr.bf16.gmra.mrb[48].mxu1 %v1942_v61  ;;  %1709 = vmatprep.mubr.msk.bf16.mxu0 %vm632_vm0, %v1943_v62 }
  0x91   : > { %1725 = vmatprep.mubr.msk.bf16.mxu1 %vm632_vm0, %v1945_v63 }
  0x97   : > { %866 = vmatmul.mubr.bf16.gmra.mrb[52].mxu0 %v1947_v0 }
  0x98   : > { %994 = vmatmul.mubr.bf16.gmra.mrb[52].mxu1 %v1948_v1  ;;  %1710 = vmatprep.mubr.msk.bf16.mxu0 %vm632_vm0, %v1949_v2 }
  0x99   : > { %1726 = vmatprep.mubr.msk.bf16.mxu1 %vm632_vm0, %v1951_v3 }
  0x9f   : > { %874 = vmatmul.mubr.bf16.gmra.mrb[56].mxu0 %v1953_v4 }
  0xa0   : > { %1002 = vmatmul.mubr.bf16.gmra.mrb[56].mxu1 %v1954_v5  ;;  %1711 = vmatprep.mubr.msk.bf16.mxu0 %vm632_vm0, %v1955_v6 }
  0xa1   : > { %1727 = vmatprep.mubr.msk.bf16.mxu1 %vm632_vm0, %v1957_v7 }
  0xa7   : > { %882 = vmatmul.mubr.bf16.gmra.mrb[60].mxu0 %v1959_v8 }
  0xa8   : > { %1010 = vmatmul.mubr.bf16.gmra.mrb[60].mxu1 %v1960_v9 }
 0x102   : > { %v763_v11 = vpop.f32.mrb[0].mxu0 }
 0x103   : > { %v891_v12 = vpop.f32.mrb[0].mxu1  ;;  %v764_v13 = vadd.f32 %v2236_v10, %v763_v11  ;;  %v765_v15 = vpop.f32.mrb[1].mxu0 }
 0x104   : > { %v892_v14 = vadd.f32 %v2236_v10, %v891_v12  ;;  %v893_v16 = vpop.f32.mrb[1].mxu1  ;;  %v766_v17 = vpop.f32.mrb[2].mxu0 }
 0x105   : > { %v894_v18 = vpop.f32.mrb[2].mxu1  ;;  %v1018_v19 = vmax.f32 %v764_v13, 0.0  ;;  %v767_v21 = vadd.f32 %v2236_v10, %v766_v17  ;;  %v768_v23 = vpop.f32.mrb[3].mxu0 }
 0x106   : > { %v1050_v20 = vmax.f32 %v892_v14, 0.0  ;;  %v895_v22 = vadd.f32 %v2236_v10, %v894_v18  ;;  %v896_v24 = vpop.f32.mrb[3].mxu1 }
 0x107   : > { %1083 = vst.msk [vmem:[%s2242_s12] sm:$0xff] %vm1082_vm1, %v1018_v19  ;;  %v1019_v25 = vmax.f32 %v767_v21, 0.0 }
 0x108   : > { %1115 = vst.msk [vmem:[%s2242_s12 + $0x100] sm:$0xff] %vm1082_vm1, %v1050_v20  ;;  %v1051_v26 = vmax.f32 %v895_v22, 0.0 }
 0x109   : > { %1084 = vst.msk [vmem:[%s2242_s12 + $0x8] sm:$0xff] %vm1082_vm1, %v1019_v25 }
 0x10a   : > { %1116 = vst.msk [vmem:[%s2242_s12 + $0x108] sm:$0xff] %vm1082_vm1, %v1051_v26  ;;  %v771_v27 = vpop.f32.mrb[4].mxu0 }
 0x10b   : > { %v899_v28 = vpop.f32.mrb[4].mxu1  ;;  %v772_v29 = vadd.f32 %v2236_v10, %v771_v27  ;;  %v773_v31 = vpop.f32.mrb[5].mxu0 }
 0x10c   : > { %v900_v30 = vadd.f32 %v2236_v10, %v899_v28  ;;  %v901_v32 = vpop.f32.mrb[5].mxu1  ;;  %v774_v33 = vpop.f32.mrb[6].mxu0 }
 0x10d   : > { %v902_v34 = vpop.f32.mrb[6].mxu1  ;;  %v1020_v35 = vmax.f32 %v772_v29, 0.0  ;;  %v775_v37 = vadd.f32 %v2236_v10, %v774_v33  ;;  %v776_v39 = vpop.f32.mrb[7].mxu0 }
 0x10e   : > { %v1052_v36 = vmax.f32 %v900_v30, 0.0  ;;  %v903_v38 = vadd.f32 %v2236_v10, %v902_v34  ;;  %v904_v40 = vpop.f32.mrb[7].mxu1 }
 0x10f   : > { %1085 = vst.msk [vmem:[%s2242_s12 + $0x10] sm:$0xff] %vm1082_vm1, %v1020_v35  ;;  %v1021_v41 = vmax.f32 %v775_v37, 0.0 }
 0x110   : > { %1117 = vst.msk [vmem:[%s2242_s12 + $0x110] sm:$0xff] %vm1082_vm1, %v1052_v36  ;;  %v1053_v42 = vmax.f32 %v903_v38, 0.0 }
 0x111   : > { %1086 = vst.msk [vmem:[%s2242_s12 + $0x18] sm:$0xff] %vm1082_vm1, %v1021_v41 }
 0x112   : > { %1118 = vst.msk [vmem:[%s2242_s12 + $0x118] sm:$0xff] %vm1082_vm1, %v1053_v42  ;;  %v779_v43 = vpop.f32.mrb[8].mxu0 }
 0x113   : > { %v907_v44 = vpop.f32.mrb[8].mxu1  ;;  %v780_v45 = vadd.f32 %v2236_v10, %v779_v43  ;;  %v781_v47 = vpop.f32.mrb[9].mxu0 }
 0x114   : > { %v908_v46 = vadd.f32 %v2236_v10, %v907_v44  ;;  %v909_v48 = vpop.f32.mrb[9].mxu1  ;;  %v782_v49 = vpop.f32.mrb[10].mxu0 }
 0x115   : > { %v910_v50 = vpop.f32.mrb[10].mxu1  ;;  %v1022_v51 = vmax.f32 %v780_v45, 0.0  ;;  %v783_v53 = vadd.f32 %v2236_v10, %v782_v49  ;;  %v784_v55 = vpop.f32.mrb[11].mxu0 }
 0x116   : > { %v1054_v52 = vmax.f32 %v908_v46, 0.0  ;;  %v911_v54 = vadd.f32 %v2236_v10, %v910_v50  ;;  %v912_v56 = vpop.f32.mrb[11].mxu1 }
 0x117   : > { %1087 = vst.msk [vmem:[%s2242_s12 + $0x20] sm:$0xff] %vm1082_vm1, %v1022_v51  ;;  %v1023_v57 = vmax.f32 %v783_v53, 0.0 }
 0x118   : > { %1119 = vst.msk [vmem:[%s2242_s12 + $0x120] sm:$0xff] %vm1082_vm1, %v1054_v52  ;;  %v1055_v58 = vmax.f32 %v911_v54, 0.0 }
 0x119   : > { %1088 = vst.msk [vmem:[%s2242_s12 + $0x28] sm:$0xff] %vm1082_vm1, %v1023_v57 }
 0x11a   : > { %1120 = vst.msk [vmem:[%s2242_s12 + $0x128] sm:$0xff] %vm1082_vm1, %v1055_v58  ;;  %v787_v59 = vpop.f32.mrb[12].mxu0 }
 0x11b   : > { %v915_v60 = vpop.f32.mrb[12].mxu1  ;;  %v788_v61 = vadd.f32 %v2236_v10, %v787_v59  ;;  %v789_v63 = vpop.f32.mrb[13].mxu0 }
 0x11c   : > { %v916_v62 = vadd.f32 %v2236_v10, %v915_v60  ;;  %v917_v0 = vpop.f32.mrb[13].mxu1  ;;  %v790_v1 = vpop.f32.mrb[14].mxu0 }
 0x11d   : > { %v918_v2 = vpop.f32.mrb[14].mxu1  ;;  %v1024_v3 = vmax.f32 %v788_v61, 0.0  ;;  %v791_v5 = vadd.f32 %v2236_v10, %v790_v1  ;;  %v792_v7 = vpop.f32.mrb[15].mxu0 }
 0x11e   : > { %v1056_v4 = vmax.f32 %v916_v62, 0.0  ;;  %v919_v6 = vadd.f32 %v2236_v10, %v918_v2  ;;  %v920_v8 = vpop.f32.mrb[15].mxu1 }
 0x11f   : > { %1089 = vst.msk [vmem:[%s2242_s12 + $0x30] sm:$0xff] %vm1082_vm1, %v1024_v3  ;;  %v1025_v9 = vmax.f32 %v791_v5, 0.0 }
 0x120   : > { %1121 = vst.msk [vmem:[%s2242_s12 + $0x130] sm:$0xff] %vm1082_vm1, %v1056_v4  ;;  %v1057_v11 = vmax.f32 %v919_v6, 0.0 }
 0x121   : > { %1090 = vst.msk [vmem:[%s2242_s12 + $0x38] sm:$0xff] %vm1082_vm1, %v1025_v9 }
 0x122   : > { %1122 = vst.msk [vmem:[%s2242_s12 + $0x138] sm:$0xff] %vm1082_vm1, %v1057_v11  ;;  %v795_v12 = vpop.f32.mrb[16].mxu0 }
 0x123   : > { %v923_v13 = vpop.f32.mrb[16].mxu1  ;;  %v796_v14 = vadd.f32 %v2236_v10, %v795_v12  ;;  %v797_v16 = vpop.f32.mrb[17].mxu0 }
 0x124   : > { %v924_v15 = vadd.f32 %v2236_v10, %v923_v13  ;;  %v925_v17 = vpop.f32.mrb[17].mxu1  ;;  %v798_v18 = vpop.f32.mrb[18].mxu0 }
 0x125   : > { %v926_v19 = vpop.f32.mrb[18].mxu1  ;;  %v1026_v20 = vmax.f32 %v796_v14, 0.0  ;;  %v799_v22 = vadd.f32 %v2236_v10, %v798_v18  ;;  %v800_v24 = vpop.f32.mrb[19].mxu0 }
 0x126   : > { %v1058_v21 = vmax.f32 %v924_v15, 0.0  ;;  %v927_v23 = vadd.f32 %v2236_v10, %v926_v19  ;;  %v928_v25 = vpop.f32.mrb[19].mxu1 }
 0x127   : > { %1091 = vst.msk [vmem:[%s2242_s12 + $0x40] sm:$0xff] %vm1082_vm1, %v1026_v20  ;;  %v1027_v26 = vmax.f32 %v799_v22, 0.0 }
 0x128   : > { %1123 = vst.msk [vmem:[%s2242_s12 + $0x140] sm:$0xff] %vm1082_vm1, %v1058_v21  ;;  %v1059_v27 = vmax.f32 %v927_v23, 0.0 }
 0x129   : > { %1092 = vst.msk [vmem:[%s2242_s12 + $0x48] sm:$0xff] %vm1082_vm1, %v1027_v26 }
 0x12a   : > { %1124 = vst.msk [vmem:[%s2242_s12 + $0x148] sm:$0xff] %vm1082_vm1, %v1059_v27  ;;  %v803_v28 = vpop.f32.mrb[20].mxu0 }
 0x12b   : > { %v931_v29 = vpop.f32.mrb[20].mxu1  ;;  %v804_v30 = vadd.f32 %v2236_v10, %v803_v28  ;;  %v805_v32 = vpop.f32.mrb[21].mxu0 }
 0x12c   : > { %v932_v31 = vadd.f32 %v2236_v10, %v931_v29  ;;  %v933_v33 = vpop.f32.mrb[21].mxu1  ;;  %v806_v34 = vpop.f32.mrb[22].mxu0 }
 0x12d   : > { %v934_v35 = vpop.f32.mrb[22].mxu1  ;;  %v1028_v36 = vmax.f32 %v804_v30, 0.0  ;;  %v807_v38 = vadd.f32 %v2236_v10, %v806_v34  ;;  %v808_v40 = vpop.f32.mrb[23].mxu0 }
 0x12e   : > { %v1060_v37 = vmax.f32 %v932_v31, 0.0  ;;  %v935_v39 = vadd.f32 %v2236_v10, %v934_v35  ;;  %v936_v41 = vpop.f32.mrb[23].mxu1 }
 0x12f   : > { %1093 = vst.msk [vmem:[%s2242_s12 + $0x50] sm:$0xff] %vm1082_vm1, %v1028_v36  ;;  %v1029_v42 = vmax.f32 %v807_v38, 0.0 }
 0x130   : > { %1125 = vst.msk [vmem:[%s2242_s12 + $0x150] sm:$0xff] %vm1082_vm1, %v1060_v37  ;;  %v1061_v43 = vmax.f32 %v935_v39, 0.0 }
 0x131   : > { %1094 = vst.msk [vmem:[%s2242_s12 + $0x58] sm:$0xff] %vm1082_vm1, %v1029_v42 }
 0x132   : > { %1126 = vst.msk [vmem:[%s2242_s12 + $0x158] sm:$0xff] %vm1082_vm1, %v1061_v43  ;;  %v811_v44 = vpop.f32.mrb[24].mxu0 }
 0x133   : > { %v939_v45 = vpop.f32.mrb[24].mxu1  ;;  %v812_v46 = vadd.f32 %v2236_v10, %v811_v44  ;;  %v813_v48 = vpop.f32.mrb[25].mxu0 }
 0x134   : > { %v940_v47 = vadd.f32 %v2236_v10, %v939_v45  ;;  %v941_v49 = vpop.f32.mrb[25].mxu1  ;;  %v814_v50 = vpop.f32.mrb[26].mxu0 }
 0x135   : > { %v942_v51 = vpop.f32.mrb[26].mxu1  ;;  %v1030_v52 = vmax.f32 %v812_v46, 0.0  ;;  %v815_v54 = vadd.f32 %v2236_v10, %v814_v50  ;;  %v816_v56 = vpop.f32.mrb[27].mxu0 }
 0x136   : > { %v1062_v53 = vmax.f32 %v940_v47, 0.0  ;;  %v943_v55 = vadd.f32 %v2236_v10, %v942_v51  ;;  %v944_v57 = vpop.f32.mrb[27].mxu1 }
 0x137   : > { %1095 = vst.msk [vmem:[%s2242_s12 + $0x60] sm:$0xff] %vm1082_vm1, %v1030_v52  ;;  %v1031_v58 = vmax.f32 %v815_v54, 0.0 }
 0x138   : > { %1127 = vst.msk [vmem:[%s2242_s12 + $0x160] sm:$0xff] %vm1082_vm1, %v1062_v53  ;;  %v1063_v59 = vmax.f32 %v943_v55, 0.0 }
 0x139   : > { %1096 = vst.msk [vmem:[%s2242_s12 + $0x68] sm:$0xff] %vm1082_vm1, %v1031_v58 }
 0x13a   : > { %1128 = vst.msk [vmem:[%s2242_s12 + $0x168] sm:$0xff] %vm1082_vm1, %v1063_v59  ;;  %v819_v60 = vpop.f32.mrb[28].mxu0 }
 0x13b   : > { %v947_v61 = vpop.f32.mrb[28].mxu1  ;;  %v820_v62 = vadd.f32 %v2236_v10, %v819_v60  ;;  %v821_v0 = vpop.f32.mrb[29].mxu0 }
 0x13c   : > { %v948_v63 = vadd.f32 %v2236_v10, %v947_v61  ;;  %v949_v1 = vpop.f32.mrb[29].mxu1  ;;  %v822_v2 = vpop.f32.mrb[30].mxu0 }
 0x13d   : > { %v950_v3 = vpop.f32.mrb[30].mxu1  ;;  %v1032_v4 = vmax.f32 %v820_v62, 0.0  ;;  %v823_v6 = vadd.f32 %v2236_v10, %v822_v2  ;;  %v824_v8 = vpop.f32.mrb[31].mxu0 }
 0x13e   : > { %v1064_v5 = vmax.f32 %v948_v63, 0.0  ;;  %v951_v7 = vadd.f32 %v2236_v10, %v950_v3  ;;  %v952_v9 = vpop.f32.mrb[31].mxu1 }
 0x13f   : > { %1097 = vst.msk [vmem:[%s2242_s12 + $0x70] sm:$0xff] %vm1082_vm1, %v1032_v4  ;;  %v1033_v11 = vmax.f32 %v823_v6, 0.0 }
 0x140   : > { %1129 = vst.msk [vmem:[%s2242_s12 + $0x170] sm:$0xff] %vm1082_vm1, %v1064_v5  ;;  %v1065_v12 = vmax.f32 %v951_v7, 0.0 }
 0x141   : > { %1098 = vst.msk [vmem:[%s2242_s12 + $0x78] sm:$0xff] %vm1082_vm1, %v1033_v11 }
 0x142   : > { %1130 = vst.msk [vmem:[%s2242_s12 + $0x178] sm:$0xff] %vm1082_vm1, %v1065_v12  ;;  %v827_v13 = vpop.f32.mrb[32].mxu0 }
 0x143   : > { %v955_v14 = vpop.f32.mrb[32].mxu1  ;;  %v828_v15 = vadd.f32 %v2236_v10, %v827_v13  ;;  %v829_v17 = vpop.f32.mrb[33].mxu0 }
 0x144   : > { %v956_v16 = vadd.f32 %v2236_v10, %v955_v14  ;;  %v957_v18 = vpop.f32.mrb[33].mxu1  ;;  %v830_v19 = vpop.f32.mrb[34].mxu0 }
 0x145   : > { %v958_v20 = vpop.f32.mrb[34].mxu1  ;;  %v1034_v21 = vmax.f32 %v828_v15, 0.0  ;;  %v831_v23 = vadd.f32 %v2236_v10, %v830_v19  ;;  %v832_v25 = vpop.f32.mrb[35].mxu0 }
 0x146   : > { %v1066_v22 = vmax.f32 %v956_v16, 0.0  ;;  %v959_v24 = vadd.f32 %v2236_v10, %v958_v20  ;;  %v960_v26 = vpop.f32.mrb[35].mxu1 }
 0x147   : > { %1099 = vst.msk [vmem:[%s2242_s12 + $0x80] sm:$0xff] %vm1082_vm1, %v1034_v21  ;;  %v1035_v27 = vmax.f32 %v831_v23, 0.0 }
 0x148   : > { %1131 = vst.msk [vmem:[%s2242_s12 + $0x180] sm:$0xff] %vm1082_vm1, %v1066_v22  ;;  %v1067_v28 = vmax.f32 %v959_v24, 0.0 }
 0x149   : > { %1100 = vst.msk [vmem:[%s2242_s12 + $0x88] sm:$0xff] %vm1082_vm1, %v1035_v27 }
 0x14a   : > { %1132 = vst.msk [vmem:[%s2242_s12 + $0x188] sm:$0xff] %vm1082_vm1, %v1067_v28  ;;  %v835_v29 = vpop.f32.mrb[36].mxu0 }
 0x14b   : > { %v963_v30 = vpop.f32.mrb[36].mxu1  ;;  %v836_v31 = vadd.f32 %v2236_v10, %v835_v29  ;;  %v837_v33 = vpop.f32.mrb[37].mxu0 }
 0x14c   : > { %v964_v32 = vadd.f32 %v2236_v10, %v963_v30  ;;  %v965_v34 = vpop.f32.mrb[37].mxu1  ;;  %v838_v35 = vpop.f32.mrb[38].mxu0 }
 0x14d   : > { %v966_v36 = vpop.f32.mrb[38].mxu1  ;;  %v1036_v37 = vmax.f32 %v836_v31, 0.0  ;;  %v839_v39 = vadd.f32 %v2236_v10, %v838_v35  ;;  %v840_v41 = vpop.f32.mrb[39].mxu0 }
 0x14e   : > { %v1068_v38 = vmax.f32 %v964_v32, 0.0  ;;  %v967_v40 = vadd.f32 %v2236_v10, %v966_v36  ;;  %v968_v42 = vpop.f32.mrb[39].mxu1 }
 0x14f   : > { %1101 = vst.msk [vmem:[%s2242_s12 + $0x90] sm:$0xff] %vm1082_vm1, %v1036_v37  ;;  %v1037_v43 = vmax.f32 %v839_v39, 0.0 }
 0x150   : > { %1133 = vst.msk [vmem:[%s2242_s12 + $0x190] sm:$0xff] %vm1082_vm1, %v1068_v38  ;;  %v1069_v44 = vmax.f32 %v967_v40, 0.0 }
 0x151   : > { %1102 = vst.msk [vmem:[%s2242_s12 + $0x98] sm:$0xff] %vm1082_vm1, %v1037_v43 }
 0x152   : > { %1134 = vst.msk [vmem:[%s2242_s12 + $0x198] sm:$0xff] %vm1082_vm1, %v1069_v44  ;;  %v843_v45 = vpop.f32.mrb[40].mxu0 }
 0x153   : > { %v971_v46 = vpop.f32.mrb[40].mxu1  ;;  %v844_v47 = vadd.f32 %v2236_v10, %v843_v45  ;;  %v845_v49 = vpop.f32.mrb[41].mxu0 }
 0x154   : > { %v972_v48 = vadd.f32 %v2236_v10, %v971_v46  ;;  %v973_v50 = vpop.f32.mrb[41].mxu1  ;;  %v846_v51 = vpop.f32.mrb[42].mxu0 }
 0x155   : > { %v974_v52 = vpop.f32.mrb[42].mxu1  ;;  %v1038_v53 = vmax.f32 %v844_v47, 0.0  ;;  %v847_v55 = vadd.f32 %v2236_v10, %v846_v51  ;;  %v848_v57 = vpop.f32.mrb[43].mxu0 }
 0x156   : > { %v1070_v54 = vmax.f32 %v972_v48, 0.0  ;;  %v975_v56 = vadd.f32 %v2236_v10, %v974_v52  ;;  %v976_v58 = vpop.f32.mrb[43].mxu1 }
 0x157   : > { %1103 = vst.msk [vmem:[%s2242_s12 + $0xa0] sm:$0xff] %vm1082_vm1, %v1038_v53  ;;  %v1039_v59 = vmax.f32 %v847_v55, 0.0 }
 0x158   : > { %1135 = vst.msk [vmem:[%s2242_s12 + $0x1a0] sm:$0xff] %vm1082_vm1, %v1070_v54  ;;  %v1071_v60 = vmax.f32 %v975_v56, 0.0 }
 0x159   : > { %1104 = vst.msk [vmem:[%s2242_s12 + $0xa8] sm:$0xff] %vm1082_vm1, %v1039_v59 }
 0x15a   : > { %1136 = vst.msk [vmem:[%s2242_s12 + $0x1a8] sm:$0xff] %vm1082_vm1, %v1071_v60  ;;  %v851_v61 = vpop.f32.mrb[44].mxu0 }
 0x15b   : > { %v979_v62 = vpop.f32.mrb[44].mxu1  ;;  %v852_v63 = vadd.f32 %v2236_v10, %v851_v61  ;;  %v853_v1 = vpop.f32.mrb[45].mxu0 }
 0x15c   : > { %v980_v0 = vadd.f32 %v2236_v10, %v979_v62  ;;  %v981_v2 = vpop.f32.mrb[45].mxu1  ;;  %v854_v3 = vpop.f32.mrb[46].mxu0 }
 0x15d   : > { %v982_v4 = vpop.f32.mrb[46].mxu1  ;;  %v1040_v5 = vmax.f32 %v852_v63, 0.0  ;;  %v855_v7 = vadd.f32 %v2236_v10, %v854_v3  ;;  %v856_v9 = vpop.f32.mrb[47].mxu0 }
 0x15e   : > { %v1072_v6 = vmax.f32 %v980_v0, 0.0  ;;  %v983_v8 = vadd.f32 %v2236_v10, %v982_v4  ;;  %v984_v11 = vpop.f32.mrb[47].mxu1 }
 0x15f   : > { %1105 = vst.msk [vmem:[%s2242_s12 + $0xb0] sm:$0xff] %vm1082_vm1, %v1040_v5  ;;  %v1041_v12 = vmax.f32 %v855_v7, 0.0 }
 0x160   : > { %1137 = vst.msk [vmem:[%s2242_s12 + $0x1b0] sm:$0xff] %vm1082_vm1, %v1072_v6  ;;  %v1073_v13 = vmax.f32 %v983_v8, 0.0 }
 0x161   : > { %1106 = vst.msk [vmem:[%s2242_s12 + $0xb8] sm:$0xff] %vm1082_vm1, %v1041_v12 }
 0x162   : > { %1138 = vst.msk [vmem:[%s2242_s12 + $0x1b8] sm:$0xff] %vm1082_vm1, %v1073_v13  ;;  %v859_v14 = vpop.f32.mrb[48].mxu0 }
 0x163   : > { %v987_v15 = vpop.f32.mrb[48].mxu1  ;;  %v860_v16 = vadd.f32 %v2236_v10, %v859_v14  ;;  %v861_v18 = vpop.f32.mrb[49].mxu0 }
 0x164   : > { %v988_v17 = vadd.f32 %v2236_v10, %v987_v15  ;;  %v989_v19 = vpop.f32.mrb[49].mxu1  ;;  %v862_v20 = vpop.f32.mrb[50].mxu0 }
 0x165   : > { %v990_v21 = vpop.f32.mrb[50].mxu1  ;;  %v1042_v22 = vmax.f32 %v860_v16, 0.0  ;;  %v863_v24 = vadd.f32 %v2236_v10, %v862_v20  ;;  %v864_v26 = vpop.f32.mrb[51].mxu0 }
 0x166   : > { %v1074_v23 = vmax.f32 %v988_v17, 0.0  ;;  %v991_v25 = vadd.f32 %v2236_v10, %v990_v21  ;;  %v992_v27 = vpop.f32.mrb[51].mxu1 }
 0x167   : > { %1107 = vst.msk [vmem:[%s2242_s12 + $0xc0] sm:$0xff] %vm1082_vm1, %v1042_v22  ;;  %v1043_v28 = vmax.f32 %v863_v24, 0.0 }
 0x168   : > { %1139 = vst.msk [vmem:[%s2242_s12 + $0x1c0] sm:$0xff] %vm1082_vm1, %v1074_v23  ;;  %v1075_v29 = vmax.f32 %v991_v25, 0.0 }
 0x169   : > { %1108 = vst.msk [vmem:[%s2242_s12 + $0xc8] sm:$0xff] %vm1082_vm1, %v1043_v28 }
 0x16a   : > { %1140 = vst.msk [vmem:[%s2242_s12 + $0x1c8] sm:$0xff] %vm1082_vm1, %v1075_v29  ;;  %v867_v30 = vpop.f32.mrb[52].mxu0 }
 0x16b   : > { %v995_v31 = vpop.f32.mrb[52].mxu1  ;;  %v868_v32 = vadd.f32 %v2236_v10, %v867_v30  ;;  %v869_v34 = vpop.f32.mrb[53].mxu0 }
 0x16c   : > { %v996_v33 = vadd.f32 %v2236_v10, %v995_v31  ;;  %v997_v35 = vpop.f32.mrb[53].mxu1  ;;  %v870_v36 = vpop.f32.mrb[54].mxu0 }
 0x16d   : > { %v998_v37 = vpop.f32.mrb[54].mxu1  ;;  %v1044_v38 = vmax.f32 %v868_v32, 0.0  ;;  %v871_v40 = vadd.f32 %v2236_v10, %v870_v36  ;;  %v872_v42 = vpop.f32.mrb[55].mxu0 }
 0x16e   : > { %v1076_v39 = vmax.f32 %v996_v33, 0.0  ;;  %v999_v41 = vadd.f32 %v2236_v10, %v998_v37  ;;  %v1000_v43 = vpop.f32.mrb[55].mxu1 }
 0x16f   : > { %1109 = vst.msk [vmem:[%s2242_s12 + $0xd0] sm:$0xff] %vm1082_vm1, %v1044_v38  ;;  %v1045_v44 = vmax.f32 %v871_v40, 0.0 }
 0x170   : > { %1141 = vst.msk [vmem:[%s2242_s12 + $0x1d0] sm:$0xff] %vm1082_vm1, %v1076_v39  ;;  %v1077_v45 = vmax.f32 %v999_v41, 0.0 }
 0x171   : > { %1110 = vst.msk [vmem:[%s2242_s12 + $0xd8] sm:$0xff] %vm1082_vm1, %v1045_v44 }
 0x172   : > { %1142 = vst.msk [vmem:[%s2242_s12 + $0x1d8] sm:$0xff] %vm1082_vm1, %v1077_v45  ;;  %v875_v46 = vpop.f32.mrb[56].mxu0 }
 0x173   : > { %v1003_v47 = vpop.f32.mrb[56].mxu1  ;;  %v876_v48 = vadd.f32 %v2236_v10, %v875_v46  ;;  %v877_v50 = vpop.f32.mrb[57].mxu0 }
 0x174   : > { %v1004_v49 = vadd.f32 %v2236_v10, %v1003_v47  ;;  %v1005_v51 = vpop.f32.mrb[57].mxu1  ;;  %v878_v52 = vpop.f32.mrb[58].mxu0 }
 0x175   : > { %v1006_v53 = vpop.f32.mrb[58].mxu1  ;;  %v1046_v54 = vmax.f32 %v876_v48, 0.0  ;;  %v879_v56 = vadd.f32 %v2236_v10, %v878_v52  ;;  %v880_v58 = vpop.f32.mrb[59].mxu0 }
 0x176   : > { %v1078_v55 = vmax.f32 %v1004_v49, 0.0  ;;  %v1007_v57 = vadd.f32 %v2236_v10, %v1006_v53  ;;  %v1008_v59 = vpop.f32.mrb[59].mxu1 }
 0x177   : > { %1111 = vst.msk [vmem:[%s2242_s12 + $0xe0] sm:$0xff] %vm1082_vm1, %v1046_v54  ;;  %v1047_v60 = vmax.f32 %v879_v56, 0.0 }
 0x178   : > { %1143 = vst.msk [vmem:[%s2242_s12 + $0x1e0] sm:$0xff] %vm1082_vm1, %v1078_v55  ;;  %v1079_v61 = vmax.f32 %v1007_v57, 0.0 }
 0x179   : > { %1112 = vst.msk [vmem:[%s2242_s12 + $0xe8] sm:$0xff] %vm1082_vm1, %v1047_v60 }
 0x17a   : > { %1144 = vst.msk [vmem:[%s2242_s12 + $0x1e8] sm:$0xff] %vm1082_vm1, %v1079_v61  ;;  %v883_v62 = vpop.f32.mrb[60].mxu0 }
 0x17b   : > { %v1011_v63 = vpop.f32.mrb[60].mxu1  ;;  %v884_v0 = vadd.f32 %v2236_v10, %v883_v62  ;;  %v885_v2 = vpop.f32.mrb[61].mxu0 }
 0x17c   : > { %v1012_v1 = vadd.f32 %v2236_v10, %v1011_v63  ;;  %v1013_v3 = vpop.f32.mrb[61].mxu1  ;;  %v886_v4 = vpop.f32.mrb[62].mxu0  ;;  %1153 = sbr.rel (!%p2095_p4) target bundleno = 459 (0x1cb), region = 36 }
 0x17d   : > { %v1014_v5 = vpop.f32.mrb[62].mxu1  ;;  %v1048_v6 = vmax.f32 %v884_v0, 0.0  ;;  %v887_v8 = vadd.f32 %v2236_v10, %v886_v4  ;;  %v888_v11 = vpop.f32.mrb[63].mxu0 }
 0x17e   : > { %v1080_v7 = vmax.f32 %v1012_v1, 0.0  ;;  %v1015_v9 = vadd.f32 %v2236_v10, %v1014_v5  ;;  %v1016_v12 = vpop.f32.mrb[63].mxu1 }
 0x17f   : > { %1113 = vst.msk [vmem:[%s2242_s12 + $0xf0] sm:$0xff] %vm1082_vm1, %v1048_v6  ;;  %v1049_v13 = vmax.f32 %v887_v8, 0.0 }
 0x180   : > { %1145 = vst.msk [vmem:[%s2242_s12 + $0x1f0] sm:$0xff] %vm1082_vm1, %v1080_v7  ;;  %v1081_v14 = vmax.f32 %v1015_v9, 0.0 }
 0x181   : > { %1114 = vst.msk [vmem:[%s2242_s12 + $0xf8] sm:$0xff] %vm1082_vm1, %v1049_v13 }
 0x182   : > { %1146 = vst.msk [vmem:[%s2242_s12 + $0x1f8] sm:$0xff] %vm1082_vm1, %v1081_v14 }
 0x183   : > { %s2652_s29 = smov (!%p1156_p8, %s1155_s29), 64 }
 0x184   : > { %s1730_s7 = sshll.u32 %s2652_s29, 7 }
 0x185   : > { %p1733_p9 = scmp.eq.s32.totalorder %s1730_s7, 0 }
 0x186   : > { %s2445_s8 = sshrl.u32 (!%p1733_p9), %s2652_s29, 6 }
 0x187   : > { %1164 = sbr.rel (%p1733_p9) target bundleno = 459 (0x1cb), region = 40  ;;  %p1734_p10 = scmp.le.s32.totalorder (!%p1733_p9), %s2445_s8, 0 }
 0x18e   : > { %1570 = sbr.rel (%p1734_p10) target bundleno = 438 (0x1b6), region = 116  ;;  %s2643_s15 = smov (!%p1734_p10), %s2439_s6 }
 0x18f   : > { %s2644_s20 = smov (!%p1734_p10), %s2242_s12  ;;  %s2454_s23 = smov (!%p1734_p10), 0  }
 0x190   : > { %s2456_s9 = smov (!%p1734_p10), 0  }
 0x195 LB: >> { %v1352_v10 = vld [vmem:[%s2023_s20] sm:$0xff]  ;;  %v1354_v15 = vld [vmem:[%s2023_s20 + $0x8] sm:$0xff]  ;;  %v1356_v16 = vld [vmem:[%s2023_s20 + $0x10] sm:$0xff]  ;;  %s1480_s10 = sadd.s32 1, %s2027_s23  ;;  %s1346_s9 = sadd.s32 1, %s2031_s9   ;;  %s2031_s9 = sphi %s2456_s9, %s1346_s9   ;;  %s2027_s23 = sphi %s2454_s23, %s2647_s23   ;;  %s2023_s20 = sphi %s2644_s20, %s2646_s20   ;;  %s2019_s15 = sphi %s2643_s15, %s2645_s15  }
 0x196   : >> { %1353 = vst [vmem:[%s2019_s15] sm:$0xff] %v1352_v10  ;;  %1355 = vst [vmem:[%s2019_s15 + $0x8] sm:$0xff] %v1354_v15  ;;  %v1358_v17 = vld [vmem:[%s2023_s20 + $0x18] sm:$0xff]  ;;  %v1360_v18 = vld [vmem:[%s2023_s20 + $0x20] sm:$0xff]  ;;  %p1481_p11 = scmp.ge.s32.totalorder %s1480_s10, %s2445_s8  ;;  %p1345_p12 = scmp.ge.s32.totalorder %s1346_s9, %s2445_s8 }
 0x197   : >> { %1357 = vst [vmem:[%s2019_s15 + $0x10] sm:$0xff] %v1356_v16  ;;  %v1362_v19 = vld [vmem:[%s2023_s20 + $0x28] sm:$0xff]  ;;  %1359 = vst [vmem:[%s2019_s15 + $0x18] sm:$0xff] %v1358_v17  ;;  %v1364_v20 = vld [vmem:[%s2023_s20 + $0x30] sm:$0xff] }
 0x198   : >> { %1361 = vst [vmem:[%s2019_s15 + $0x20] sm:$0xff] %v1360_v18  ;;  %1363 = vst [vmem:[%s2019_s15 + $0x28] sm:$0xff] %v1362_v19  ;;  %v1366_v21 = vld [vmem:[%s2023_s20 + $0x38] sm:$0xff]  ;;  %v1368_v22 = vld [vmem:[%s2023_s20 + $0x40] sm:$0xff]  ;;  %s2654_s10 = smov (%p1481_p11, %s1480_s10), 0 }
 0x199   : >> { %1365 = vst [vmem:[%s2019_s15 + $0x30] sm:$0xff] %v1364_v20  ;;  %1367 = vst [vmem:[%s2019_s15 + $0x38] sm:$0xff] %v1366_v21  ;;  %v1370_v23 = vld [vmem:[%s2023_s20 + $0x48] sm:$0xff]  ;;  %v1372_v24 = vld [vmem:[%s2023_s20 + $0x50] sm:$0xff]  ;;  %s1735_s11 = sshll.u32 %s2654_s10, 9  ;;  %s2647_s23 = smov %s2654_s10 }
 0x19a   : >> { %1369 = vst [vmem:[%s2019_s15 + $0x40] sm:$0xff] %v1368_v22  ;;  %v1374_v25 = vld [vmem:[%s2023_s20 + $0x58] sm:$0xff]  ;;  %1371 = vst [vmem:[%s2019_s15 + $0x48] sm:$0xff] %v1370_v23  ;;  %v1376_v26 = vld [vmem:[%s2023_s20 + $0x60] sm:$0xff]  ;;  %s2512_s14 = scalar_lea.vmem %s2242_s12, %s1735_s11 [#allocation2]   ;;  %s2515_s17 = scalar_lea.vmem %s2439_s6, %s1735_s11  }
 0x19b   : >> { %1373 = vst [vmem:[%s2019_s15 + $0x50] sm:$0xff] %v1372_v24  ;;  %1375 = vst [vmem:[%s2019_s15 + $0x58] sm:$0xff] %v1374_v25  ;;  %v1378_v27 = vld [vmem:[%s2023_s20 + $0x68] sm:$0xff]  ;;  %v1380_v28 = vld [vmem:[%s2023_s20 + $0x70] sm:$0xff] }
 0x19c   : >> { %1377 = vst [vmem:[%s2019_s15 + $0x60] sm:$0xff] %v1376_v26  ;;  %1379 = vst [vmem:[%s2019_s15 + $0x68] sm:$0xff] %v1378_v27  ;;  %v1382_v29 = vld [vmem:[%s2023_s20 + $0x78] sm:$0xff]  ;;  %v1384_v30 = vld [vmem:[%s2023_s20 + $0x80] sm:$0xff] }
 0x19d   : >> { %1381 = vst [vmem:[%s2019_s15 + $0x70] sm:$0xff] %v1380_v28  ;;  %v1386_v31 = vld [vmem:[%s2023_s20 + $0x88] sm:$0xff]  ;;  %1383 = vst [vmem:[%s2019_s15 + $0x78] sm:$0xff] %v1382_v29  ;;  %v1388_v32 = vld [vmem:[%s2023_s20 + $0x90] sm:$0xff] }
 0x19e   : >> { %1385 = vst [vmem:[%s2019_s15 + $0x80] sm:$0xff] %v1384_v30  ;;  %1387 = vst [vmem:[%s2019_s15 + $0x88] sm:$0xff] %v1386_v31  ;;  %v1390_v33 = vld [vmem:[%s2023_s20 + $0x98] sm:$0xff]  ;;  %v1392_v34 = vld [vmem:[%s2023_s20 + $0xa0] sm:$0xff] }
 0x19f   : >> { %1389 = vst [vmem:[%s2019_s15 + $0x90] sm:$0xff] %v1388_v32  ;;  %1391 = vst [vmem:[%s2019_s15 + $0x98] sm:$0xff] %v1390_v33  ;;  %v1394_v35 = vld [vmem:[%s2023_s20 + $0xa8] sm:$0xff]  ;;  %v1396_v36 = vld [vmem:[%s2023_s20 + $0xb0] sm:$0xff] }
 0x1a0   : >> { %1393 = vst [vmem:[%s2019_s15 + $0xa0] sm:$0xff] %v1392_v34  ;;  %v1398_v37 = vld [vmem:[%s2023_s20 + $0xb8] sm:$0xff]  ;;  %1395 = vst [vmem:[%s2019_s15 + $0xa8] sm:$0xff] %v1394_v35  ;;  %v1400_v38 = vld [vmem:[%s2023_s20 + $0xc0] sm:$0xff] }
 0x1a1   : >> { %1397 = vst [vmem:[%s2019_s15 + $0xb0] sm:$0xff] %v1396_v36  ;;  %1399 = vst [vmem:[%s2019_s15 + $0xb8] sm:$0xff] %v1398_v37  ;;  %v1402_v39 = vld [vmem:[%s2023_s20 + $0xc8] sm:$0xff]  ;;  %v1404_v40 = vld [vmem:[%s2023_s20 + $0xd0] sm:$0xff] }
 0x1a2   : >> { %1401 = vst [vmem:[%s2019_s15 + $0xc0] sm:$0xff] %v1400_v38  ;;  %1403 = vst [vmem:[%s2019_s15 + $0xc8] sm:$0xff] %v1402_v39  ;;  %v1406_v41 = vld [vmem:[%s2023_s20 + $0xd8] sm:$0xff]  ;;  %v1408_v42 = vld [vmem:[%s2023_s20 + $0xe0] sm:$0xff] }
 0x1a3   : >> { %1405 = vst [vmem:[%s2019_s15 + $0xd0] sm:$0xff] %v1404_v40  ;;  %v1410_v43 = vld [vmem:[%s2023_s20 + $0xe8] sm:$0xff]  ;;  %1407 = vst [vmem:[%s2019_s15 + $0xd8] sm:$0xff] %v1406_v41  ;;  %v1412_v44 = vld [vmem:[%s2023_s20 + $0xf0] sm:$0xff] }
 0x1a4   : >> { %1409 = vst [vmem:[%s2019_s15 + $0xe0] sm:$0xff] %v1408_v42  ;;  %1411 = vst [vmem:[%s2019_s15 + $0xe8] sm:$0xff] %v1410_v43  ;;  %v1414_v45 = vld [vmem:[%s2023_s20 + $0xf8] sm:$0xff]  ;;  %v1416_v46 = vld [vmem:[%s2023_s20 + $0x100] sm:$0xff] }
 0x1a5   : >> { %1413 = vst [vmem:[%s2019_s15 + $0xf0] sm:$0xff] %v1412_v44  ;;  %1415 = vst [vmem:[%s2019_s15 + $0xf8] sm:$0xff] %v1414_v45  ;;  %v1418_v47 = vld [vmem:[%s2023_s20 + $0x108] sm:$0xff]  ;;  %v1420_v48 = vld [vmem:[%s2023_s20 + $0x110] sm:$0xff] }
 0x1a6   : >> { %1417 = vst [vmem:[%s2019_s15 + $0x100] sm:$0xff] %v1416_v46  ;;  %v1422_v49 = vld [vmem:[%s2023_s20 + $0x118] sm:$0xff]  ;;  %1419 = vst [vmem:[%s2019_s15 + $0x108] sm:$0xff] %v1418_v47  ;;  %v1424_v50 = vld [vmem:[%s2023_s20 + $0x120] sm:$0xff] }
 0x1a7   : >> { %1421 = vst [vmem:[%s2019_s15 + $0x110] sm:$0xff] %v1420_v48  ;;  %1423 = vst [vmem:[%s2019_s15 + $0x118] sm:$0xff] %v1422_v49  ;;  %v1426_v51 = vld [vmem:[%s2023_s20 + $0x128] sm:$0xff]  ;;  %v1428_v52 = vld [vmem:[%s2023_s20 + $0x130] sm:$0xff] }
 0x1a8   : >> { %1425 = vst [vmem:[%s2019_s15 + $0x120] sm:$0xff] %v1424_v50  ;;  %1427 = vst [vmem:[%s2019_s15 + $0x128] sm:$0xff] %v1426_v51  ;;  %v1430_v53 = vld [vmem:[%s2023_s20 + $0x138] sm:$0xff]  ;;  %v1432_v54 = vld [vmem:[%s2023_s20 + $0x140] sm:$0xff] }
 0x1a9   : >> { %1429 = vst [vmem:[%s2019_s15 + $0x130] sm:$0xff] %v1428_v52  ;;  %v1434_v55 = vld [vmem:[%s2023_s20 + $0x148] sm:$0xff]  ;;  %1431 = vst [vmem:[%s2019_s15 + $0x138] sm:$0xff] %v1430_v53  ;;  %v1436_v56 = vld [vmem:[%s2023_s20 + $0x150] sm:$0xff] }
 0x1aa   : >> { %1433 = vst [vmem:[%s2019_s15 + $0x140] sm:$0xff] %v1432_v54  ;;  %1435 = vst [vmem:[%s2019_s15 + $0x148] sm:$0xff] %v1434_v55  ;;  %v1438_v57 = vld [vmem:[%s2023_s20 + $0x158] sm:$0xff]  ;;  %v1440_v58 = vld [vmem:[%s2023_s20 + $0x160] sm:$0xff] }
 0x1ab   : >> { %1437 = vst [vmem:[%s2019_s15 + $0x150] sm:$0xff] %v1436_v56  ;;  %1439 = vst [vmem:[%s2019_s15 + $0x158] sm:$0xff] %v1438_v57  ;;  %v1442_v59 = vld [vmem:[%s2023_s20 + $0x168] sm:$0xff]  ;;  %v1444_v60 = vld [vmem:[%s2023_s20 + $0x170] sm:$0xff] }
 0x1ac   : >> { %1441 = vst [vmem:[%s2019_s15 + $0x160] sm:$0xff] %v1440_v58  ;;  %v1446_v61 = vld [vmem:[%s2023_s20 + $0x178] sm:$0xff]  ;;  %1443 = vst [vmem:[%s2019_s15 + $0x168] sm:$0xff] %v1442_v59  ;;  %v1448_v62 = vld [vmem:[%s2023_s20 + $0x180] sm:$0xff] }
 0x1ad   : >> { %1445 = vst [vmem:[%s2019_s15 + $0x170] sm:$0xff] %v1444_v60  ;;  %1447 = vst [vmem:[%s2019_s15 + $0x178] sm:$0xff] %v1446_v61  ;;  %v1450_v63 = vld [vmem:[%s2023_s20 + $0x188] sm:$0xff]  ;;  %v1452_v0 = vld [vmem:[%s2023_s20 + $0x190] sm:$0xff] }
 0x1ae   : >> { %1449 = vst [vmem:[%s2019_s15 + $0x180] sm:$0xff] %v1448_v62  ;;  %1451 = vst [vmem:[%s2019_s15 + $0x188] sm:$0xff] %v1450_v63  ;;  %v1454_v1 = vld [vmem:[%s2023_s20 + $0x198] sm:$0xff]  ;;  %v1456_v2 = vld [vmem:[%s2023_s20 + $0x1a0] sm:$0xff] }
 0x1af   : >> { %1453 = vst [vmem:[%s2019_s15 + $0x190] sm:$0xff] %v1452_v0  ;;  %v1458_v3 = vld [vmem:[%s2023_s20 + $0x1a8] sm:$0xff]  ;;  %1455 = vst [vmem:[%s2019_s15 + $0x198] sm:$0xff] %v1454_v1  ;;  %v1460_v4 = vld [vmem:[%s2023_s20 + $0x1b0] sm:$0xff]  ;;  %1348 = sbr.rel (!%p1345_p12) target bundleno = 405 (0x195), region = 122 }
 0x1b0   : >> { %1457 = vst [vmem:[%s2019_s15 + $0x1a0] sm:$0xff] %v1456_v2  ;;  %1459 = vst [vmem:[%s2019_s15 + $0x1a8] sm:$0xff] %v1458_v3  ;;  %v1462_v5 = vld [vmem:[%s2023_s20 + $0x1b8] sm:$0xff]  ;;  %v1464_v6 = vld [vmem:[%s2023_s20 + $0x1c0] sm:$0xff] }
 0x1b1   : >> { %1461 = vst [vmem:[%s2019_s15 + $0x1b0] sm:$0xff] %v1460_v4  ;;  %1463 = vst [vmem:[%s2019_s15 + $0x1b8] sm:$0xff] %v1462_v5  ;;  %v1466_v7 = vld [vmem:[%s2023_s20 + $0x1c8] sm:$0xff]  ;;  %v1468_v8 = vld [vmem:[%s2023_s20 + $0x1d0] sm:$0xff] }
 0x1b2   : >> { %1465 = vst [vmem:[%s2019_s15 + $0x1c0] sm:$0xff] %v1464_v6  ;;  %v1470_v9 = vld [vmem:[%s2023_s20 + $0x1d8] sm:$0xff]  ;;  %1467 = vst [vmem:[%s2019_s15 + $0x1c8] sm:$0xff] %v1466_v7  ;;  %v1472_v11 = vld [vmem:[%s2023_s20 + $0x1e0] sm:$0xff] }
 0x1b3   : >> { %1469 = vst [vmem:[%s2019_s15 + $0x1d0] sm:$0xff] %v1468_v8  ;;  %1471 = vst [vmem:[%s2019_s15 + $0x1d8] sm:$0xff] %v1470_v9  ;;  %v1474_v12 = vld [vmem:[%s2023_s20 + $0x1e8] sm:$0xff]  ;;  %v1476_v13 = vld [vmem:[%s2023_s20 + $0x1f0] sm:$0xff] }
 0x1b4   : >> { %1473 = vst [vmem:[%s2019_s15 + $0x1e0] sm:$0xff] %v1472_v11  ;;  %1475 = vst [vmem:[%s2019_s15 + $0x1e8] sm:$0xff] %v1474_v12  ;;  %v1478_v14 = vld [vmem:[%s2023_s20 + $0x1f8] sm:$0xff]  ;;  %s2646_s20 = smov %s2512_s14 }
 0x1b5   : >> { %1477 = vst [vmem:[%s2019_s15 + $0x1f0] sm:$0xff] %v1476_v13  ;;  %1479 = vst [vmem:[%s2019_s15 + $0x1f8] sm:$0xff] %v1478_v14  ;;  %s2645_s15 = smov %s2515_s17 }
 0x1b6 PF: > { %s2620_s18 = sand.u32 63, %s2652_s29   ;;  %s1747_s21 = sshll.u32 %s2445_s8, 9 }
 0x1b7   : > { %s1491_s22 = scalar_lea.vmem %s2242_s12, %s1747_s21 [#allocation2]   ;;  %s1493_s24 = scalar_lea.vmem %s2439_s6, %s1747_s21  }
 0x1b8   : > { %p1740_p13 = scmp.le.s32.totalorder %s2620_s18, 0 }
 0x1b9   : > { %s2033_s25 = smov (!%p1740_p13), %s1493_s24   ;;  %s2037_s26 = smov (!%p1740_p13), %s1491_s22  }
 0x1ba   : > { %1584 = sbr.rel (%p1740_p13) target bundleno = 459 (0x1cb), region = 127  ;;  %s2041_s27 = smov (!%p1740_p13), 0  }
 0x1bb   : > { %s2045_s28 = smov (!%p1740_p13), 0  }
 0x1c1 LB: >> { %v1503_v10 = vld [vmem:[%s2039_s26] sm:$0xff]  ;;  %s1505_s29 = sadd.s32 1, %s2043_s27  ;;  %s1497_s28 = sadd.s32 1, %s2047_s28   ;;  %s2047_s28 = sphi %s2045_s28, %s1497_s28   ;;  %s2043_s27 = sphi %s2041_s27, %s2042_s27   ;;  %s2039_s26 = sphi %s2037_s26, %s1510_s26   ;;  %s2035_s25 = sphi %s2033_s25, %s1511_s25  }
 0x1c2   : >> { %1504 = vst [vmem:[%s2035_s25] sm:$0xff] %v1503_v10  ;;  %p1506_p0 = scmp.ge.s32.totalorder %s1505_s29, %s2620_s18  ;;  %p1496_p1 = scmp.ge.s32.totalorder %s1497_s28, %s2620_s18 }
 0x1c4   : >> { %s2656_s29 = smov (%p1506_p0, %s1505_s29), 0  ;;  %1499 = sbr.rel (!%p1496_p1) target bundleno = 449 (0x1c1), region = 133 }
 0x1c5   : >> { %s1741_s12 = sshll.u32 %s2656_s29, 3  ;;  %s2042_s27 = smov %s2656_s29  }
 0x1c6   : >> { %s1510_s26 = scalar_lea.vmem %s1491_s22, %s1741_s12 [#allocation2]   ;;  %s1511_s25 = scalar_lea.vmem %s1493_s24, %s1741_s12  }
 0x1cb PF: > { %p10_p2 = scmp.ge.s32.totalorder %s2085_s16, 5   ;;  %s2648_s12 = smov %s2011_s13 }
 0x1cc   : > { %s2649_s13 = smov %s2093_s19  ;;  %s2650_s14 = smov %s2085_s16 }
 0x1cd   :  { %12 = sbr.rel (!%p10_p2) target bundleno = 2 (0x2), region = 144 }

// kernel: _lambda_.11
= control target key start
LH: loop header
LB: loop body
LE: loop exit
PB: predicated region body
PF: predicated region fallthrough
CT: control target
= control target key end

     0   :  { %vm158_vm0 = vcmask 392192   ;;  %vm400_vm1 = vcmask 261120   ;;  %s813_s1 = inlined_call_operand.vmem [shape: bf16[48,32], index: 1, kind: input, shape index: {}]   ;;  %s814_s0 = inlined_call_operand.vmem [shape: bf16[256,48], index: 0, kind: input, shape index: {}]   ;;  %s815_s2 = inlined_call_operand.vmem [shape: f32[1,32], index: 2, kind: input, shape index: {}]   ;;  %s816_s3 = inlined_call_operand.vmem [shape: f32[256,32], index: 3, kind: output, shape index: {}]  }
   0x1   :  { %v536_v0 = vld [vmem:[%s813_s1] sm:$0xff]   ;;  %v537_v1 = vld [vmem:[%s813_s1 + $0x8] sm:$0xff]   ;;  %v538_v2 = vld [vmem:[%s813_s1 + $0x10] sm:$0xff]  }
   0x2   :  { %492 = vmatprep.subr.bf16.mxu0 %v536_v0  ;;  %530 = vmatprep.subr.bf16.mxu1 %v536_v0  ;;  %v539_v3 = vld [vmem:[%s814_s0] sm:$0xff]   ;;  %v541_v5 = vld [vmem:[%s814_s0 + $0x8] sm:$0xff]   ;;  %v543_v7 = vld [vmem:[%s814_s0 + $0x10] sm:$0xff]  }
   0x3   :  { %493 = vmatpush3.bf16.msra.mxu0 %v536_v0  ;;  %533 = vmatpush3.bf16.msra.mxu1 %v536_v0  ;;  %v540_v4 = vld [vmem:[%s814_s0 + $0x40] sm:$0xff]   ;;  %v542_v6 = vld [vmem:[%s814_s0 + $0x48] sm:$0xff]   ;;  %v544_v8 = vld [vmem:[%s814_s0 + $0x50] sm:$0xff]  }
   0x4   :  { %494 = vmatprep.subr.bf16.mxu0 %v537_v1  ;;  %531 = vmatprep.subr.bf16.mxu1 %v537_v1  ;;  %v545_v9 = vld [vmem:[%s814_s0 + $0x18] sm:$0xff]   ;;  %v547_v11 = vld [vmem:[%s814_s0 + $0x20] sm:$0xff]   ;;  %v549_v13 = vld [vmem:[%s814_s0 + $0x28] sm:$0xff]  }
   0x5   :  { %498 = vmatprep.mubr.msk.bf16.mxu0 %vm158_vm0, %v539_v3  ;;  %514 = vmatprep.mubr.msk.bf16.mxu1 %vm158_vm0, %v540_v4  ;;  %v546_v10 = vld [vmem:[%s814_s0 + $0x58] sm:$0xff]   ;;  %v548_v12 = vld [vmem:[%s814_s0 + $0x60] sm:$0xff]   ;;  %v550_v14 = vld [vmem:[%s814_s0 + $0x68] sm:$0xff]  }
   0x6   :  { %v551_v15 = vld [vmem:[%s814_s0 + $0x30] sm:$0xff]   ;;  %v553_v17 = vld [vmem:[%s814_s0 + $0x38] sm:$0xff]   ;;  %v651_v19 = vld [vmem:[%s815_s2] ss:$0 sm:$0xff] }
   0x7   :  { %495 = vmatpush3.bf16.msra.mxu0 %v537_v1  ;;  %534 = vmatpush3.bf16.msra.mxu1 %v537_v1  ;;  %v552_v16 = vld [vmem:[%s814_s0 + $0x70] sm:$0xff]   ;;  %v554_v18 = vld [vmem:[%s814_s0 + $0x78] sm:$0xff]  }
   0x8   :  { %496 = vmatprep.subr.bf16.mxu0 %v538_v2  ;;  %532 = vmatprep.subr.bf16.mxu1 %v538_v2 }
   0xb   :  { %497 = vmatpush3.bf16.msra.mxu0 %v538_v2  ;;  %535 = vmatpush3.bf16.msra.mxu1 %v538_v2 }
   0xe   :  { %499 = vmatmul.mubr.msk.bf16.vlgmr.msra.gmra.mrb[0].mxu0 %vm158_vm0, %v541_v5  ;;  %515 = vmatmul.mubr.msk.bf16.vlgmr.msra.gmra.mrb[0].mxu1 %vm158_vm0, %v542_v6 }
   0xf   :  { %502 = vmatprep.mubr.msk.bf16.mxu0 %vm158_vm0, %v543_v7  ;;  %518 = vmatprep.mubr.msk.bf16.mxu1 %vm158_vm0, %v544_v8 }
  0x16   :  { %503 = vmatmul.mubr.msk.bf16.gmra.mrb[4].mxu0 %vm158_vm0, %v545_v9  ;;  %519 = vmatmul.mubr.msk.bf16.gmra.mrb[4].mxu1 %vm158_vm0, %v546_v10 }
  0x17   :  { %506 = vmatprep.mubr.msk.bf16.mxu0 %vm158_vm0, %v547_v11  ;;  %522 = vmatprep.mubr.msk.bf16.mxu1 %vm158_vm0, %v548_v12 }
  0x1e   :  { %507 = vmatmul.mubr.msk.bf16.gmra.mrb[8].mxu0 %vm158_vm0, %v549_v13  ;;  %523 = vmatmul.mubr.msk.bf16.gmra.mrb[8].mxu1 %vm158_vm0, %v550_v14 }
  0x1f   :  { %510 = vmatprep.mubr.msk.bf16.mxu0 %vm158_vm0, %v551_v15  ;;  %526 = vmatprep.mubr.msk.bf16.mxu1 %vm158_vm0, %v552_v16 }
  0x26   :  { %511 = vmatmul.mubr.msk.bf16.gmra.mrb[12].mxu0 %vm158_vm0, %v553_v17  ;;  %527 = vmatmul.mubr.msk.bf16.gmra.mrb[12].mxu1 %vm158_vm0, %v554_v18 }
  0xe1   :  { %v500_v20 = vpop.f32.mrb[0].mxu0  ;;  %v516_v21 = vpop.f32.mrb[0].mxu1 }
  0xe2   :  { %v250_v22 = vadd.f32 %v500_v20, %v651_v19  ;;  %v314_v23 = vadd.f32 %v516_v21, %v651_v19  ;;  %v241_v24 = vpop.f32.mrb[1].mxu0  ;;  %v305_v25 = vpop.f32.mrb[1].mxu1 }
  0xe3   :  { %v242_v26 = vadd.f32 %v651_v19, %v241_v24  ;;  %v306_v27 = vadd.f32 %v651_v19, %v305_v25  ;;  %v501_v28 = vpop.f32.mrb[2].mxu0  ;;  %v517_v29 = vpop.f32.mrb[2].mxu1 }
  0xe4   :  { %v370_v30 = vmax.f32 %v250_v22, 0.0  ;;  %v386_v31 = vmax.f32 %v314_v23, 0.0  ;;  %v253_v32 = vadd.f32 %v501_v28, %v651_v19  ;;  %v317_v33 = vadd.f32 %v517_v29, %v651_v19  ;;  %v244_v34 = vpop.f32.mrb[3].mxu0  ;;  %v308_v35 = vpop.f32.mrb[3].mxu1 }
  0xe5   :  { %v368_v36 = vmax.f32 %v242_v26, 0.0  ;;  %v384_v37 = vmax.f32 %v306_v27, 0.0  ;;  %v245_v38 = vadd.f32 %v651_v19, %v244_v34  ;;  %v309_v39 = vadd.f32 %v651_v19, %v308_v35 }
  0xe6   :  { %403 = vst.msk [vmem:[%s816_s3 + $0x10] sm:$0xff] %vm400_vm1, %v370_v30  ;;  %419 = vst.msk [vmem:[%s816_s3 + $0x90] sm:$0xff] %vm400_vm1, %v386_v31  ;;  %v371_v40 = vmax.f32 %v253_v32, 0.0  ;;  %v387_v41 = vmax.f32 %v317_v33, 0.0 }
  0xe7   :  { %401 = vst.msk [vmem:[%s816_s3] sm:$0xff] %vm400_vm1, %v368_v36  ;;  %417 = vst.msk [vmem:[%s816_s3 + $0x80] sm:$0xff] %vm400_vm1, %v384_v37  ;;  %v369_v42 = vmax.f32 %v245_v38, 0.0  ;;  %v385_v43 = vmax.f32 %v309_v39, 0.0 }
  0xe8   :  { %404 = vst.msk [vmem:[%s816_s3 + $0x18] sm:$0xff] %vm400_vm1, %v371_v40  ;;  %420 = vst.msk [vmem:[%s816_s3 + $0x98] sm:$0xff] %vm400_vm1, %v387_v41 }
  0xe9   :  { %402 = vst.msk [vmem:[%s816_s3 + $0x8] sm:$0xff] %vm400_vm1, %v369_v42  ;;  %418 = vst.msk [vmem:[%s816_s3 + $0x88] sm:$0xff] %vm400_vm1, %v385_v43  ;;  %v504_v44 = vpop.f32.mrb[4].mxu0  ;;  %v520_v45 = vpop.f32.mrb[4].mxu1 }
  0xea   :  { %v266_v46 = vadd.f32 %v504_v44, %v651_v19  ;;  %v330_v47 = vadd.f32 %v520_v45, %v651_v19  ;;  %v257_v48 = vpop.f32.mrb[5].mxu0  ;;  %v321_v49 = vpop.f32.mrb[5].mxu1 }
  0xeb   :  { %v258_v50 = vadd.f32 %v651_v19, %v257_v48  ;;  %v322_v51 = vadd.f32 %v651_v19, %v321_v49  ;;  %v505_v52 = vpop.f32.mrb[6].mxu0  ;;  %v521_v53 = vpop.f32.mrb[6].mxu1 }
  0xec   :  { %v374_v54 = vmax.f32 %v266_v46, 0.0  ;;  %v390_v55 = vmax.f32 %v330_v47, 0.0  ;;  %v269_v56 = vadd.f32 %v505_v52, %v651_v19  ;;  %v333_v57 = vadd.f32 %v521_v53, %v651_v19  ;;  %v260_v58 = vpop.f32.mrb[7].mxu0  ;;  %v324_v59 = vpop.f32.mrb[7].mxu1 }
  0xed   :  { %v372_v60 = vmax.f32 %v258_v50, 0.0  ;;  %v388_v61 = vmax.f32 %v322_v51, 0.0  ;;  %v261_v62 = vadd.f32 %v651_v19, %v260_v58  ;;  %v325_v63 = vadd.f32 %v651_v19, %v324_v59 }
  0xee   :  { %407 = vst.msk [vmem:[%s816_s3 + $0x30] sm:$0xff] %vm400_vm1, %v374_v54  ;;  %423 = vst.msk [vmem:[%s816_s3 + $0xb0] sm:$0xff] %vm400_vm1, %v390_v55  ;;  %v375_v0 = vmax.f32 %v269_v56, 0.0  ;;  %v391_v1 = vmax.f32 %v333_v57, 0.0 }
  0xef   :  { %405 = vst.msk [vmem:[%s816_s3 + $0x20] sm:$0xff] %vm400_vm1, %v372_v60  ;;  %421 = vst.msk [vmem:[%s816_s3 + $0xa0] sm:$0xff] %vm400_vm1, %v388_v61  ;;  %v373_v2 = vmax.f32 %v261_v62, 0.0  ;;  %v389_v3 = vmax.f32 %v325_v63, 0.0 }
  0xf0   :  { %408 = vst.msk [vmem:[%s816_s3 + $0x38] sm:$0xff] %vm400_vm1, %v375_v0  ;;  %424 = vst.msk [vmem:[%s816_s3 + $0xb8] sm:$0xff] %vm400_vm1, %v391_v1 }
  0xf1   :  { %406 = vst.msk [vmem:[%s816_s3 + $0x28] sm:$0xff] %vm400_vm1, %v373_v2  ;;  %422 = vst.msk [vmem:[%s816_s3 + $0xa8] sm:$0xff] %vm400_vm1, %v389_v3  ;;  %v508_v4 = vpop.f32.mrb[8].mxu0  ;;  %v524_v5 = vpop.f32.mrb[8].mxu1 }
  0xf2   :  { %v282_v6 = vadd.f32 %v508_v4, %v651_v19  ;;  %v346_v7 = vadd.f32 %v524_v5, %v651_v19  ;;  %v273_v8 = vpop.f32.mrb[9].mxu0  ;;  %v337_v9 = vpop.f32.mrb[9].mxu1 }
  0xf3   :  { %v274_v10 = vadd.f32 %v651_v19, %v273_v8  ;;  %v338_v11 = vadd.f32 %v651_v19, %v337_v9  ;;  %v509_v12 = vpop.f32.mrb[10].mxu0  ;;  %v525_v13 = vpop.f32.mrb[10].mxu1 }
  0xf4   :  { %v378_v14 = vmax.f32 %v282_v6, 0.0  ;;  %v394_v15 = vmax.f32 %v346_v7, 0.0  ;;  %v285_v16 = vadd.f32 %v509_v12, %v651_v19  ;;  %v349_v17 = vadd.f32 %v525_v13, %v651_v19  ;;  %v276_v18 = vpop.f32.mrb[11].mxu0  ;;  %v340_v20 = vpop.f32.mrb[11].mxu1 }
  0xf5   :  { %v376_v21 = vmax.f32 %v274_v10, 0.0  ;;  %v392_v22 = vmax.f32 %v338_v11, 0.0  ;;  %v277_v23 = vadd.f32 %v651_v19, %v276_v18  ;;  %v341_v24 = vadd.f32 %v651_v19, %v340_v20 }
  0xf6   :  { %411 = vst.msk [vmem:[%s816_s3 + $0x50] sm:$0xff] %vm400_vm1, %v378_v14  ;;  %427 = vst.msk [vmem:[%s816_s3 + $0xd0] sm:$0xff] %vm400_vm1, %v394_v15  ;;  %v379_v25 = vmax.f32 %v285_v16, 0.0  ;;  %v395_v26 = vmax.f32 %v349_v17, 0.0 }
  0xf7   :  { %409 = vst.msk [vmem:[%s816_s3 + $0x40] sm:$0xff] %vm400_vm1, %v376_v21  ;;  %425 = vst.msk [vmem:[%s816_s3 + $0xc0] sm:$0xff] %vm400_vm1, %v392_v22  ;;  %v377_v27 = vmax.f32 %v277_v23, 0.0  ;;  %v393_v28 = vmax.f32 %v341_v24, 0.0 }
  0xf8   :  { %412 = vst.msk [vmem:[%s816_s3 + $0x58] sm:$0xff] %vm400_vm1, %v379_v25  ;;  %428 = vst.msk [vmem:[%s816_s3 + $0xd8] sm:$0xff] %vm400_vm1, %v395_v26 }
  0xf9   :  { %410 = vst.msk [vmem:[%s816_s3 + $0x48] sm:$0xff] %vm400_vm1, %v377_v27  ;;  %426 = vst.msk [vmem:[%s816_s3 + $0xc8] sm:$0xff] %vm400_vm1, %v393_v28  ;;  %v512_v29 = vpop.f32.mrb[12].mxu0  ;;  %v528_v30 = vpop.f32.mrb[12].mxu1 }
  0xfa   :  { %v298_v31 = vadd.f32 %v512_v29, %v651_v19  ;;  %v362_v32 = vadd.f32 %v528_v30, %v651_v19  ;;  %v289_v33 = vpop.f32.mrb[13].mxu0  ;;  %v353_v34 = vpop.f32.mrb[13].mxu1 }
  0xfb   :  { %v290_v35 = vadd.f32 %v651_v19, %v289_v33  ;;  %v354_v36 = vadd.f32 %v651_v19, %v353_v34  ;;  %v513_v37 = vpop.f32.mrb[14].mxu0  ;;  %v529_v38 = vpop.f32.mrb[14].mxu1 }
  0xfc   :  { %v382_v39 = vmax.f32 %v298_v31, 0.0  ;;  %v398_v40 = vmax.f32 %v362_v32, 0.0  ;;  %v301_v41 = vadd.f32 %v513_v37, %v651_v19  ;;  %v365_v42 = vadd.f32 %v529_v38, %v651_v19  ;;  %v292_v43 = vpop.f32.mrb[15].mxu0  ;;  %v356_v44 = vpop.f32.mrb[15].mxu1 }
  0xfd   :  { %v380_v45 = vmax.f32 %v290_v35, 0.0  ;;  %v396_v46 = vmax.f32 %v354_v36, 0.0  ;;  %v293_v47 = vadd.f32 %v651_v19, %v292_v43  ;;  %v357_v48 = vadd.f32 %v651_v19, %v356_v44 }
  0xfe   :  { %415 = vst.msk [vmem:[%s816_s3 + $0x70] sm:$0xff] %vm400_vm1, %v382_v39  ;;  %431 = vst.msk [vmem:[%s816_s3 + $0xf0] sm:$0xff] %vm400_vm1, %v398_v40  ;;  %v383_v49 = vmax.f32 %v301_v41, 0.0  ;;  %v399_v50 = vmax.f32 %v365_v42, 0.0 }
  0xff   :  { %413 = vst.msk [vmem:[%s816_s3 + $0x60] sm:$0xff] %vm400_vm1, %v380_v45  ;;  %429 = vst.msk [vmem:[%s816_s3 + $0xe0] sm:$0xff] %vm400_vm1, %v396_v46  ;;  %v381_v19 = vmax.f32 %v293_v47, 0.0  ;;  %v397_v51 = vmax.f32 %v357_v48, 0.0 }
 0x100   :  { %416 = vst.msk [vmem:[%s816_s3 + $0x78] sm:$0xff] %vm400_vm1, %v383_v49  ;;  %432 = vst.msk [vmem:[%s816_s3 + $0xf8] sm:$0xff] %vm400_vm1, %v399_v50 }
 0x101   :  { %414 = vst.msk [vmem:[%s816_s3 + $0x68] sm:$0xff] %vm400_vm1, %v381_v19  ;;  %430 = vst.msk [vmem:[%s816_s3 + $0xe8] sm:$0xff] %vm400_vm1, %v397_v51 }

// kernel: _lambda_.12
= control target key start
LH: loop header
LB: loop body
LE: loop exit
PB: predicated region body
PF: predicated region fallthrough
CT: control target
= control target key end

     0   :  { %vm470_vm0 = vcmask 261120   ;;  %vm873_vm1 = vcmask 785408   ;;  %s1686_s1 = inlined_call_operand.vmem [shape: bf16[288,96], index: 1, kind: input, shape index: {}]   ;;  %s1687_s0 = inlined_call_operand.vmem [shape: bf16[256,288], index: 0, kind: input, shape index: {}]   ;;  %s1688_s2 = inlined_call_operand.vmem [shape: f32[1,96], index: 2, kind: input, shape index: {}]   ;;  %s1689_s3 = inlined_call_operand.vmem [shape: f32[256,96], index: 3, kind: output, shape index: {}]  }
   0x1   :  { %v1175_v0 = vld [vmem:[%s1686_s1 + $0x40] sm:$0xff]   ;;  %v1177_v2 = vld [vmem:[%s1686_s1 + $0x48] sm:$0xff]   ;;  %v1179_v4 = vld [vmem:[%s1686_s1 + $0x50] sm:$0xff]  }
   0x2   :  { %v1176_v1 = vld [vmem:[%s1686_s1] sm:$0xff]   ;;  %993 = vmatprep.subr.bf16.mxu0 %v1175_v0  ;;  %1159 = vmatprep.subr.bf16.mxu1 %v1175_v0  ;;  %v1178_v3 = vld [vmem:[%s1686_s1 + $0x8] sm:$0xff]   ;;  %v1180_v5 = vld [vmem:[%s1686_s1 + $0x10] sm:$0xff]  }
   0x3   :  { %994 = vmatpush3.bf16.msra.mxu0 %v1176_v1  ;;  %1167 = vmatpush3.bf16.msra.mxu1 %v1176_v1  ;;  %v1181_v6 = vld [vmem:[%s1686_s1 + $0x58] sm:$0xff]   ;;  %v1183_v8 = vld [vmem:[%s1686_s1 + $0x60] sm:$0xff]   ;;  %v1185_v10 = vld [vmem:[%s1686_s1 + $0x68] sm:$0xff]  }
   0x4   :  { %995 = vmatprep.subr.bf16.mxu0 %v1177_v2  ;;  %1160 = vmatprep.subr.bf16.mxu1 %v1177_v2  ;;  %v1182_v7 = vld [vmem:[%s1686_s1 + $0x18] sm:$0xff]   ;;  %v1184_v9 = vld [vmem:[%s1686_s1 + $0x20] sm:$0xff]   ;;  %v1186_v13 = vld [vmem:[%s1686_s1 + $0x28] sm:$0xff]  }
   0x5   :  { %v1193_v11 = vld [vmem:[%s1687_s0 + $0x4] ss:$12 sps:$4 sm:$0xff]   ;;  %v1189_v16 = vld [vmem:[%s1686_s1 + $0x78] sm:$0xff]   ;;  %v1191_v19 = vld [vmem:[%s1687_s0] ss:$12 sps:$4 sm:$0xff]  }
   0x6   :  { %v1196_v12 = vld [vmem:[%s1687_s0 + $0x124] ss:$12 sps:$4 sm:$0xff]   ;;  %551 = vmatprep.mubr.bf16.mxu0 %v1193_v11  ;;  %v1190_v17 = vld [vmem:[%s1686_s1 + $0x38] sm:$0xff]   ;;  %v1194_v20 = vld [vmem:[%s1687_s0 + $0x120] ss:$12 sps:$4 sm:$0xff]  }
   0x7   :  { %996 = vmatpush3.bf16.msra.mxu0 %v1178_v3  ;;  %1168 = vmatpush3.bf16.msra.mxu1 %v1178_v3  ;;  %v1187_v14 = vld [vmem:[%s1686_s1 + $0x70] sm:$0xff]   ;;  %v1197_v18 = vld [vmem:[%s1686_s1 + $0x80] sm:$0xff]   ;;  %v1198_v21 = vld [vmem:[%s1687_s0 + $0x1c] ss:$12 sps:$4 sm:$0xff]  }
   0x8   :  { %997 = vmatprep.subr.bf16.mxu0 %v1179_v4  ;;  %1161 = vmatprep.subr.bf16.mxu1 %v1179_v4  ;;  %v1188_v15 = vld [vmem:[%s1686_s1 + $0x30] sm:$0xff]   ;;  %v1200_v22 = vld [vmem:[%s1687_s0 + $0x13c] ss:$12 sps:$4 sm:$0xff]   ;;  %v1202_v24 = vld [vmem:[%s1687_s0 + $0x18] ss:$12 sps:$4 sm:$0xff]  }
   0x9   :  { %647 = vmatprep.mubr.bf16.mxu1 %v1196_v12  ;;  %v1210_v23 = vld [vmem:[%s1686_s1 + $0x88] sm:$0xff]   ;;  %v1203_v25 = vld [vmem:[%s1687_s0 + $0x138] ss:$12 sps:$4 sm:$0xff]   ;;  %v1204_v26 = vld [vmem:[%s1687_s0 + $0x34] ss:$12 sps:$4 sm:$0xff]  }
   0xa   :  { %v1206_v27 = vld [vmem:[%s1687_s0 + $0x154] ss:$12 sps:$4 sm:$0xff]   ;;  %v1208_v28 = vld [vmem:[%s1687_s0 + $0x30] ss:$12 sps:$4 sm:$0xff]   ;;  %v1211_v30 = vld [vmem:[%s1687_s0 + $0x4c] ss:$12 sps:$4 sm:$0xff]  }
   0xb   :  { %998 = vmatpush3.bf16.msra.mxu0 %v1180_v5  ;;  %1169 = vmatpush3.bf16.msra.mxu1 %v1180_v5  ;;  %v1209_v29 = vld [vmem:[%s1687_s0 + $0x150] ss:$12 sps:$4 sm:$0xff]   ;;  %v1213_v31 = vld [vmem:[%s1687_s0 + $0x16c] ss:$12 sps:$4 sm:$0xff]   ;;  %v1215_v32 = vld [vmem:[%s1687_s0 + $0x48] ss:$12 sps:$4 sm:$0xff]  }
   0xc   :  { %999 = vmatprep.subr.bf16.mxu0 %v1181_v6  ;;  %1162 = vmatprep.subr.bf16.mxu1 %v1181_v6  ;;  %v1216_v33 = vld [vmem:[%s1687_s0 + $0x168] ss:$12 sps:$4 sm:$0xff]   ;;  %v1217_v34 = vld [vmem:[%s1687_s0 + $0x64] ss:$12 sps:$4 sm:$0xff]   ;;  %v1220_v36 = vld [vmem:[%s1687_s0 + $0x60] ss:$12 sps:$4 sm:$0xff]  }
   0xd   :  { %v1219_v35 = vld [vmem:[%s1687_s0 + $0x8] ss:$12 sps:$4 sm:$0xff]   ;;  %v1221_v37 = vld [vmem:[%s1687_s0 + $0x20] ss:$12 sps:$4 sm:$0xff]   ;;  %v1224_v39 = vld [vmem:[%s1687_s0 + $0x38] ss:$12 sps:$4 sm:$0xff]  }
   0xe   :  { %v1222_v38 = vld [vmem:[%s1687_s0 + $0x7c] ss:$12 sps:$4 sm:$0xff]   ;;  %v1225_v40 = vld [vmem:[%s1687_s0 + $0x78] ss:$12 sps:$4 sm:$0xff]   ;;  %v1227_v42 = vld [vmem:[%s1687_s0 + $0x94] ss:$12 sps:$4 sm:$0xff]  }
   0xf   :  { %1000 = vmatpush3.bf16.msra.mxu0 %v1182_v7  ;;  %1170 = vmatpush3.bf16.msra.mxu1 %v1182_v7  ;;  %v1226_v41 = vld [vmem:[%s1687_s0 + $0x50] ss:$12 sps:$4 sm:$0xff]   ;;  %v1229_v43 = vld [vmem:[%s1687_s0 + $0x68] ss:$12 sps:$4 sm:$0xff]   ;;  %v1231_v45 = vld [vmem:[%s1687_s0 + $0x80] ss:$12 sps:$4 sm:$0xff]  }
  0x10   :  { %1001 = vmatprep.subr.bf16.mxu0 %v1183_v8  ;;  %1163 = vmatprep.subr.bf16.mxu1 %v1183_v8  ;;  %v1230_v44 = vld [vmem:[%s1687_s0 + $0x90] ss:$12 sps:$4 sm:$0xff]   ;;  %v1232_v46 = vld [vmem:[%s1687_s0 + $0xac] ss:$12 sps:$4 sm:$0xff]   ;;  %v1235_v48 = vld [vmem:[%s1687_s0 + $0xa8] ss:$12 sps:$4 sm:$0xff]  }
  0x11   :  { %v1234_v47 = vld [vmem:[%s1687_s0 + $0x98] ss:$12 sps:$4 sm:$0xff]   ;;  %v1236_v49 = vld [vmem:[%s1687_s0 + $0xb0] ss:$12 sps:$4 sm:$0xff]   ;;  %v1239_v51 = vld [vmem:[%s1687_s0 + $0xc8] ss:$12 sps:$4 sm:$0xff]  }
  0x12   :  { %v1237_v50 = vld [vmem:[%s1687_s0 + $0xc4] ss:$12 sps:$4 sm:$0xff]   ;;  %v1240_v52 = vld [vmem:[%s1687_s0 + $0xc0] ss:$12 sps:$4 sm:$0xff]   ;;  %v1242_v54 = vld [vmem:[%s1687_s0 + $0xdc] ss:$12 sps:$4 sm:$0xff]  }
  0x13   :  { %1002 = vmatpush3.bf16.msra.mxu0 %v1184_v9  ;;  %1171 = vmatpush3.bf16.msra.mxu1 %v1184_v9  ;;  %v1241_v53 = vld [vmem:[%s1687_s0 + $0xe0] ss:$12 sps:$4 sm:$0xff]   ;;  %v1244_v55 = vld [vmem:[%s1687_s0 + $0xf8] ss:$12 sps:$4 sm:$0xff]   ;;  %v1246_v57 = vld [vmem:[%s1687_s0 + $0x110] ss:$12 sps:$4 sm:$0xff]  }
  0x14   :  { %1003 = vmatprep.subr.bf16.mxu0 %v1185_v10  ;;  %1164 = vmatprep.subr.bf16.mxu1 %v1185_v10  ;;  %v1245_v56 = vld [vmem:[%s1687_s0 + $0xd8] ss:$12 sps:$4 sm:$0xff]   ;;  %v1247_v58 = vld [vmem:[%s1687_s0 + $0xf4] ss:$12 sps:$4 sm:$0xff]   ;;  %v1250_v60 = vld [vmem:[%s1687_s0 + $0xf0] ss:$12 sps:$4 sm:$0xff]  }
  0x15   :  { %v1249_v59 = vld [vmem:[%s1687_s0 + $0x128] ss:$12 sps:$4 sm:$0xff]   ;;  %v1251_v61 = vld [vmem:[%s1687_s0 + $0x140] ss:$12 sps:$4 sm:$0xff]   ;;  %v1254_v63 = vld [vmem:[%s1687_s0 + $0x158] ss:$12 sps:$4 sm:$0xff]  }
  0x16   :  { %v1252_v62 = vld [vmem:[%s1687_s0 + $0x10c] ss:$12 sps:$4 sm:$0xff]   ;;  %v1255_v0 = vld [vmem:[%s1687_s0 + $0x108] ss:$12 sps:$4 sm:$0xff]   ;;  %v1256_v1 = vld [vmem:[%s1687_s0 + $0x170] ss:$12 sps:$4 sm:$0xff]  }
  0x17   :  { %1004 = vmatpush3.bf16.msra.mxu0 %v1186_v13  ;;  %1172 = vmatpush3.bf16.msra.mxu1 %v1186_v13 }
  0x18   :  { %1005 = vmatprep.subr.bf16.mxu0 %v1187_v14  ;;  %1165 = vmatprep.subr.bf16.mxu1 %v1187_v14 }
  0x1b   :  { %1006 = vmatpush3.bf16.msra.mxu0 %v1188_v15  ;;  %1173 = vmatpush3.bf16.msra.mxu1 %v1188_v15 }
  0x1c   :  { %1007 = vmatprep.subr.bf16.mxu0 %v1189_v16  ;;  %1166 = vmatprep.subr.bf16.mxu1 %v1189_v16 }
  0x1f   :  { %1008 = vmatpush3.bf16.msra.mxu0 %v1190_v17  ;;  %1174 = vmatpush3.bf16.msra.mxu1 %v1190_v17 }
  0x20   :  { %1123 = vmatprep.subr.bf16.mxu1 %v1197_v18 }
  0x22   :  { %552 = vmatmul.mubr.bf16.vlgmr.msra.gmra.mrb[0].mxu0 %v1191_v19  ;;  %648 = vmatmul.mubr.bf16.vlgmr.msra.gmra.mrb[0].mxu1 %v1194_v20 }
  0x23   :  { %1124 = vmatpush3.bf16.msra.mxu1 %v1197_v18  ;;  %559 = vmatprep.mubr.bf16.mxu0 %v1198_v21 }
  0x24   :  { %655 = vmatprep.mubr.bf16.mxu1 %v1200_v22  ;;  %1125 = vmatprep.subr.bf16.mxu1 %v1210_v23 }
  0x27   :  { %1126 = vmatpush3.bf16.msra.mxu1 %v1210_v23 }
  0x2a   :  { %560 = vmatmul.mubr.bf16.gmra.mrb[4].mxu0 %v1202_v24  ;;  %656 = vmatmul.mubr.bf16.gmra.mrb[4].mxu1 %v1203_v25 }
  0x2b   :  { %567 = vmatprep.mubr.bf16.mxu0 %v1204_v26  ;;  %663 = vmatprep.mubr.bf16.mxu1 %v1206_v27 }
  0x32   :  { %568 = vmatmul.mubr.bf16.gmra.mrb[8].mxu0 %v1208_v28  ;;  %664 = vmatmul.mubr.bf16.gmra.mrb[8].mxu1 %v1209_v29 }
  0x33   :  { %575 = vmatprep.mubr.bf16.mxu0 %v1211_v30  ;;  %671 = vmatprep.mubr.bf16.mxu1 %v1213_v31 }
  0x3a   :  { %576 = vmatmul.mubr.bf16.gmra.mrb[12].mxu0 %v1215_v32  ;;  %672 = vmatmul.mubr.bf16.gmra.mrb[12].mxu1 %v1216_v33 }
  0x3b   :  { %583 = vmatprep.mubr.bf16.mxu0 %v1217_v34  ;;  %1127 = vmatprep.mubr.msk.bf16.mxu1 %vm470_vm0, %v1219_v35 }
  0x42   :  { %584 = vmatmul.mubr.bf16.gmra.mrb[16].mxu0 %v1220_v36  ;;  %1128 = vmatmul.mubr.msk.bf16.vlgmr.msra.gmra.mrb[16].mxu1 %vm470_vm0, %v1221_v37 }
  0x43   :  { %591 = vmatprep.mubr.bf16.mxu0 %v1222_v38  ;;  %1131 = vmatprep.mubr.msk.bf16.mxu1 %vm470_vm0, %v1224_v39 }
  0x4a   :  { %592 = vmatmul.mubr.bf16.gmra.mrb[20].mxu0 %v1225_v40  ;;  %1132 = vmatmul.mubr.msk.bf16.gmra.mrb[20].mxu1 %vm470_vm0, %v1226_v41 }
  0x4b   :  { %599 = vmatprep.mubr.bf16.mxu0 %v1227_v42  ;;  %1135 = vmatprep.mubr.msk.bf16.mxu1 %vm470_vm0, %v1229_v43 }
  0x52   :  { %600 = vmatmul.mubr.bf16.gmra.mrb[24].mxu0 %v1230_v44  ;;  %1136 = vmatmul.mubr.msk.bf16.gmra.mrb[24].mxu1 %vm470_vm0, %v1231_v45 }
  0x53   :  { %607 = vmatprep.mubr.bf16.mxu0 %v1232_v46  ;;  %1139 = vmatprep.mubr.msk.bf16.mxu1 %vm470_vm0, %v1234_v47 }
  0x5a   :  { %608 = vmatmul.mubr.bf16.gmra.mrb[28].mxu0 %v1235_v48  ;;  %1140 = vmatmul.mubr.msk.bf16.gmra.mrb[28].mxu1 %vm470_vm0, %v1236_v49 }
  0x5b   :  { %615 = vmatprep.mubr.bf16.mxu0 %v1237_v50  ;;  %1143 = vmatprep.mubr.msk.bf16.mxu1 %vm470_vm0, %v1239_v51  ;;  %v1510_v50 = vld [vmem:[%s1688_s2] ss:$0 sm:$0xff] }
  0x62   :  { %616 = vmatmul.mubr.bf16.gmra.mrb[32].mxu0 %v1240_v52  ;;  %1144 = vmatmul.mubr.msk.bf16.gmra.mrb[32].mxu1 %vm470_vm0, %v1241_v53 }
  0x63   :  { %623 = vmatprep.mubr.bf16.mxu0 %v1242_v54  ;;  %1147 = vmatprep.mubr.msk.bf16.mxu1 %vm470_vm0, %v1244_v55 }
  0x6a   :  { %624 = vmatmul.mubr.bf16.gmra.mrb[36].mxu0 %v1245_v56  ;;  %1148 = vmatmul.mubr.msk.bf16.gmra.mrb[36].mxu1 %vm470_vm0, %v1246_v57 }
  0x6b   :  { %631 = vmatprep.mubr.bf16.mxu0 %v1247_v58  ;;  %1151 = vmatprep.mubr.msk.bf16.mxu1 %vm470_vm0, %v1249_v59 }
  0x72   :  { %632 = vmatmul.mubr.bf16.gmra.mrb[40].mxu0 %v1250_v60  ;;  %1152 = vmatmul.mubr.msk.bf16.gmra.mrb[40].mxu1 %vm470_vm0, %v1251_v61 }
  0x73   :  { %639 = vmatprep.mubr.bf16.mxu0 %v1252_v62  ;;  %1155 = vmatprep.mubr.msk.bf16.mxu1 %vm470_vm0, %v1254_v63 }
  0x7a   :  { %640 = vmatmul.mubr.bf16.gmra.mrb[44].mxu0 %v1255_v0  ;;  %1156 = vmatmul.mubr.msk.bf16.gmra.mrb[44].mxu1 %vm470_vm0, %v1256_v1 }
  0xf5   :  { %v1009_v2 = vpop.f32.mrb[0].mxu0  ;;  %v1081_v3 = vpop.f32.mrb[0].mxu1 }
  0xf6   :  { %v1010_v4 = vpop.f32.mrb[1].mxu0  ;;  %v1082_v5 = vpop.f32.mrb[1].mxu1 }
  0xf7   :  { %v1011_v6 = vadd.f32 %v1010_v4, %v1009_v2  ;;  %v1012_v7 = vpop.f32.mrb[2].mxu0  ;;  %v1491_v8 = vadd.f32 %v1082_v5, %v1081_v3  ;;  %v1084_v9 = vpop.f32.mrb[2].mxu1 }
  0xf8   :  { %v1013_v10 = vpop.f32.mrb[3].mxu0  ;;  %v1085_v11 = vpop.f32.mrb[3].mxu1 }
  0xf9   :  { %v1014_v12 = vadd.f32 %v1013_v10, %v1012_v7  ;;  %v1493_v13 = vadd.f32 %v1085_v11, %v1084_v9  ;;  %v554_v54 = vadd.f32 %v1011_v6, %v1510_v50 }
  0xfb   :  { %v557_v63 = vadd.f32 %v1014_v12, %v1510_v50 }
  0xfd   :  { %v1015_v14 = vpop.f32.mrb[4].mxu0  ;;  %v1087_v15 = vpop.f32.mrb[4].mxu1 }
  0xfe   :  { %v1016_v16 = vpop.f32.mrb[5].mxu0  ;;  %v1088_v17 = vpop.f32.mrb[5].mxu1 }
  0xff   :  { %v1017_v18 = vadd.f32 %v1016_v16, %v1015_v14  ;;  %v1018_v19 = vpop.f32.mrb[6].mxu0  ;;  %v1495_v20 = vadd.f32 %v1088_v17, %v1087_v15  ;;  %v1090_v21 = vpop.f32.mrb[6].mxu1 }
 0x100   :  { %v1019_v22 = vpop.f32.mrb[7].mxu0  ;;  %v1091_v23 = vpop.f32.mrb[7].mxu1 }
 0x101   :  { %v1020_v24 = vadd.f32 %v1019_v22, %v1018_v19  ;;  %v1497_v25 = vadd.f32 %v1091_v23, %v1090_v21  ;;  %v562_v51 = vadd.f32 %v1017_v18, %v1510_v50 }
 0x103   :  { %v565_v58 = vadd.f32 %v1020_v24, %v1510_v50 }
 0x105   :  { %v1021_v26 = vpop.f32.mrb[8].mxu0  ;;  %v1093_v27 = vpop.f32.mrb[8].mxu1 }
 0x106   :  { %v1022_v28 = vpop.f32.mrb[9].mxu0  ;;  %v1094_v29 = vpop.f32.mrb[9].mxu1 }
 0x107   :  { %v1023_v30 = vadd.f32 %v1022_v28, %v1021_v26  ;;  %v1024_v31 = vpop.f32.mrb[10].mxu0  ;;  %v1499_v32 = vadd.f32 %v1094_v29, %v1093_v27  ;;  %v1096_v33 = vpop.f32.mrb[10].mxu1 }
 0x108   :  { %v1025_v34 = vpop.f32.mrb[11].mxu0  ;;  %v1097_v35 = vpop.f32.mrb[11].mxu1 }
 0x109   :  { %v1026_v36 = vadd.f32 %v1025_v34, %v1024_v31  ;;  %v1501_v37 = vadd.f32 %v1097_v35, %v1096_v33  ;;  %v570_v14 = vadd.f32 %v1023_v30, %v1510_v50 }
 0x10b   :  { %v573_v24 = vadd.f32 %v1026_v36, %v1510_v50 }
 0x10d   :  { %v1027_v38 = vpop.f32.mrb[12].mxu0  ;;  %v1099_v39 = vpop.f32.mrb[12].mxu1 }
 0x10e   :  { %v1028_v40 = vpop.f32.mrb[13].mxu0  ;;  %v1100_v41 = vpop.f32.mrb[13].mxu1 }
 0x10f   :  { %v1029_v42 = vadd.f32 %v1028_v40, %v1027_v38  ;;  %v1030_v43 = vpop.f32.mrb[14].mxu0  ;;  %v1503_v44 = vadd.f32 %v1100_v41, %v1099_v39  ;;  %v1102_v45 = vpop.f32.mrb[14].mxu1 }
 0x110   :  { %v1031_v46 = vpop.f32.mrb[15].mxu0  ;;  %v1103_v47 = vpop.f32.mrb[15].mxu1 }
 0x111   :  { %v1032_v48 = vadd.f32 %v1031_v46, %v1030_v43  ;;  %v1505_v49 = vadd.f32 %v1103_v47, %v1102_v45  ;;  %v578_v10 = vadd.f32 %v1029_v42, %v1510_v50 }
 0x113   :  { %v581_v18 = vadd.f32 %v1032_v48, %v1510_v50 }
 0x115   :  { %v1033_v52 = vpop.f32.mrb[16].mxu0  ;;  %v1129_v53 = vpop.f32.mrb[16].mxu1 }
 0x116   :  { %v723_v55 = vadd.f32 %v1129_v53, %v562_v51  ;;  %v1034_v56 = vpop.f32.mrb[17].mxu0  ;;  %v714_v57 = vpop.f32.mrb[17].mxu1 }
 0x117   :  { %v1035_v59 = vadd.f32 %v1034_v56, %v1033_v52  ;;  %v715_v60 = vadd.f32 %v714_v57, %v554_v54  ;;  %v1036_v61 = vpop.f32.mrb[18].mxu0  ;;  %v1130_v62 = vpop.f32.mrb[18].mxu1 }
 0x118   :  { %v843_v0 = vmax.f32 %v723_v55, 0.0  ;;  %v726_v1 = vadd.f32 %v1130_v62, %v565_v58  ;;  %v1037_v2 = vpop.f32.mrb[19].mxu0  ;;  %v717_v3 = vpop.f32.mrb[19].mxu1 }
 0x119   :  { %v841_v4 = vmax.f32 %v715_v60, 0.0  ;;  %v1038_v5 = vadd.f32 %v1037_v2, %v1036_v61  ;;  %v718_v7 = vadd.f32 %v717_v3, %v557_v63  ;;  %v586_v40 = vadd.f32 %v1035_v59, %v1510_v50 }
 0x11a   :  { %876 = vst.msk [vmem:[%s1689_s3 + $0x10] sm:$0xff] %vm873_vm1, %v843_v0  ;;  %v844_v6 = vmax.f32 %v726_v1, 0.0 }
 0x11b   :  { %874 = vst.msk [vmem:[%s1689_s3] sm:$0xff] %vm873_vm1, %v841_v4  ;;  %v842_v9 = vmax.f32 %v718_v7, 0.0  ;;  %v589_v52 = vadd.f32 %v1038_v5, %v1510_v50 }
 0x11c   :  { %877 = vst.msk [vmem:[%s1689_s3 + $0x18] sm:$0xff] %vm873_vm1, %v844_v6 }
 0x11d   :  { %875 = vst.msk [vmem:[%s1689_s3 + $0x8] sm:$0xff] %vm873_vm1, %v842_v9  ;;  %v1039_v11 = vpop.f32.mrb[20].mxu0  ;;  %v1133_v12 = vpop.f32.mrb[20].mxu1 }
 0x11e   :  { %v739_v15 = vadd.f32 %v1133_v12, %v578_v10  ;;  %v1040_v16 = vpop.f32.mrb[21].mxu0  ;;  %v730_v17 = vpop.f32.mrb[21].mxu1 }
 0x11f   :  { %v1041_v19 = vadd.f32 %v1040_v16, %v1039_v11  ;;  %v731_v21 = vadd.f32 %v730_v17, %v570_v14  ;;  %v1042_v22 = vpop.f32.mrb[22].mxu0  ;;  %v1134_v23 = vpop.f32.mrb[22].mxu1 }
 0x120   :  { %v847_v26 = vmax.f32 %v739_v15, 0.0  ;;  %v742_v27 = vadd.f32 %v1134_v23, %v581_v18  ;;  %v1043_v28 = vpop.f32.mrb[23].mxu0  ;;  %v733_v29 = vpop.f32.mrb[23].mxu1 }
 0x121   :  { %v845_v31 = vmax.f32 %v731_v21, 0.0  ;;  %v1044_v33 = vadd.f32 %v1043_v28, %v1042_v22  ;;  %v734_v34 = vadd.f32 %v733_v29, %v573_v24  ;;  %v594_v36 = vadd.f32 %v1041_v19, %v1510_v50 }
 0x122   :  { %880 = vst.msk [vmem:[%s1689_s3 + $0x30] sm:$0xff] %vm873_vm1, %v847_v26  ;;  %v848_v30 = vmax.f32 %v742_v27, 0.0 }
 0x123   :  { %878 = vst.msk [vmem:[%s1689_s3 + $0x20] sm:$0xff] %vm873_vm1, %v845_v31  ;;  %v846_v35 = vmax.f32 %v734_v34, 0.0  ;;  %v597_v45 = vadd.f32 %v1044_v33, %v1510_v50 }
 0x124   :  { %881 = vst.msk [vmem:[%s1689_s3 + $0x38] sm:$0xff] %vm873_vm1, %v848_v30 }
 0x125   :  { %879 = vst.msk [vmem:[%s1689_s3 + $0x28] sm:$0xff] %vm873_vm1, %v846_v35  ;;  %v1045_v38 = vpop.f32.mrb[24].mxu0  ;;  %v1137_v39 = vpop.f32.mrb[24].mxu1 }
 0x126   :  { %v755_v41 = vadd.f32 %v1137_v39, %v594_v36  ;;  %v1046_v42 = vpop.f32.mrb[25].mxu0  ;;  %v746_v43 = vpop.f32.mrb[25].mxu1 }
 0x127   :  { %v1047_v46 = vadd.f32 %v1046_v42, %v1045_v38  ;;  %v747_v47 = vadd.f32 %v746_v43, %v586_v40  ;;  %v1048_v48 = vpop.f32.mrb[26].mxu0  ;;  %v1138_v51 = vpop.f32.mrb[26].mxu1 }
 0x128   :  { %v851_v53 = vmax.f32 %v755_v41, 0.0  ;;  %v758_v54 = vadd.f32 %v1138_v51, %v597_v45  ;;  %v1049_v55 = vpop.f32.mrb[27].mxu0  ;;  %v749_v56 = vpop.f32.mrb[27].mxu1 }
 0x129   :  { %v849_v57 = vmax.f32 %v747_v47, 0.0  ;;  %v1050_v58 = vadd.f32 %v1049_v55, %v1048_v48  ;;  %v750_v60 = vadd.f32 %v749_v56, %v589_v52  ;;  %v602_v0 = vadd.f32 %v1047_v46, %v1510_v50 }
 0x12a   :  { %884 = vst.msk [vmem:[%s1689_s3 + $0x50] sm:$0xff] %vm873_vm1, %v851_v53  ;;  %v852_v59 = vmax.f32 %v758_v54, 0.0 }
 0x12b   :  { %882 = vst.msk [vmem:[%s1689_s3 + $0x40] sm:$0xff] %vm873_vm1, %v849_v57  ;;  %v850_v61 = vmax.f32 %v750_v60, 0.0  ;;  %v605_v6 = vadd.f32 %v1050_v58, %v1510_v50  ;;  %v658_v58 = vadd.f32 %v1495_v20, %v1510_v50 }
 0x12c   :  { %885 = vst.msk [vmem:[%s1689_s3 + $0x58] sm:$0xff] %vm873_vm1, %v852_v59 }
 0x12d   :  { %883 = vst.msk [vmem:[%s1689_s3 + $0x48] sm:$0xff] %vm873_vm1, %v850_v61  ;;  %v1051_v62 = vpop.f32.mrb[28].mxu0  ;;  %v1141_v63 = vpop.f32.mrb[28].mxu1 }
 0x12e   :  { %v1052_v1 = vpop.f32.mrb[29].mxu0  ;;  %v762_v2 = vpop.f32.mrb[29].mxu1 }
 0x12f   :  { %v1053_v3 = vadd.f32 %v1052_v1, %v1051_v62  ;;  %v763_v4 = vadd.f32 %v762_v2, %v602_v0  ;;  %v1054_v5 = vpop.f32.mrb[30].mxu0  ;;  %v1142_v7 = vpop.f32.mrb[30].mxu1 }
 0x130   :  { %v1055_v9 = vpop.f32.mrb[31].mxu0  ;;  %v765_v10 = vpop.f32.mrb[31].mxu1 }
 0x131   :  { %v610_v11 = vadd.f32 %v1053_v3, %v1510_v50  ;;  %v853_v12 = vmax.f32 %v763_v4, 0.0  ;;  %v1056_v14 = vadd.f32 %v1055_v9, %v1054_v5  ;;  %v766_v15 = vadd.f32 %v765_v10, %v605_v6 }
 0x132   :  { %v661_v3 = vadd.f32 %v1497_v25, %v1510_v50  ;;  %v653_v9 = vadd.f32 %v1493_v13, %v1510_v50 }
 0x133   :  { %v771_v16 = vadd.f32 %v1141_v63, %v610_v11  ;;  %886 = vst.msk [vmem:[%s1689_s3 + $0x60] sm:$0xff] %vm873_vm1, %v853_v12  ;;  %v613_v17 = vadd.f32 %v1056_v14, %v1510_v50  ;;  %v854_v18 = vmax.f32 %v766_v15, 0.0  ;;  %v650_v63 = vadd.f32 %v1491_v8, %v1510_v50 }
 0x135   :  { %v855_v19 = vmax.f32 %v771_v16, 0.0  ;;  %v774_v21 = vadd.f32 %v1142_v7, %v613_v17  ;;  %887 = vst.msk [vmem:[%s1689_s3 + $0x68] sm:$0xff] %vm873_vm1, %v854_v18  ;;  %v1057_v22 = vpop.f32.mrb[32].mxu0  ;;  %v1145_v23 = vpop.f32.mrb[32].mxu1 }
 0x136   :  { %v1058_v24 = vpop.f32.mrb[33].mxu0  ;;  %v778_v26 = vpop.f32.mrb[33].mxu1 }
 0x137   :  { %888 = vst.msk [vmem:[%s1689_s3 + $0x70] sm:$0xff] %vm873_vm1, %v855_v19  ;;  %v856_v27 = vmax.f32 %v774_v21, 0.0  ;;  %v1059_v28 = vadd.f32 %v1058_v24, %v1057_v22  ;;  %v1060_v29 = vpop.f32.mrb[34].mxu0  ;;  %v1146_v31 = vpop.f32.mrb[34].mxu1  ;;  %v674_v21 = vadd.f32 %v1503_v44, %v1510_v50 }
 0x138   :  { %v1061_v33 = vpop.f32.mrb[35].mxu0  ;;  %v781_v34 = vpop.f32.mrb[35].mxu1 }
 0x139   :  { %889 = vst.msk [vmem:[%s1689_s3 + $0x78] sm:$0xff] %vm873_vm1, %v856_v27  ;;  %v618_v30 = vadd.f32 %v1059_v28, %v1510_v50  ;;  %v1062_v35 = vadd.f32 %v1061_v33, %v1060_v29  ;;  %v666_v27 = vadd.f32 %v1499_v32, %v1510_v50  ;;  %v677_v33 = vadd.f32 %v1505_v49, %v1510_v50 }
 0x13b   :  { %v779_v36 = vadd.f32 %v778_v26, %v618_v30  ;;  %v621_v38 = vadd.f32 %v1062_v35, %v1510_v50 }
 0x13d   :  { %v857_v39 = vmax.f32 %v779_v36, 0.0  ;;  %v782_v40 = vadd.f32 %v781_v34, %v621_v38  ;;  %v1063_v41 = vpop.f32.mrb[36].mxu0  ;;  %v1594_v42 = vpop.f32.mrb[36].mxu1  ;;  %v669_v38 = vadd.f32 %v1501_v37, %v1510_v50 }
 0x13e   :  { %v1064_v43 = vpop.f32.mrb[37].mxu0  ;;  %v794_v45 = vpop.f32.mrb[37].mxu1 }
 0x13f   :  { %890 = vst.msk [vmem:[%s1689_s3 + $0x80] sm:$0xff] %vm873_vm1, %v857_v39  ;;  %v858_v46 = vmax.f32 %v782_v40, 0.0  ;;  %v1065_v47 = vadd.f32 %v1064_v43, %v1063_v41  ;;  %v1066_v48 = vpop.f32.mrb[38].mxu0  ;;  %v1600_v51 = vpop.f32.mrb[38].mxu1 }
 0x140   :  { %v1067_v52 = vpop.f32.mrb[39].mxu0  ;;  %v797_v53 = vpop.f32.mrb[39].mxu1 }
 0x141   :  { %891 = vst.msk [vmem:[%s1689_s3 + $0x88] sm:$0xff] %vm873_vm1, %v858_v46  ;;  %v626_v54 = vadd.f32 %v1065_v47, %v1510_v50  ;;  %v1068_v55 = vadd.f32 %v1067_v52, %v1066_v48 }
 0x143   :  { %v787_v56 = vadd.f32 %v1145_v23, %v626_v54  ;;  %v629_v57 = vadd.f32 %v1068_v55, %v1510_v50 }
 0x145   :  { %v859_v60 = vmax.f32 %v787_v56, 0.0  ;;  %v790_v59 = vadd.f32 %v1146_v31, %v629_v57  ;;  %v1069_v61 = vpop.f32.mrb[40].mxu0  ;;  %v1153_v62 = vpop.f32.mrb[40].mxu1 }
 0x146   :  { %v819_v0 = vadd.f32 %v1153_v62, %v658_v58  ;;  %v1070_v1 = vpop.f32.mrb[41].mxu0  ;;  %v810_v2 = vpop.f32.mrb[41].mxu1 }
 0x147   :  { %892 = vst.msk [vmem:[%s1689_s3 + $0x90] sm:$0xff] %vm873_vm1, %v859_v60  ;;  %v860_v4 = vmax.f32 %v790_v59, 0.0  ;;  %v1071_v20 = vadd.f32 %v1070_v1, %v1069_v61  ;;  %v811_v5 = vadd.f32 %v810_v2, %v650_v63  ;;  %v1072_v7 = vpop.f32.mrb[42].mxu0  ;;  %v1154_v6 = vpop.f32.mrb[42].mxu1 }
 0x148   :  { %v867_v8 = vmax.f32 %v819_v0, 0.0  ;;  %v822_v10 = vadd.f32 %v1154_v6, %v661_v3  ;;  %v1073_v11 = vpop.f32.mrb[43].mxu0  ;;  %v813_v12 = vpop.f32.mrb[43].mxu1 }
 0x149   :  { %893 = vst.msk [vmem:[%s1689_s3 + $0x98] sm:$0xff] %vm873_vm1, %v860_v4  ;;  %v634_v25 = vadd.f32 %v1071_v20, %v1510_v50  ;;  %v865_v14 = vmax.f32 %v811_v5, 0.0  ;;  %v1074_v15 = vadd.f32 %v1073_v11, %v1072_v7  ;;  %v814_v16 = vadd.f32 %v813_v12, %v653_v9 }
 0x14a   :  { %900 = vst.msk [vmem:[%s1689_s3 + $0xd0] sm:$0xff] %vm873_vm1, %v867_v8  ;;  %v868_v13 = vmax.f32 %v822_v10, 0.0 }
 0x14b   :  { %v795_v17 = vadd.f32 %v794_v45, %v634_v25  ;;  %898 = vst.msk [vmem:[%s1689_s3 + $0xc0] sm:$0xff] %vm873_vm1, %v865_v14  ;;  %v637_v18 = vadd.f32 %v1074_v15, %v1510_v50  ;;  %v866_v19 = vmax.f32 %v814_v16, 0.0 }
 0x14c   :  { %901 = vst.msk [vmem:[%s1689_s3 + $0xd8] sm:$0xff] %vm873_vm1, %v868_v13 }
 0x14d   :  { %v861_v22 = vmax.f32 %v795_v17, 0.0  ;;  %v798_v23 = vadd.f32 %v797_v53, %v637_v18  ;;  %899 = vst.msk [vmem:[%s1689_s3 + $0xc8] sm:$0xff] %vm873_vm1, %v866_v19  ;;  %v1075_v24 = vpop.f32.mrb[44].mxu0  ;;  %v1157_v26 = vpop.f32.mrb[44].mxu1 }
 0x14e   :  { %v835_v28 = vadd.f32 %v1157_v26, %v674_v21  ;;  %v1076_v29 = vpop.f32.mrb[45].mxu0  ;;  %v826_v31 = vpop.f32.mrb[45].mxu1 }
 0x14f   :  { %894 = vst.msk [vmem:[%s1689_s3 + $0xa0] sm:$0xff] %vm873_vm1, %v861_v22  ;;  %v862_v44 = vmax.f32 %v798_v23, 0.0  ;;  %v1077_v34 = vadd.f32 %v1076_v29, %v1075_v24  ;;  %v827_v30 = vadd.f32 %v826_v31, %v666_v27  ;;  %v1078_v35 = vpop.f32.mrb[46].mxu0  ;;  %v1158_v36 = vpop.f32.mrb[46].mxu1 }
 0x150   :  { %v871_v32 = vmax.f32 %v835_v28, 0.0  ;;  %v838_v39 = vadd.f32 %v1158_v36, %v677_v33  ;;  %v1079_v40 = vpop.f32.mrb[47].mxu0  ;;  %v829_v41 = vpop.f32.mrb[47].mxu1 }
 0x151   :  { %895 = vst.msk [vmem:[%s1689_s3 + $0xa8] sm:$0xff] %vm873_vm1, %v862_v44  ;;  %v642_v49 = vadd.f32 %v1077_v34, %v1510_v50  ;;  %v869_v43 = vmax.f32 %v827_v30, 0.0  ;;  %v1080_v45 = vadd.f32 %v1079_v40, %v1078_v35  ;;  %v830_v46 = vadd.f32 %v829_v41, %v669_v38 }
 0x152   :  { %904 = vst.msk [vmem:[%s1689_s3 + $0xf0] sm:$0xff] %vm873_vm1, %v871_v32  ;;  %v872_v37 = vmax.f32 %v838_v39, 0.0 }
 0x153   :  { %v803_v47 = vadd.f32 %v1594_v42, %v642_v49  ;;  %902 = vst.msk [vmem:[%s1689_s3 + $0xe0] sm:$0xff] %vm873_vm1, %v869_v43  ;;  %v645_v48 = vadd.f32 %v1080_v45, %v1510_v50  ;;  %v870_v52 = vmax.f32 %v830_v46, 0.0 }
 0x154   :  { %905 = vst.msk [vmem:[%s1689_s3 + $0xf8] sm:$0xff] %vm873_vm1, %v872_v37 }
 0x155   :  { %v863_v53 = vmax.f32 %v803_v47, 0.0  ;;  %v806_v54 = vadd.f32 %v1600_v51, %v645_v48  ;;  %903 = vst.msk [vmem:[%s1689_s3 + $0xe8] sm:$0xff] %vm873_vm1, %v870_v52 }
 0x157   :  { %896 = vst.msk [vmem:[%s1689_s3 + $0xb0] sm:$0xff] %vm873_vm1, %v863_v53  ;;  %v864_v50 = vmax.f32 %v806_v54, 0.0 }
 0x159   :  { %897 = vst.msk [vmem:[%s1689_s3 + $0xb8] sm:$0xff] %vm873_vm1, %v864_v50 }

// kernel: _lambda_.13
= control target key start
LH: loop header
LB: loop body
LE: loop exit
PB: predicated region body
PF: predicated region fallthrough
CT: control target
= control target key end

     0   :  { %v239_v0 = vmov 0.0   ;;  %vm240_vm0 = vmmov 0   ;;  %vm88_vm1 = vcmask 785408   ;;  %vm159_vm2 = vcmask 392192   ;;  %s309_s1 = inlined_call_operand.vmem [shape: bf16[96,48], index: 1, kind: input, shape index: {}]   ;;  %s310_s0 = inlined_call_operand.vmem [shape: bf16[36,96], index: 0, kind: input, shape index: {}]   ;;  %s311_s2 = inlined_call_operand.vmem [shape: f32[1,48], index: 2, kind: input, shape index: {}]   ;;  %s312_s3 = inlined_call_operand.vmem [shape: f32[36,48], index: 3, kind: output, shape index: {}]  }
   0x1   :  { %216 = vmatprep.subr.bf16.mxu1 %v239_v0  ;;  %v230_v1 = vld [vmem:[%s309_s1] sm:$0xff]   ;;  %192 = vmatprep.subr.bf16.mxu0 %v239_v0  ;;  %v231_v2 = vld [vmem:[%s309_s1 + $0x8] sm:$0xff]   ;;  %v232_v3 = vld [vmem:[%s309_s1 + $0x10] sm:$0xff]   ;;  %vm164_vm3 = vcmask 388096  }
   0x2   :  { %208 = vmatprep.mubr.msk.bf16.mxu1 %vm240_vm0, %v239_v0  ;;  %204 = vmatprep.mubr.msk.bf16.mxu0 %vm240_vm0, %v239_v0  ;;  %v233_v4 = vld [vmem:[%s309_s1 + $0x18] sm:$0xff]   ;;  %v234_v5 = vld [vmem:[%s309_s1 + $0x20] sm:$0xff]   ;;  %v235_v6 = vld [vmem:[%s309_s1 + $0x28] sm:$0xff]  }
   0x3   :  { %222 = vmatpush3.bf16.msra.mxu1 %v230_v1  ;;  %193 = vmatpush3.bf16.msra.mxu0 %v230_v1  ;;  %v236_v7 = vld [vmem:[%s310_s0 + $0x8] sm:$0xff]   ;;  %v237_v8 = vld [vmem:[%s310_s0] sm:$0xff]   ;;  %v238_v9 = vld [vmem:[%s310_s0 + $0x10] ss:$0 sps:$4 sm:$0x33]  }
   0x4   :  { %217 = vmatprep.subr.bf16.mxu1 %v239_v0  ;;  %194 = vmatprep.subr.bf16.mxu0 %v239_v0  ;;  %v170_v10 = vld [vmem:[%s311_s2] ss:$0 sm:$0xff] }
   0x7   :  { %223 = vmatpush3.bf16.msra.mxu1 %v231_v2  ;;  %195 = vmatpush3.bf16.msra.mxu0 %v231_v2 }
   0x8   :  { %218 = vmatprep.subr.bf16.mxu1 %v239_v0  ;;  %196 = vmatprep.subr.bf16.mxu0 %v239_v0 }
   0xb   :  { %224 = vmatpush3.bf16.msra.mxu1 %v232_v3  ;;  %197 = vmatpush3.bf16.msra.mxu0 %v232_v3 }
   0xc   :  { %219 = vmatprep.subr.bf16.mxu1 %v239_v0  ;;  %198 = vmatprep.subr.bf16.mxu0 %v239_v0 }
   0xf   :  { %225 = vmatpush3.bf16.msra.mxu1 %v233_v4  ;;  %199 = vmatpush3.bf16.msra.mxu0 %v233_v4 }
  0x10   :  { %220 = vmatprep.subr.bf16.mxu1 %v239_v0  ;;  %200 = vmatprep.subr.bf16.mxu0 %v239_v0 }
  0x13   :  { %226 = vmatpush3.bf16.msra.mxu1 %v234_v5  ;;  %201 = vmatpush3.bf16.msra.mxu0 %v234_v5 }
  0x14   :  { %221 = vmatprep.subr.bf16.mxu1 %v239_v0  ;;  %202 = vmatprep.subr.bf16.mxu0 %v239_v0 }
  0x17   :  { %227 = vmatpush3.bf16.msra.mxu1 %v235_v6  ;;  %203 = vmatpush3.bf16.msra.mxu0 %v235_v6 }
  0x1a   :  { %209 = vmatmul.mubr.msk.bf16.vlgmr.msra.gmra.mrb[0].mxu1 %vm88_vm1, %v236_v7  ;;  %205 = vmatmul.mubr.msk.bf16.vlgmr.msra.gmra.mrb[0].mxu0 %vm88_vm1, %v237_v8 }
  0x1b   :  { %212 = vmatprep.mubr.msk.bf16.mxu1 %vm240_vm0, %v239_v0 }
  0x22   :  { %213 = vmatmul.mubr.msk.bf16.gmra.mrb[4].mxu1 %vm88_vm1, %v238_v9 }
  0xed   :  { %v140_v11 = vpop.f32.mrb[0].mxu1  ;;  %v132_v12 = vpop.f32.mrb[0].mxu0 }
  0xee   :  { %v141_v13 = vadd.f32 %v170_v10, %v140_v11  ;;  %v210_v14 = vpop.f32.mrb[1].mxu1  ;;  %v133_v15 = vadd.f32 %v170_v10, %v132_v12  ;;  %v206_v16 = vpop.f32.mrb[1].mxu0 }
  0xef   :  { %v143_v17 = vpop.f32.mrb[2].mxu1  ;;  %v135_v18 = vpop.f32.mrb[2].mxu0 }
  0xf0   :  { %v156_v19 = vmax.f32 %v141_v13, 0.0  ;;  %v144_v20 = vadd.f32 %v170_v10, %v143_v17  ;;  %v154_v21 = vmax.f32 %v133_v15, 0.0  ;;  %v211_v22 = vpop.f32.mrb[3].mxu1  ;;  %v136_v23 = vadd.f32 %v170_v10, %v135_v18  ;;  %v207_v24 = vpop.f32.mrb[3].mxu0 }
  0xf2   :  { %162 = vst.msk [vmem:[%s312_s3 + $0x10] sm:$0xff] %vm159_vm2, %v156_v19  ;;  %v157_v25 = vmax.f32 %v144_v20, 0.0  ;;  %160 = vst.msk [vmem:[%s312_s3] sm:$0xff] %vm159_vm2, %v154_v21  ;;  %v155_v26 = vmax.f32 %v136_v23, 0.0 }
  0xf4   :  { %163 = vst.msk [vmem:[%s312_s3 + $0x18] sm:$0xff] %vm159_vm2, %v157_v25  ;;  %161 = vst.msk [vmem:[%s312_s3 + $0x8] sm:$0xff] %vm159_vm2, %v155_v26 }
  0xf5   :  { %v148_v27 = vpop.f32.mrb[4].mxu1 }
  0xf6   :  { %v149_v28 = vadd.f32 %v170_v10, %v148_v27  ;;  %v214_v29 = vpop.f32.mrb[5].mxu1 }
  0xf7   :  { %v151_v30 = vpop.f32.mrb[6].mxu1 }
  0xf8   :  { %v158_v31 = vmax.f32 %v149_v28, 0.0  ;;  %v215_v32 = vpop.f32.mrb[7].mxu1 }
  0xfa   :  { %165 = vst.msk [vmem:[%s312_s3 + $0x20] sm:$0xf] %vm164_vm3, %v158_v31 }

// kernel: _lambda_.14
= control target key start
LH: loop header
LB: loop body
LE: loop exit
PB: predicated region body
PF: predicated region fallthrough
CT: control target
= control target key end

     0   :  { %vm412_vm0 = vcmask 392192   ;;  %vm555_vm1 = vcmask 130048   ;;  %vm564_vm2 = vcmask 125952   ;;  %s1008_s1 = inlined_call_operand.vmem [shape: bf16[432,144], index: 1, kind: input, shape index: {}]   ;;  %s1009_s0 = inlined_call_operand.vmem [shape: bf16[36,432], index: 0, kind: input, shape index: {}]   ;;  %s1010_s2 = inlined_call_operand.vmem [shape: f32[1,144], index: 2, kind: input, shape index: {}]   ;;  %s1011_s3 = inlined_call_operand.vmem [shape: f32[36,144], index: 3, kind: output, shape index: {}]  }
   0x1   :  { %v659_v0 = vld [vmem:[%s1008_s1 + $0x4] ss:$8 sps:$4 sm:$0xff]   ;;  %v661_v1 = vld [vmem:[%s1008_s1] ss:$8 sps:$4 sm:$0xff]   ;;  %v662_v2 = vld [vmem:[%s1008_s1 + $0x14] ss:$8 sps:$4 sm:$0xff]  }
   0x2   :  { %422 = vmatprep.subr.bf16.mxu1 %v659_v0  ;;  %v664_v3 = vld [vmem:[%s1008_s1 + $0x10] ss:$8 sps:$4 sm:$0xff]   ;;  %v665_v4 = vld [vmem:[%s1008_s1 + $0x24] ss:$8 sps:$4 sm:$0xff]   ;;  %v667_v5 = vld [vmem:[%s1008_s1 + $0x20] ss:$8 sps:$4 sm:$0xff]  }
   0x3   :  { %423 = vmatpush1.bf16.msra.mxu1 %v661_v1  ;;  %v674_v6 = vld [vmem:[%s1008_s1 + $0x104] ss:$8 sps:$4 sm:$0xff]   ;;  %v668_v7 = vld [vmem:[%s1008_s1 + $0x34] ss:$8 sps:$4 sm:$0xff]   ;;  %v678_v8 = vld [vmem:[%s1008_s1 + $0x100] ss:$8 sps:$4 sm:$0xff]  }
   0x4   :  { %424 = vmatprep.subr.bf16.mxu1 %v662_v2  ;;  %483 = vmatprep.subr.bf16.mxu0 %v674_v6  ;;  %v680_v9 = vld [vmem:[%s1008_s1 + $0x114] ss:$8 sps:$4 sm:$0xff]   ;;  %v670_v10 = vld [vmem:[%s1008_s1 + $0x30] ss:$8 sps:$4 sm:$0xff]   ;;  %v671_v11 = vld [vmem:[%s1008_s1 + $0x44] ss:$8 sps:$4 sm:$0xff]  }
   0x5   :  { %484 = vmatpush1.bf16.msra.mxu0 %v678_v8  ;;  %v684_v12 = vld [vmem:[%s1008_s1 + $0x110] ss:$8 sps:$4 sm:$0xff]   ;;  %v686_v13 = vld [vmem:[%s1008_s1 + $0x124] ss:$8 sps:$4 sm:$0xff]   ;;  %v673_v14 = vld [vmem:[%s1008_s1 + $0x40] ss:$8 sps:$4 sm:$0xff]  }
   0x6   :  { %485 = vmatprep.subr.bf16.mxu0 %v680_v9  ;;  %v690_v15 = vld [vmem:[%s1008_s1 + $0x120] ss:$8 sps:$4 sm:$0xff]   ;;  %v692_v16 = vld [vmem:[%s1008_s1 + $0x134] ss:$8 sps:$4 sm:$0xff]   ;;  %v696_v18 = vld [vmem:[%s1008_s1 + $0x130] ss:$8 sps:$4 sm:$0xff]  }
   0x7   :  { %425 = vmatpush1.bf16.msra.mxu1 %v664_v3  ;;  %v676_v17 = vld [vmem:[%s1008_s1 + $0x54] ss:$8 sps:$4 sm:$0xff]   ;;  %v679_v19 = vld [vmem:[%s1008_s1 + $0x50] ss:$8 sps:$4 sm:$0xff]   ;;  %v698_v20 = vld [vmem:[%s1008_s1 + $0x144] ss:$8 sps:$4 sm:$0xff]  }
   0x8   :  { %426 = vmatprep.subr.bf16.mxu1 %v665_v4  ;;  %v682_v21 = vld [vmem:[%s1008_s1 + $0x64] ss:$8 sps:$4 sm:$0xff]   ;;  %v685_v22 = vld [vmem:[%s1008_s1 + $0x60] ss:$8 sps:$4 sm:$0xff]   ;;  %v704_v24 = vld [vmem:[%s1008_s1 + $0x154] ss:$8 sps:$4 sm:$0xff]   ;;  %v81_v4 = vlaneseq }
   0x9   :  { %486 = vmatpush1.bf16.msra.mxu0 %v684_v12  ;;  %v702_v23 = vld [vmem:[%s1008_s1 + $0x140] ss:$8 sps:$4 sm:$0xff]   ;;  %v688_v25 = vld [vmem:[%s1008_s1 + $0x74] ss:$8 sps:$4 sm:$0xff]   ;;  %v708_v26 = vld [vmem:[%s1008_s1 + $0x150] ss:$8 sps:$4 sm:$0xff]  }
   0xa   :  { %487 = vmatprep.subr.bf16.mxu0 %v686_v13  ;;  %v691_v27 = vld [vmem:[%s1008_s1 + $0x70] ss:$8 sps:$4 sm:$0xff]   ;;  %v710_v28 = vld [vmem:[%s1008_s1 + $0x164] ss:$8 sps:$4 sm:$0xff]   ;;  %v697_v30 = vld [vmem:[%s1008_s1 + $0x80] ss:$8 sps:$4 sm:$0xff]  }
   0xb   :  { %427 = vmatpush1.bf16.msra.mxu1 %v667_v5  ;;  %v694_v29 = vld [vmem:[%s1008_s1 + $0x84] ss:$8 sps:$4 sm:$0xff]   ;;  %v714_v31 = vld [vmem:[%s1008_s1 + $0x160] ss:$8 sps:$4 sm:$0xff]   ;;  %v716_v32 = vld [vmem:[%s1008_s1 + $0x174] ss:$8 sps:$4 sm:$0xff]  }
   0xc   :  { %428 = vmatprep.subr.bf16.mxu1 %v668_v7  ;;  %v700_v33 = vld [vmem:[%s1008_s1 + $0x94] ss:$8 sps:$4 sm:$0xff]   ;;  %v720_v34 = vld [vmem:[%s1008_s1 + $0x170] ss:$8 sps:$4 sm:$0xff]   ;;  %v722_v36 = vld [vmem:[%s1008_s1 + $0x184] ss:$8 sps:$4 sm:$0xff]  }
   0xd   :  { %488 = vmatpush1.bf16.msra.mxu0 %v690_v15  ;;  %v703_v35 = vld [vmem:[%s1008_s1 + $0x90] ss:$8 sps:$4 sm:$0xff]   ;;  %v706_v37 = vld [vmem:[%s1008_s1 + $0xa4] ss:$8 sps:$4 sm:$0xff]   ;;  %v709_v38 = vld [vmem:[%s1008_s1 + $0xa0] ss:$8 sps:$4 sm:$0xff]  }
   0xe   :  { %489 = vmatprep.subr.bf16.mxu0 %v692_v16  ;;  %v742_v39 = vld [vmem:[%s1009_s0 + $0xc] ss:$16 sps:$4 sm:$0xff]   ;;  %v726_v40 = vld [vmem:[%s1008_s1 + $0x180] ss:$8 sps:$4 sm:$0xff]   ;;  %v745_v41 = vld [vmem:[%s1009_s0 + $0x4] ss:$16 sps:$4 sm:$0xff]  }
   0xf   :  { %429 = vmatpush1.bf16.msra.mxu1 %v670_v10  ;;  %v728_v42 = vld [vmem:[%s1008_s1 + $0x194] ss:$8 sps:$4 sm:$0xff]   ;;  %636 = vmatprep.mubr.msk.bf16.mxu0 %vm412_vm0, %v742_v39  ;;  %v732_v44 = vld [vmem:[%s1008_s1 + $0x190] ss:$8 sps:$4 sm:$0xff]   ;;  %v734_v46 = vld [vmem:[%s1008_s1 + $0x1a4] ss:$8 sps:$4 sm:$0xff]  }
  0x10   :  { %430 = vmatprep.subr.bf16.mxu1 %v671_v11  ;;  %v712_v43 = vld [vmem:[%s1008_s1 + $0xb4] ss:$8 sps:$4 sm:$0xff]   ;;  %454 = vmatprep.mubr.bf16.mxu1 %v745_v41  ;;  %v715_v45 = vld [vmem:[%s1008_s1 + $0xb0] ss:$8 sps:$4 sm:$0xff]   ;;  %v718_v47 = vld [vmem:[%s1008_s1 + $0xc4] ss:$8 sps:$4 sm:$0xff]  }
  0x11   :  { %490 = vmatpush1.bf16.msra.mxu0 %v696_v18  ;;  %v738_v48 = vld [vmem:[%s1008_s1 + $0x1a0] ss:$8 sps:$4 sm:$0xff]   ;;  %v724_v50 = vld [vmem:[%s1008_s1 + $0xd4] ss:$8 sps:$4 sm:$0xff]   ;;  %v727_v53 = vld [vmem:[%s1008_s1 + $0xd0] ss:$8 sps:$4 sm:$0xff]  }
  0x12   :  { %491 = vmatprep.subr.bf16.mxu0 %v698_v20  ;;  %v721_v49 = vld [vmem:[%s1008_s1 + $0xc0] ss:$8 sps:$4 sm:$0xff]   ;;  %v746_v52 = vld [vmem:[%s1009_s0 + $0x2c] ss:$16 sps:$4 sm:$0xff]   ;;  %v739_v60 = vld [vmem:[%s1008_s1 + $0xf0] ss:$8 sps:$4 sm:$0xff]  }
  0x13   :  { %431 = vmatpush1.bf16.msra.mxu1 %v673_v14  ;;  %v740_v51 = vld [vmem:[%s1009_s0 + $0x8] ss:$16 sps:$4 sm:$0xff]   ;;  %v730_v54 = vld [vmem:[%s1008_s1 + $0xe4] ss:$8 sps:$4 sm:$0xff]   ;;  %v736_v57 = vld [vmem:[%s1008_s1 + $0xf4] ss:$8 sps:$4 sm:$0xff]  }
  0x14   :  { %432 = vmatprep.subr.bf16.mxu1 %v676_v17  ;;  %v733_v55 = vld [vmem:[%s1008_s1 + $0xe0] ss:$8 sps:$4 sm:$0xff]   ;;  %v748_v62 = vld [vmem:[%s1009_s0 + $0x24] ss:$16 sps:$4 sm:$0xff]   ;;  %v82_v7 = vshrl.u32 %v81_v4, 7 }
  0x15   :  { %492 = vmatpush1.bf16.msra.mxu0 %v702_v23  ;;  %v24_v56 = vld [vmem:[%s1009_s0 + $0x48] sm:$0x33]  ;;  %v743_v61 = vld [vmem:[%s1009_s0] ss:$16 sps:$4 sm:$0xff]  }
  0x16   :  { %493 = vmatprep.subr.bf16.mxu0 %v704_v24  ;;  %v750_v58 = vld [vmem:[%s1009_s0 + $0x28] ss:$16 sps:$4 sm:$0xff]   ;;  %v581_v59 = vcombine.high %v24_v56, %v24_v56  ;;  %v580_v63 = vcombine.low %v24_v56, %v24_v56  ;;  %v23_v0 = vld [vmem:[%s1009_s0 + $0x40] sm:$0x33]  ;;  %v83_v10 = vsub.s32 0, %v82_v7  ;;  %v87_v12 = vsub.s32 1, %v82_v7 }
  0x17   :  { %433 = vmatpush1.bf16.msra.mxu1 %v679_v19  ;;  %v751_v1 = vld [vmem:[%s1009_s0 + $0x20] ss:$16 sps:$4 sm:$0xff]   ;;  %v579_v2 = vcombine.high %v23_v0, %v23_v0  ;;  %v578_v3 = vcombine.low %v23_v0, %v23_v0 }
  0x18   :  { %434 = vmatprep.subr.bf16.mxu1 %v682_v21  ;;  %v79_v11 = vld [vmem:[%s1010_s2] sm:$0x3] }
  0x19   :  { %494 = vmatpush1.bf16.msra.mxu0 %v708_v26  ;;  %v84_v15 = vrot.slane %v79_v11, %v83_v10  ;;  %v88_v17 = vrot.slane %v79_v11, %v87_v12 }
  0x1a   :  { %495 = vmatprep.subr.bf16.mxu0 %v710_v28 }
  0x1b   :  { %435 = vmatpush1.bf16.msra.mxu1 %v685_v22 }
  0x1c   :  { %436 = vmatprep.subr.bf16.mxu1 %v688_v25 }
  0x1d   :  { %496 = vmatpush1.bf16.msra.mxu0 %v714_v31 }
  0x1e   :  { %497 = vmatprep.subr.bf16.mxu0 %v716_v32 }
  0x1f   :  { %437 = vmatpush1.bf16.msra.mxu1 %v691_v27 }
  0x20   :  { %438 = vmatprep.subr.bf16.mxu1 %v694_v29 }
  0x21   :  { %498 = vmatpush1.bf16.msra.mxu0 %v720_v34 }
  0x22   :  { %499 = vmatprep.subr.bf16.mxu0 %v722_v36 }
  0x23   :  { %439 = vmatpush1.bf16.msra.mxu1 %v697_v30 }
  0x24   :  { %440 = vmatprep.subr.bf16.mxu1 %v700_v33 }
  0x25   :  { %500 = vmatpush1.bf16.msra.mxu0 %v726_v40 }
  0x26   :  { %501 = vmatprep.subr.bf16.mxu0 %v728_v42 }
  0x27   :  { %441 = vmatpush1.bf16.msra.mxu1 %v703_v35 }
  0x28   :  { %442 = vmatprep.subr.bf16.mxu1 %v706_v37 }
  0x29   :  { %502 = vmatpush1.bf16.msra.mxu0 %v732_v44 }
  0x2a   :  { %503 = vmatprep.subr.bf16.mxu0 %v734_v46 }
  0x2b   :  { %443 = vmatpush1.bf16.msra.mxu1 %v709_v38 }
  0x2c   :  { %444 = vmatprep.subr.bf16.mxu1 %v712_v43 }
  0x2d   :  { %504 = vmatpush1.bf16.msra.mxu0 %v738_v48 }
  0x2f   :  { %445 = vmatpush1.bf16.msra.mxu1 %v715_v45 }
  0x30   :  { %446 = vmatprep.subr.bf16.mxu1 %v718_v47  ;;  %516 = vmatmul.mubr.bf16.vlgmr.msra.gmra.mrb[0].mxu0 %v740_v51 }
  0x31   :  { %637 = vmatprep.mubr.msk.bf16.mxu0 %vm412_vm0, %v746_v52 }
  0x33   :  { %447 = vmatpush1.bf16.msra.mxu1 %v721_v49 }
  0x34   :  { %448 = vmatprep.subr.bf16.mxu1 %v724_v50 }
  0x37   :  { %449 = vmatpush1.bf16.msra.mxu1 %v727_v53 }
  0x38   :  { %450 = vmatprep.subr.bf16.mxu1 %v730_v54  ;;  %526 = vmatmul.mubr.bf16.gmra.mrb[4].mxu0 %v750_v58 }
  0x39   :  { %638 = vmatprep.mubr.msk.bf16.mxu0 %vm412_vm0, %v581_v59 }
  0x3b   :  { %451 = vmatpush1.bf16.msra.mxu1 %v733_v55 }
  0x3c   :  { %452 = vmatprep.subr.bf16.mxu1 %v736_v57 }
  0x3f   :  { %453 = vmatpush1.bf16.msra.mxu1 %v739_v60 }
  0x40   :  { %536 = vmatmul.mubr.bf16.gmra.mrb[8].mxu0 %v580_v63 }
  0x42   :  { %455 = vmatmul.mubr.bf16.vlgmr.msra.gmra.mrb[0].mxu1 %v743_v61 }
  0x43   :  { %464 = vmatprep.mubr.bf16.mxu1 %v748_v62 }
  0x4a   :  { %465 = vmatmul.mubr.bf16.gmra.mrb[4].mxu1 %v751_v1 }
  0x4b   :  { %474 = vmatprep.mubr.bf16.mxu1 %v579_v2 }
  0x52   :  { %475 = vmatmul.mubr.bf16.gmra.mrb[8].mxu1 %v578_v3 }
 0x103   :  { %v517_v5 = vpop.f32.mrb[0].mxu0 }
 0x104   :  { %v519_v6 = vpop.f32.mrb[1].mxu0 }
 0x105   :  { %v521_v8 = vpop.f32.mrb[2].mxu0 }
 0x106   :  { %v523_v9 = vpop.f32.mrb[3].mxu0 }
 0x10b   :  { %v527_v13 = vpop.f32.mrb[4].mxu0 }
 0x10c   :  { %v529_v14 = vpop.f32.mrb[5].mxu0 }
 0x10d   :  { %v531_v16 = vpop.f32.mrb[6].mxu0 }
 0x10e   :  { %v533_v18 = vpop.f32.mrb[7].mxu0 }
 0x113   :  { %v537_v27 = vpop.f32.mrb[8].mxu0 }
 0x114   :  { %v539_v30 = vpop.f32.mrb[9].mxu0 }
 0x115   :  { %v456_v19 = vpop.f32.mrb[0].mxu1  ;;  %v541_v33 = vpop.f32.mrb[10].mxu0 }
 0x116   :  { %v457_v20 = vadd.f32 %v456_v19, %v84_v15  ;;  %v458_v21 = vpop.f32.mrb[1].mxu1  ;;  %v542_v36 = vpop.f32.mrb[11].mxu0 }
 0x117   :  { %v459_v22 = vadd.f32 %v458_v21, %v88_v17  ;;  %v460_v23 = vpop.f32.mrb[2].mxu1 }
 0x118   :  { %v518_v24 = vadd.f32 %v517_v5, %v457_v20  ;;  %v461_v25 = vadd.f32 %v460_v23, %v84_v15  ;;  %v462_v26 = vpop.f32.mrb[3].mxu1 }
 0x119   :  { %v520_v28 = vadd.f32 %v519_v6, %v459_v22  ;;  %v463_v29 = vadd.f32 %v462_v26, %v88_v17 }
 0x11a   :  { %v544_v31 = vmax.f32 %v518_v24, 0.0  ;;  %v522_v32 = vadd.f32 %v521_v8, %v461_v25 }
 0x11b   :  { %v545_v34 = vmax.f32 %v520_v28, 0.0  ;;  %v524_v35 = vadd.f32 %v523_v9, %v463_v29 }
 0x11c   :  { %554 = vst [vmem:[%s1011_s3] sm:$0xff] %v544_v31  ;;  %v546_v37 = vmax.f32 %v522_v32, 0.0 }
 0x11d   :  { %556 = vst.msk [vmem:[%s1011_s3 + $0x8] sm:$0xff] %vm555_vm1, %v545_v34  ;;  %v547_v38 = vmax.f32 %v524_v35, 0.0  ;;  %v466_v39 = vpop.f32.mrb[4].mxu1 }
 0x11e   :  { %557 = vst [vmem:[%s1011_s3 + $0x10] sm:$0xff] %v546_v37  ;;  %v467_v40 = vadd.f32 %v466_v39, %v84_v15  ;;  %v468_v41 = vpop.f32.mrb[5].mxu1 }
 0x11f   :  { %558 = vst.msk [vmem:[%s1011_s3 + $0x18] sm:$0xff] %vm555_vm1, %v547_v38  ;;  %v469_v42 = vadd.f32 %v468_v41, %v88_v17  ;;  %v470_v43 = vpop.f32.mrb[6].mxu1 }
 0x120   :  { %v528_v44 = vadd.f32 %v527_v13, %v467_v40  ;;  %v471_v45 = vadd.f32 %v470_v43, %v84_v15  ;;  %v472_v46 = vpop.f32.mrb[7].mxu1 }
 0x121   :  { %v530_v47 = vadd.f32 %v529_v14, %v469_v42  ;;  %v473_v48 = vadd.f32 %v472_v46, %v88_v17 }
 0x122   :  { %v548_v49 = vmax.f32 %v528_v44, 0.0  ;;  %v532_v50 = vadd.f32 %v531_v16, %v471_v45 }
 0x123   :  { %v549_v51 = vmax.f32 %v530_v47, 0.0  ;;  %v534_v52 = vadd.f32 %v533_v18, %v473_v48 }
 0x124   :  { %559 = vst [vmem:[%s1011_s3 + $0x20] sm:$0xff] %v548_v49  ;;  %v550_v53 = vmax.f32 %v532_v50, 0.0 }
 0x125   :  { %560 = vst.msk [vmem:[%s1011_s3 + $0x28] sm:$0xff] %vm555_vm1, %v549_v51  ;;  %v551_v54 = vmax.f32 %v534_v52, 0.0  ;;  %v476_v55 = vpop.f32.mrb[8].mxu1 }
 0x126   :  { %561 = vst [vmem:[%s1011_s3 + $0x30] sm:$0xff] %v550_v53  ;;  %v477_v56 = vadd.f32 %v476_v55, %v84_v15  ;;  %v478_v57 = vpop.f32.mrb[9].mxu1 }
 0x127   :  { %562 = vst.msk [vmem:[%s1011_s3 + $0x38] sm:$0xff] %vm555_vm1, %v551_v54  ;;  %v479_v58 = vadd.f32 %v478_v57, %v88_v17  ;;  %v480_v59 = vpop.f32.mrb[10].mxu1 }
 0x128   :  { %v538_v60 = vadd.f32 %v537_v27, %v477_v56  ;;  %v481_v61 = vpop.f32.mrb[11].mxu1 }
 0x129   :  { %v540_v62 = vadd.f32 %v539_v30, %v479_v58 }
 0x12a   :  { %v552_v63 = vmax.f32 %v538_v60, 0.0 }
 0x12b   :  { %v553_v0 = vmax.f32 %v540_v62, 0.0 }
 0x12c   :  { %563 = vst [vmem:[%s1011_s3 + $0x40] sm:$0xf] %v552_v63 }
 0x12d   :  { %565 = vst.msk [vmem:[%s1011_s3 + $0x48] sm:$0xf] %vm564_vm2, %v553_v0 }

// kernel: _lambda_.15
= control target key start
LH: loop header
LB: loop body
LE: loop exit
PB: predicated region body
PF: predicated region fallthrough
CT: control target
= control target key end

     0   :  { %7 = vsyncpa [#allocation3], 0  ;;  %vm366_vm0 = vcmask 0   ;;  %s851_s0 = inlined_call_operand.vmem [shape: f32[552,128], index: 0, kind: input, shape index: {}]   ;;  %s852_s1 = inlined_call_operand.vmem [shape: f32[552,128], index: 1, kind: input, shape index: {}]   ;;  %s853_s2 = inlined_call_operand.hbm [shape: f32[1,1], index: 2, kind: output, shape index: {}]  }
   0x1   :  { %v12_v0 = vld [vmem:[%s851_s0] sm:$0xff]  ;;  %v13_v1 = vld [vmem:[%s851_s0 + $0x8] sm:$0xff]  ;;  %v14_v4 = vld [vmem:[%s851_s0 + $0x10] sm:$0xff] }
   0x2   :  { %v81_v2 = vld [vmem:[%s852_s1] sm:$0xff]  ;;  %v82_v3 = vld [vmem:[%s852_s1 + $0x8] sm:$0xff]  ;;  %v83_v5 = vld [vmem:[%s852_s1 + $0x10] sm:$0xff] }
   0x3   :  { %v150_v6 = vsub.f32 %v12_v0, %v81_v2  ;;  %v151_v7 = vsub.f32 %v13_v1, %v82_v3  ;;  %v15_v8 = vld [vmem:[%s851_s0 + $0x18] sm:$0xff]  ;;  %v152_v10 = vsub.f32 %v14_v4, %v83_v5  ;;  %v16_v11 = vld [vmem:[%s851_s0 + $0x20] sm:$0xff]  ;;  %v17_v16 = vld [vmem:[%s851_s0 + $0x28] sm:$0xff] }
   0x4   :  { %v84_v9 = vld [vmem:[%s852_s1 + $0x18] sm:$0xff]  ;;  %v85_v12 = vld [vmem:[%s852_s1 + $0x20] sm:$0xff]  ;;  %v86_v17 = vld [vmem:[%s852_s1 + $0x28] sm:$0xff] }
   0x5   :  { %v153_v13 = vsub.f32 %v15_v8, %v84_v9  ;;  %v219_v14 = vand.u32 2147483647, %v150_v6  ;;  %v220_v15 = vand.u32 2147483647, %v151_v7  ;;  %v154_v18 = vsub.f32 %v16_v11, %v85_v12  ;;  %v18_v20 = vld [vmem:[%s851_s0 + $0x30] sm:$0xff]  ;;  %v19_v25 = vld [vmem:[%s851_s0 + $0x38] sm:$0xff] }
   0x6   :  { %v221_v19 = vand.u32 2147483647, %v152_v10  ;;  %v87_v21 = vld [vmem:[%s852_s1 + $0x30] sm:$0xff]  ;;  %v155_v22 = vsub.f32 %v17_v16, %v86_v17  ;;  %v88_v26 = vld [vmem:[%s852_s1 + $0x38] sm:$0xff]  ;;  %v20_v30 = vld [vmem:[%s851_s0 + $0x40] sm:$0xff] }
   0x7   :  { %v222_v23 = vand.u32 2147483647, %v153_v13  ;;  %v288_v24 = vadd.f32 %v220_v15, %v219_v14  ;;  %v156_v27 = vsub.f32 %v18_v20, %v87_v21  ;;  %v223_v28 = vand.u32 2147483647, %v154_v18  ;;  %v89_v31 = vld [vmem:[%s852_s1 + $0x40] sm:$0xff]  ;;  %v21_v35 = vld [vmem:[%s851_s0 + $0x48] sm:$0xff] }
   0x8   :  { %v157_v32 = vsub.f32 %v19_v25, %v88_v26  ;;  %v224_v33 = vand.u32 2147483647, %v155_v22  ;;  %v90_v36 = vld [vmem:[%s852_s1 + $0x48] sm:$0xff]  ;;  %v158_v37 = vsub.f32 %v20_v30, %v89_v31  ;;  %v22_v40 = vld [vmem:[%s851_s0 + $0x50] sm:$0xff]  ;;  %v23_v45 = vld [vmem:[%s851_s0 + $0x58] sm:$0xff] }
   0x9   :  { %v289_v29 = vadd.f32 %v288_v24, %v221_v19  ;;  %v225_v38 = vand.u32 2147483647, %v156_v27  ;;  %v91_v41 = vld [vmem:[%s852_s1 + $0x50] sm:$0xff]  ;;  %v159_v42 = vsub.f32 %v21_v35, %v90_v36  ;;  %v92_v46 = vld [vmem:[%s852_s1 + $0x58] sm:$0xff]  ;;  %v24_v50 = vld [vmem:[%s851_s0 + $0x60] sm:$0xff] }
   0xa   :  { %v226_v43 = vand.u32 2147483647, %v157_v32  ;;  %v160_v47 = vsub.f32 %v22_v40, %v91_v41  ;;  %v227_v48 = vand.u32 2147483647, %v158_v37  ;;  %v93_v51 = vld [vmem:[%s852_s1 + $0x60] sm:$0xff]  ;;  %v161_v52 = vsub.f32 %v23_v45, %v92_v46  ;;  %v25_v55 = vld [vmem:[%s851_s0 + $0x68] sm:$0xff] }
   0xb   :  { %v290_v34 = vadd.f32 %v289_v29, %v222_v23  ;;  %v228_v53 = vand.u32 2147483647, %v159_v42  ;;  %v94_v56 = vld [vmem:[%s852_s1 + $0x68] sm:$0xff]  ;;  %v162_v57 = vsub.f32 %v24_v50, %v93_v51  ;;  %v26_v60 = vld [vmem:[%s851_s0 + $0x70] sm:$0xff]  ;;  %v27_v1 = vld [vmem:[%s851_s0 + $0x78] sm:$0xff] }
   0xc   :  { %v229_v58 = vand.u32 2147483647, %v160_v47  ;;  %v95_v61 = vld [vmem:[%s852_s1 + $0x70] sm:$0xff]  ;;  %v163_v62 = vsub.f32 %v25_v55, %v94_v56  ;;  %v230_v63 = vand.u32 2147483647, %v161_v52  ;;  %v96_v2 = vld [vmem:[%s852_s1 + $0x78] sm:$0xff] }
   0xd   :  { %v291_v39 = vadd.f32 %v290_v34, %v223_v28  ;;  %v164_v3 = vsub.f32 %v26_v60, %v95_v61  ;;  %v231_v4 = vand.u32 2147483647, %v162_v57  ;;  %v28_v6 = vld [vmem:[%s851_s0 + $0x80] sm:$0xff]  ;;  %v165_v8 = vsub.f32 %v27_v1, %v96_v2  ;;  %v29_v11 = vld [vmem:[%s851_s0 + $0x88] sm:$0xff]  ;;  %v30_v16 = vld [vmem:[%s851_s0 + $0x90] sm:$0xff] }
   0xe   :  { %v97_v7 = vld [vmem:[%s852_s1 + $0x80] sm:$0xff]  ;;  %v232_v9 = vand.u32 2147483647, %v163_v62  ;;  %v98_v12 = vld [vmem:[%s852_s1 + $0x88] sm:$0xff]  ;;  %v99_v17 = vld [vmem:[%s852_s1 + $0x90] sm:$0xff] }
   0xf   :  { %v292_v44 = vadd.f32 %v291_v39, %v224_v33  ;;  %v166_v13 = vsub.f32 %v28_v6, %v97_v7  ;;  %v233_v14 = vand.u32 2147483647, %v164_v3  ;;  %v167_v18 = vsub.f32 %v29_v11, %v98_v12  ;;  %v31_v21 = vld [vmem:[%s851_s0 + $0x98] sm:$0xff]  ;;  %v32_v26 = vld [vmem:[%s851_s0 + $0xa0] sm:$0xff]  ;;  %v33_v31 = vld [vmem:[%s851_s0 + $0xa8] sm:$0xff] }
  0x10   :  { %v234_v19 = vand.u32 2147483647, %v165_v8  ;;  %v100_v22 = vld [vmem:[%s852_s1 + $0x98] sm:$0xff]  ;;  %v168_v23 = vsub.f32 %v30_v16, %v99_v17  ;;  %v101_v27 = vld [vmem:[%s852_s1 + $0xa0] sm:$0xff]  ;;  %v102_v32 = vld [vmem:[%s852_s1 + $0xa8] sm:$0xff] }
  0x11   :  { %v293_v49 = vadd.f32 %v292_v44, %v225_v38  ;;  %v235_v24 = vand.u32 2147483647, %v166_v13  ;;  %v169_v28 = vsub.f32 %v31_v21, %v100_v22  ;;  %v236_v29 = vand.u32 2147483647, %v167_v18  ;;  %v34_v36 = vld [vmem:[%s851_s0 + $0xb0] sm:$0xff]  ;;  %v35_v41 = vld [vmem:[%s851_s0 + $0xb8] sm:$0xff] }
  0x12   :  { %v170_v33 = vsub.f32 %v32_v26, %v101_v27  ;;  %v237_v34 = vand.u32 2147483647, %v168_v23  ;;  %v103_v37 = vld [vmem:[%s852_s1 + $0xb0] sm:$0xff]  ;;  %v171_v38 = vsub.f32 %v33_v31, %v102_v32  ;;  %v104_v42 = vld [vmem:[%s852_s1 + $0xb8] sm:$0xff]  ;;  %v36_v46 = vld [vmem:[%s851_s0 + $0xc0] sm:$0xff] }
  0x13   :  { %v294_v54 = vadd.f32 %v293_v49, %v226_v43  ;;  %v238_v39 = vand.u32 2147483647, %v169_v28  ;;  %v172_v43 = vsub.f32 %v34_v36, %v103_v37  ;;  %v105_v47 = vld [vmem:[%s852_s1 + $0xc0] sm:$0xff]  ;;  %v37_v51 = vld [vmem:[%s851_s0 + $0xc8] sm:$0xff]  ;;  %v38_v56 = vld [vmem:[%s851_s0 + $0xd0] sm:$0xff] }
  0x14   :  { %v239_v44 = vand.u32 2147483647, %v170_v33  ;;  %v240_v49 = vand.u32 2147483647, %v171_v38  ;;  %v106_v52 = vld [vmem:[%s852_s1 + $0xc8] sm:$0xff]  ;;  %v107_v57 = vld [vmem:[%s852_s1 + $0xd0] sm:$0xff] }
  0x15   :  { %v295_v59 = vadd.f32 %v294_v54, %v227_v48  ;;  %v173_v48 = vsub.f32 %v35_v41, %v104_v42  ;;  %v241_v54 = vand.u32 2147483647, %v172_v43  ;;  %v39_v61 = vld [vmem:[%s851_s0 + $0xd8] sm:$0xff]  ;;  %v40_v2 = vld [vmem:[%s851_s0 + $0xe0] sm:$0xff]  ;;  %v41_v7 = vld [vmem:[%s851_s0 + $0xe8] sm:$0xff] }
  0x16   :  { %v108_v62 = vld [vmem:[%s852_s1 + $0xd8] sm:$0xff]  ;;  %v109_v3 = vld [vmem:[%s852_s1 + $0xe0] sm:$0xff]  ;;  %v110_v8 = vld [vmem:[%s852_s1 + $0xe8] sm:$0xff] }
  0x17   :  { %v296_v0 = vadd.f32 %v295_v59, %v228_v53  ;;  %v174_v53 = vsub.f32 %v36_v46, %v105_v47  ;;  %v242_v59 = vand.u32 2147483647, %v173_v48  ;;  %v42_v12 = vld [vmem:[%s851_s0 + $0xf0] sm:$0xff]  ;;  %v43_v17 = vld [vmem:[%s851_s0 + $0xf8] sm:$0xff]  ;;  %v44_v22 = vld [vmem:[%s851_s0 + $0x100] sm:$0xff] }
  0x18   :  { %v111_v13 = vld [vmem:[%s852_s1 + $0xf0] sm:$0xff]  ;;  %v112_v18 = vld [vmem:[%s852_s1 + $0xf8] sm:$0xff]  ;;  %v113_v23 = vld [vmem:[%s852_s1 + $0x100] sm:$0xff] }
  0x19   :  { %v297_v5 = vadd.f32 %v296_v0, %v229_v58  ;;  %v175_v58 = vsub.f32 %v37_v51, %v106_v52  ;;  %v243_v0 = vand.u32 2147483647, %v174_v53  ;;  %v45_v27 = vld [vmem:[%s851_s0 + $0x108] sm:$0xff]  ;;  %v46_v32 = vld [vmem:[%s851_s0 + $0x110] sm:$0xff]  ;;  %v47_v37 = vld [vmem:[%s851_s0 + $0x118] sm:$0xff] }
  0x1a   :  { %v114_v28 = vld [vmem:[%s852_s1 + $0x108] sm:$0xff]  ;;  %v115_v33 = vld [vmem:[%s852_s1 + $0x110] sm:$0xff]  ;;  %v116_v38 = vld [vmem:[%s852_s1 + $0x118] sm:$0xff] }
  0x1b   :  { %v298_v10 = vadd.f32 %v297_v5, %v230_v63  ;;  %v176_v63 = vsub.f32 %v38_v56, %v107_v57  ;;  %v244_v5 = vand.u32 2147483647, %v175_v58  ;;  %v48_v42 = vld [vmem:[%s851_s0 + $0x120] sm:$0xff]  ;;  %v49_v47 = vld [vmem:[%s851_s0 + $0x128] sm:$0xff]  ;;  %v50_v52 = vld [vmem:[%s851_s0 + $0x130] sm:$0xff] }
  0x1c   :  { %v117_v43 = vld [vmem:[%s852_s1 + $0x120] sm:$0xff]  ;;  %v118_v48 = vld [vmem:[%s852_s1 + $0x128] sm:$0xff]  ;;  %v119_v53 = vld [vmem:[%s852_s1 + $0x130] sm:$0xff] }
  0x1d   :  { %v299_v15 = vadd.f32 %v298_v10, %v231_v4  ;;  %v177_v4 = vsub.f32 %v39_v61, %v108_v62  ;;  %v245_v10 = vand.u32 2147483647, %v176_v63  ;;  %v51_v57 = vld [vmem:[%s851_s0 + $0x138] sm:$0xff]  ;;  %v52_v62 = vld [vmem:[%s851_s0 + $0x140] sm:$0xff] }
  0x1e   :  { %v120_v58 = vld [vmem:[%s852_s1 + $0x138] sm:$0xff]  ;;  %v121_v63 = vld [vmem:[%s852_s1 + $0x140] sm:$0xff] }
  0x1f   :  { %v300_v20 = vadd.f32 %v299_v15, %v232_v9  ;;  %v178_v9 = vsub.f32 %v40_v2, %v109_v3  ;;  %v246_v15 = vand.u32 2147483647, %v177_v4  ;;  %v53_v3 = vld [vmem:[%s851_s0 + $0x148] sm:$0xff] }
  0x20   :  { %v122_v4 = vld [vmem:[%s852_s1 + $0x148] sm:$0xff] }
  0x21   :  { %v301_v25 = vadd.f32 %v300_v20, %v233_v14  ;;  %v179_v14 = vsub.f32 %v41_v7, %v110_v8  ;;  %v247_v20 = vand.u32 2147483647, %v178_v9  ;;  %v54_v8 = vld [vmem:[%s851_s0 + $0x150] sm:$0xff] }
  0x22   :  { %v123_v9 = vld [vmem:[%s852_s1 + $0x150] sm:$0xff] }
  0x23   :  { %v302_v30 = vadd.f32 %v301_v25, %v234_v19  ;;  %v180_v19 = vsub.f32 %v42_v12, %v111_v13  ;;  %v248_v25 = vand.u32 2147483647, %v179_v14  ;;  %v55_v13 = vld [vmem:[%s851_s0 + $0x158] sm:$0xff] }
  0x24   :  { %v124_v14 = vld [vmem:[%s852_s1 + $0x158] sm:$0xff] }
  0x25   :  { %v303_v35 = vadd.f32 %v302_v30, %v235_v24  ;;  %v181_v24 = vsub.f32 %v43_v17, %v112_v18  ;;  %v249_v30 = vand.u32 2147483647, %v180_v19  ;;  %v56_v18 = vld [vmem:[%s851_s0 + $0x160] sm:$0xff] }
  0x26   :  { %v125_v19 = vld [vmem:[%s852_s1 + $0x160] sm:$0xff] }
  0x27   :  { %v304_v40 = vadd.f32 %v303_v35, %v236_v29  ;;  %v182_v29 = vsub.f32 %v44_v22, %v113_v23  ;;  %v250_v35 = vand.u32 2147483647, %v181_v24  ;;  %v57_v23 = vld [vmem:[%s851_s0 + $0x168] sm:$0xff] }
  0x28   :  { %v126_v24 = vld [vmem:[%s852_s1 + $0x168] sm:$0xff] }
  0x29   :  { %v305_v45 = vadd.f32 %v304_v40, %v237_v34  ;;  %v183_v34 = vsub.f32 %v45_v27, %v114_v28  ;;  %v251_v40 = vand.u32 2147483647, %v182_v29  ;;  %v58_v28 = vld [vmem:[%s851_s0 + $0x170] sm:$0xff] }
  0x2a   :  { %v127_v29 = vld [vmem:[%s852_s1 + $0x170] sm:$0xff] }
  0x2b   :  { %v306_v50 = vadd.f32 %v305_v45, %v238_v39  ;;  %v184_v39 = vsub.f32 %v46_v32, %v115_v33  ;;  %v252_v45 = vand.u32 2147483647, %v183_v34  ;;  %v59_v33 = vld [vmem:[%s851_s0 + $0x178] sm:$0xff] }
  0x2c   :  { %v128_v34 = vld [vmem:[%s852_s1 + $0x178] sm:$0xff] }
  0x2d   :  { %v307_v55 = vadd.f32 %v306_v50, %v239_v44  ;;  %v185_v44 = vsub.f32 %v47_v37, %v116_v38  ;;  %v253_v50 = vand.u32 2147483647, %v184_v39  ;;  %v60_v38 = vld [vmem:[%s851_s0 + $0x180] sm:$0xff] }
  0x2e   :  { %v129_v39 = vld [vmem:[%s852_s1 + $0x180] sm:$0xff] }
  0x2f   :  { %v308_v60 = vadd.f32 %v307_v55, %v240_v49  ;;  %v186_v49 = vsub.f32 %v48_v42, %v117_v43  ;;  %v254_v55 = vand.u32 2147483647, %v185_v44  ;;  %v61_v43 = vld [vmem:[%s851_s0 + $0x188] sm:$0xff] }
  0x30   :  { %v130_v44 = vld [vmem:[%s852_s1 + $0x188] sm:$0xff] }
  0x31   :  { %v309_v1 = vadd.f32 %v308_v60, %v241_v54  ;;  %v187_v54 = vsub.f32 %v49_v47, %v118_v48  ;;  %v255_v60 = vand.u32 2147483647, %v186_v49  ;;  %v62_v48 = vld [vmem:[%s851_s0 + $0x190] sm:$0xff] }
  0x32   :  { %v131_v49 = vld [vmem:[%s852_s1 + $0x190] sm:$0xff] }
  0x33   :  { %v310_v6 = vadd.f32 %v309_v1, %v242_v59  ;;  %v188_v59 = vsub.f32 %v50_v52, %v119_v53  ;;  %v256_v1 = vand.u32 2147483647, %v187_v54  ;;  %v63_v53 = vld [vmem:[%s851_s0 + $0x198] sm:$0xff] }
  0x34   :  { %v132_v54 = vld [vmem:[%s852_s1 + $0x198] sm:$0xff] }
  0x35   :  { %v311_v11 = vadd.f32 %v310_v6, %v243_v0  ;;  %v189_v0 = vsub.f32 %v51_v57, %v120_v58  ;;  %v257_v6 = vand.u32 2147483647, %v188_v59  ;;  %v64_v58 = vld [vmem:[%s851_s0 + $0x1a0] sm:$0xff] }
  0x36   :  { %v133_v59 = vld [vmem:[%s852_s1 + $0x1a0] sm:$0xff] }
  0x37   :  { %v312_v16 = vadd.f32 %v311_v11, %v244_v5  ;;  %v190_v5 = vsub.f32 %v52_v62, %v121_v63  ;;  %v258_v11 = vand.u32 2147483647, %v189_v0  ;;  %v65_v63 = vld [vmem:[%s851_s0 + $0x1a8] sm:$0xff] }
  0x38   :  { %v134_v0 = vld [vmem:[%s852_s1 + $0x1a8] sm:$0xff] }
  0x39   :  { %v313_v21 = vadd.f32 %v312_v16, %v245_v10  ;;  %v191_v10 = vsub.f32 %v53_v3, %v122_v4  ;;  %v259_v16 = vand.u32 2147483647, %v190_v5  ;;  %v66_v4 = vld [vmem:[%s851_s0 + $0x1b0] sm:$0xff] }
  0x3a   :  { %v135_v5 = vld [vmem:[%s852_s1 + $0x1b0] sm:$0xff] }
  0x3b   :  { %v314_v26 = vadd.f32 %v313_v21, %v246_v15  ;;  %v192_v15 = vsub.f32 %v54_v8, %v123_v9  ;;  %v260_v21 = vand.u32 2147483647, %v191_v10  ;;  %v67_v9 = vld [vmem:[%s851_s0 + $0x1b8] sm:$0xff] }
  0x3c   :  { %v136_v10 = vld [vmem:[%s852_s1 + $0x1b8] sm:$0xff] }
  0x3d   :  { %v315_v31 = vadd.f32 %v314_v26, %v247_v20  ;;  %v193_v20 = vsub.f32 %v55_v13, %v124_v14  ;;  %v261_v26 = vand.u32 2147483647, %v192_v15  ;;  %v68_v14 = vld [vmem:[%s851_s0 + $0x1c0] sm:$0xff] }
  0x3e   :  { %v137_v15 = vld [vmem:[%s852_s1 + $0x1c0] sm:$0xff] }
  0x3f   :  { %v316_v36 = vadd.f32 %v315_v31, %v248_v25  ;;  %v194_v25 = vsub.f32 %v56_v18, %v125_v19  ;;  %v262_v31 = vand.u32 2147483647, %v193_v20  ;;  %v69_v19 = vld [vmem:[%s851_s0 + $0x1c8] sm:$0xff] }
  0x40   :  { %v138_v20 = vld [vmem:[%s852_s1 + $0x1c8] sm:$0xff] }
  0x41   :  { %v317_v41 = vadd.f32 %v316_v36, %v249_v30  ;;  %v195_v30 = vsub.f32 %v57_v23, %v126_v24  ;;  %v263_v36 = vand.u32 2147483647, %v194_v25  ;;  %v70_v24 = vld [vmem:[%s851_s0 + $0x1d0] sm:$0xff] }
  0x42   :  { %v139_v25 = vld [vmem:[%s852_s1 + $0x1d0] sm:$0xff] }
  0x43   :  { %v318_v46 = vadd.f32 %v317_v41, %v250_v35  ;;  %v196_v35 = vsub.f32 %v58_v28, %v127_v29  ;;  %v264_v41 = vand.u32 2147483647, %v195_v30  ;;  %v71_v29 = vld [vmem:[%s851_s0 + $0x1d8] sm:$0xff] }
  0x44   :  { %v140_v30 = vld [vmem:[%s852_s1 + $0x1d8] sm:$0xff] }
  0x45   :  { %v319_v51 = vadd.f32 %v318_v46, %v251_v40  ;;  %v197_v40 = vsub.f32 %v59_v33, %v128_v34  ;;  %v265_v46 = vand.u32 2147483647, %v196_v35  ;;  %v72_v34 = vld [vmem:[%s851_s0 + $0x1e0] sm:$0xff] }
  0x46   :  { %v141_v35 = vld [vmem:[%s852_s1 + $0x1e0] sm:$0xff] }
  0x47   :  { %v320_v56 = vadd.f32 %v319_v51, %v252_v45  ;;  %v198_v45 = vsub.f32 %v60_v38, %v129_v39  ;;  %v266_v51 = vand.u32 2147483647, %v197_v40  ;;  %v73_v39 = vld [vmem:[%s851_s0 + $0x1e8] sm:$0xff] }
  0x48   :  { %v142_v40 = vld [vmem:[%s852_s1 + $0x1e8] sm:$0xff] }
  0x49   :  { %v321_v61 = vadd.f32 %v320_v56, %v253_v50  ;;  %v199_v50 = vsub.f32 %v61_v43, %v130_v44  ;;  %v267_v56 = vand.u32 2147483647, %v198_v45  ;;  %v74_v44 = vld [vmem:[%s851_s0 + $0x1f0] sm:$0xff] }
  0x4a   :  { %v143_v45 = vld [vmem:[%s852_s1 + $0x1f0] sm:$0xff] }
  0x4b   :  { %v322_v2 = vadd.f32 %v321_v61, %v254_v55  ;;  %v200_v55 = vsub.f32 %v62_v48, %v131_v49  ;;  %v268_v61 = vand.u32 2147483647, %v199_v50  ;;  %v75_v49 = vld [vmem:[%s851_s0 + $0x1f8] sm:$0xff] }
  0x4c   :  { %v144_v50 = vld [vmem:[%s852_s1 + $0x1f8] sm:$0xff] }
  0x4d   :  { %v323_v7 = vadd.f32 %v322_v2, %v255_v60  ;;  %v201_v60 = vsub.f32 %v63_v53, %v132_v54  ;;  %v269_v2 = vand.u32 2147483647, %v200_v55  ;;  %v76_v54 = vld [vmem:[%s851_s0 + $0x200] sm:$0xff] }
  0x4e   :  { %v145_v55 = vld [vmem:[%s852_s1 + $0x200] sm:$0xff] }
  0x4f   :  { %v324_v12 = vadd.f32 %v323_v7, %v256_v1  ;;  %v202_v1 = vsub.f32 %v64_v58, %v133_v59  ;;  %v270_v7 = vand.u32 2147483647, %v201_v60  ;;  %v77_v59 = vld [vmem:[%s851_s0 + $0x208] sm:$0xff] }
  0x50   :  { %v146_v60 = vld [vmem:[%s852_s1 + $0x208] sm:$0xff] }
  0x51   :  { %v325_v17 = vadd.f32 %v324_v12, %v257_v6  ;;  %v203_v6 = vsub.f32 %v65_v63, %v134_v0  ;;  %v271_v12 = vand.u32 2147483647, %v202_v1  ;;  %v78_v0 = vld [vmem:[%s851_s0 + $0x210] sm:$0xff] }
  0x52   :  { %v147_v1 = vld [vmem:[%s852_s1 + $0x210] sm:$0xff] }
  0x53   :  { %v326_v22 = vadd.f32 %v325_v17, %v258_v11  ;;  %v204_v11 = vsub.f32 %v66_v4, %v135_v5  ;;  %v272_v17 = vand.u32 2147483647, %v203_v6  ;;  %v79_v5 = vld [vmem:[%s851_s0 + $0x218] sm:$0xff] }
  0x54   :  { %v148_v6 = vld [vmem:[%s852_s1 + $0x218] sm:$0xff] }
  0x55   :  { %v327_v27 = vadd.f32 %v326_v22, %v259_v16  ;;  %v205_v16 = vsub.f32 %v67_v9, %v136_v10  ;;  %v273_v22 = vand.u32 2147483647, %v204_v11  ;;  %v80_v10 = vld [vmem:[%s851_s0 + $0x220] sm:$0xff]  ;;  %s409_s0 = smov [#allocation2]  }
  0x56   :  { %v149_v11 = vld [vmem:[%s852_s1 + $0x220] sm:$0xff]  ;;  %s374_s1 = sshll.u32 %s409_s0, 4  ;;  %s375_s1 = int_to_ptr.vmem [resolvable:$true] %s374_s1 }
  0x57   :  { %v328_v32 = vadd.f32 %v327_v27, %v260_v21  ;;  %v206_v21 = vsub.f32 %v68_v14, %v137_v15  ;;  %v274_v27 = vand.u32 2147483647, %v205_v16  ;;  %v218_v15 = vsub.f32 %v80_v10, %v149_v11  ;;  %s385_s6 = scalar_lea.vmem %s375_s1, 16  ;;  %s389_s7 = scalar_lea.vmem %s375_s1, 32 }
  0x58   :  { %p386_p0 = scmp.ne.s32.totalorder %s375_s1, %s385_s6  ;;  %p390_p1 = scmp.lt.s32.totalorder %s375_s1, %s375_s1 }
  0x59   :  { %v329_v37 = vadd.f32 %v328_v32, %v261_v26  ;;  %v207_v26 = vsub.f32 %v69_v19, %v138_v20  ;;  %v275_v32 = vand.u32 2147483647, %v206_v21  ;;  %v287_v20 = vand.u32 2147483647, %v218_v15  ;;  %p391_p2 = scmp.lt.s32.totalorder %s389_s7, %s385_s6 }
  0x5b   :  { %v330_v42 = vadd.f32 %v329_v37, %v262_v31  ;;  %v208_v31 = vsub.f32 %v70_v24, %v139_v25  ;;  %v276_v37 = vand.u32 2147483647, %v207_v26  ;;  %p392_p3 = por %p391_p2, %p390_p1 }
  0x5d   :  { %v331_v47 = vadd.f32 %v330_v42, %v263_v36  ;;  %v209_v36 = vsub.f32 %v71_v29, %v140_v30  ;;  %v277_v42 = vand.u32 2147483647, %v208_v31  ;;  %p393_p4 = pnand %p392_p3, %p386_p0 }
  0x5f   :  { %v332_v52 = vadd.f32 %v331_v47, %v264_v41  ;;  %v210_v41 = vsub.f32 %v72_v34, %v141_v35  ;;  %v278_v47 = vand.u32 2147483647, %v209_v36 }
  0x61   :  { %v333_v57 = vadd.f32 %v332_v52, %v265_v46  ;;  %v211_v46 = vsub.f32 %v73_v39, %v142_v40  ;;  %v279_v52 = vand.u32 2147483647, %v210_v41 }
  0x63   :  { %v334_v62 = vadd.f32 %v333_v57, %v266_v51  ;;  %v212_v51 = vsub.f32 %v74_v44, %v143_v45  ;;  %v280_v57 = vand.u32 2147483647, %v211_v46 }
  0x65   :  { %v335_v3 = vadd.f32 %v334_v62, %v267_v56  ;;  %v213_v56 = vsub.f32 %v75_v49, %v144_v50  ;;  %v281_v62 = vand.u32 2147483647, %v212_v51 }
  0x67   :  { %v336_v8 = vadd.f32 %v335_v3, %v268_v61  ;;  %v214_v61 = vsub.f32 %v76_v54, %v145_v55  ;;  %v282_v3 = vand.u32 2147483647, %v213_v56 }
  0x69   :  { %v337_v13 = vadd.f32 %v336_v8, %v269_v2  ;;  %v215_v2 = vsub.f32 %v77_v59, %v146_v60  ;;  %v283_v8 = vand.u32 2147483647, %v214_v61 }
  0x6b   :  { %v338_v18 = vadd.f32 %v337_v13, %v270_v7  ;;  %v216_v7 = vsub.f32 %v78_v0, %v147_v1  ;;  %v284_v13 = vand.u32 2147483647, %v215_v2 }
  0x6d   :  { %v339_v23 = vadd.f32 %v338_v18, %v271_v12  ;;  %v217_v12 = vsub.f32 %v79_v5, %v148_v6  ;;  %v285_v16 = vand.u32 2147483647, %v216_v7 }
  0x6f   :  { %v340_v28 = vadd.f32 %v339_v23, %v272_v17  ;;  %v286_v18 = vand.u32 2147483647, %v217_v12 }
  0x71   :  { %v341_v33 = vadd.f32 %v340_v28, %v273_v22 }
  0x73   :  { %v342_v38 = vadd.f32 %v341_v33, %v274_v27 }
  0x75   :  { %v343_v43 = vadd.f32 %v342_v38, %v275_v32 }
  0x77   :  { %v344_v48 = vadd.f32 %v343_v43, %v276_v37 }
  0x79   :  { %v345_v53 = vadd.f32 %v344_v48, %v277_v42 }
  0x7b   :  { %v346_v58 = vadd.f32 %v345_v53, %v278_v47 }
  0x7d   :  { %v347_v63 = vadd.f32 %v346_v58, %v279_v52 }
  0x7f   :  { %v348_v4 = vadd.f32 %v347_v63, %v280_v57 }
  0x81   :  { %v349_v9 = vadd.f32 %v348_v4, %v281_v62 }
  0x83   :  { %v350_v14 = vadd.f32 %v349_v9, %v282_v3 }
  0x85   :  { %v351_v17 = vadd.f32 %v350_v14, %v283_v8 }
  0x87   :  { %v352_v19 = vadd.f32 %v351_v17, %v284_v13 }
  0x89   :  { %v353_v21 = vadd.f32 %v352_v19, %v285_v16 }
  0x8b   :  { %v354_v22 = vadd.f32 %v353_v21, %v286_v18 }
  0x8d   :  { %v355_v23 = vadd.f32 %v354_v22, %v287_v20 }
  0x8f   :  { %356 = vadd.xlane.f32.xlu0 %v355_v23 }
 0x11c   :  { %v357_v24 = vpop.xlane.xlu0 %356 }
 0x11d   :  { %v358_v25 = vrot.slane %v357_v24, 4 }
 0x11f   :  { %v359_v26 = vadd.f32 %v358_v25, %v357_v24 }
 0x121   :  { %v360_v27 = vrot.slane %v359_v26, 2 }
 0x123   :  { %v361_v28 = vadd.f32 %v360_v27, %v359_v26 }
 0x125   :  { %v362_v29 = vrot.slane %v361_v28, 1 }
 0x127   :  { %v363_v30 = vadd.f32 %v362_v29, %v361_v28 }
 0x129   :  { %382 = vpush %v363_v30 }
 0x15a   :  { %s383_s5 = spop %382 }
 0x15b   :  { %v365_v31 = vstv %s383_s5 }
 0x15c   :  { %367 = vst.msk [vmem:[#allocation2] sm:$0x1] %vm366_vm0, %v365_v31 }
 0x15d   :  { %396 = shalt.err (!%p393_p4)
}
 0x15e   :  { %s397_s10 = scalar_lea.hbm %s853_s2, 16 }
 0x15f   :  { %p398_p5 = scmp.ne.s32.totalorder %s853_s2, %s397_s10  ;;  %p401_p6 = scmp.lt.u32.totalorder %s397_s10, %s853_s2 }
 0x161   :  { %p403_p7 = pnand %p401_p6, %p398_p5 }
 0x163   :  { %406 = shalt.err (!%p403_p7)
}
 0x164   :  { %377 = dma.vmem_to_hbm [thread:$0]  %s375_s1, 16, %s853_s2, [#allocation3]  }
 0x165   :  { %407 = dma.done.wait [#allocation3], 16  }
 0x166   :  { %408 = vsyncadd [#allocation3], 4294967280 }
 0x167   :  { %381 = vsyncpa [#allocation3], 1 }

</bundles_post_ra>
